<compile_context>
chip_gen: v5e
topology: v5e:2x2
jax: 0.10.0
libtpu: 0.0.40
codegen_flags: <defaults>
</compile_context>

<pallas_src>
import functools

import jax
import jax.numpy as jnp
from jax.experimental import pallas as pl
from jax.experimental.pallas import tpu as pltpu


_VMEM_LIMIT = 64 * 1024 * 1024  # fits every generation incl. v7x (64 MiB/TC)


def _cp(semantics):
    return pltpu.CompilerParams(dimension_semantics=semantics,
                                vmem_limit_bytes=_VMEM_LIMIT)


# ----------------------------------------------------------------------------
# Kernels
# ----------------------------------------------------------------------------
def conv3x3_bn_relu_kernel(xp_ref, w_ref, scale_ref, bias_ref, o_ref, acc_ref,
                           *, H, W):
    # xp_ref:    (H+2, W+2, tk)  padded-image Cin-slice (batch dim squeezed)
    # w_ref:     (9*tk, tj)      k-block of the 3x3 weight, rows ordered
    #                            (tap, cin_within_block)
    # scale_ref: (1, tj)  bias_ref: (1, tj)   folded BatchNorm (f32)
    # o_ref:     (H*W, tj)
    # acc_ref:   (H*W, tj) f32 scratch accumulator (persists across k)
    k = pl.program_id(2)

    @pl.when(k == 0)
    def _():
        acc_ref[...] = jnp.zeros_like(acc_ref)

    xp = xp_ref[...]
    tk = xp.shape[-1]
    # Form the nine 3x3 taps in VMEM and contract them in one long-K matmul.
    taps = [xp[dy:dy + H, dx:dx + W, :].reshape(H * W, tk)
            for dy in range(3) for dx in range(3)]
    x_cat = jnp.concatenate(taps, axis=-1)                 # (H*W, 9*tk)
    acc_ref[...] += jnp.dot(x_cat, w_ref[...],
                            preferred_element_type=jnp.float32)

    @pl.when(k == pl.num_programs(2) - 1)
    def _():
        y = acc_ref[...] * scale_ref[...] + bias_ref[...]
        o_ref[...] = jnp.maximum(y, 0.0).astype(o_ref.dtype)


def conv3x3_bn_relu_cls_kernel(xp_ref, w_ref, scale_ref, bias_ref,
                               wcls_ref, bcls_ref, o_ref, acc_ref, *, H, W):
    # Same as conv3x3_bn_relu_kernel but the epilogue also applies the fused
    # 1x1 classifier (lane-padded output channels).  Dropout2d is identity.
    k = pl.program_id(1)

    @pl.when(k == 0)
    def _():
        acc_ref[...] = jnp.zeros_like(acc_ref)

    xp = xp_ref[...]
    tk = xp.shape[-1]
    taps = [xp[dy:dy + H, dx:dx + W, :].reshape(H * W, tk)
            for dy in range(3) for dx in range(3)]
    x_cat = jnp.concatenate(taps, axis=-1)
    acc_ref[...] += jnp.dot(x_cat, w_ref[...],
                            preferred_element_type=jnp.float32)

    @pl.when(k == pl.num_programs(1) - 1)
    def _():
        h = jnp.maximum(acc_ref[...] * scale_ref[...] + bias_ref[...], 0.0)
        y = jnp.dot(h.astype(wcls_ref.dtype), wcls_ref[...],
                    preferred_element_type=jnp.float32) + bcls_ref[...]
        o_ref[...] = y.astype(o_ref.dtype)


def pam_kernel(xq_ref, xkv_ref, wq_ref, bq_ref, wkv_ref, bkv_ref, o_ref,
               q_s, m_s, l_s, acc_s, *, qp):
    # Flash-style Position Attention Module.
    # xq_ref:  (tq, C)   query-row slab (resident across kv steps)
    # xkv_ref: (tkv, C)  current key/value-row slab
    # wq_ref:  (C, qp)        zero-padded query projection
    # wkv_ref: (C, qp + C)    fused [zero-padded key | gamma*value] projection
    # o_ref:   (tq, C)
    # scratches: q_s (tq, qp), m_s/l_s (tq, 1), acc_s (tq, C)   all f32
    ki = pl.program_id(2)
    cdt = xq_ref.dtype

    @pl.when(ki == 0)
    def _():
        q_s[...] = jnp.dot(xq_ref[...], wq_ref[...],
                           preferred_element_type=jnp.float32) + bq_ref[...]
        m_s[...] = jnp.full_like(m_s, -jnp.inf)
        l_s[...] = jnp.zeros_like(l_s)
        acc_s[...] = jnp.zeros_like(acc_s)

    kv = jnp.dot(xkv_ref[...], wkv_ref[...],
                 preferred_element_type=jnp.float32) + bkv_ref[...]
    kk = kv[:, :qp]              # (tkv, qp)  zero-padded keys
    v = kv[:, qp:]               # (tkv, C)   gamma-scaled values

    # energy[i, j] = q_i . k_j  (zero padding contributes nothing)
    s = jax.lax.dot_general(q_s[...].astype(cdt), kk.astype(cdt),
                            (((1,), (1,)), ((), ())),
                            preferred_element_type=jnp.float32)   # (tq, tkv)
    m_new = jnp.maximum(m_s[...], jnp.max(s, axis=-1, keepdims=True))
    alpha = jnp.exp(m_s[...] - m_new)
    p = jnp.exp(s - m_new)
    l_s[...] = alpha * l_s[...] + jnp.sum(p, axis=-1, keepdims=True)
    acc_s[...] = alpha * acc_s[...] + jnp.dot(
        p.astype(cdt), v.astype(cdt), preferred_element_type=jnp.float32)
    m_s[...] = m_new

    @pl.when(ki == pl.num_programs(2) - 1)
    def _():
        out = acc_s[...] * pl.reciprocal(l_s[...], approx=True)
        o_ref[...] = (out + xq_ref[...].astype(jnp.float32)).astype(o_ref.dtype)


# ----------------------------------------------------------------------------
# Wrappers (layout / padding / weight re-blocking only)
# ----------------------------------------------------------------------------
def _block_conv_weight(w9, tk, dtype):
    # (9, Cin, Cout) -> (Cin//tk, 9*tk, Cout): rows of k-block ordered
    # (tap, cin_within_block), matching the in-kernel tap concatenation.
    _, cin, cout = w9.shape
    nk = cin // tk
    return (w9.reshape(9, nk, tk, cout).transpose(1, 0, 2, 3)
            .reshape(nk, 9 * tk, cout).astype(dtype))


def _pad_lanes(a, lanes, dtype):
    out = jnp.zeros(a.shape[:-1] + (lanes,), dtype)
    return out.at[..., :a.shape[-1]].set(a.astype(dtype))


def conv3x3_bn_relu(x_nhwc, w9, scale, bias, *, tk=256, tj=512,
                    compute_dtype=jnp.float32):
    B, H, W, Cin = x_nhwc.shape
    Cout = w9.shape[-1]
    tk = min(tk, Cin)
    tj = min(tj, Cout)
    assert Cin % tk == 0 and Cout % tj == 0
    nk, nj = Cin // tk, Cout // tj
    N = H * W

    xp = jnp.pad(x_nhwc, ((0, 0), (1, 1), (1, 1), (0, 0))).astype(compute_dtype)
    wb = _block_conv_weight(w9, tk, compute_dtype)

    out = pl.pallas_call(
        functools.partial(conv3x3_bn_relu_kernel, H=H, W=W),
        out_shape=jax.ShapeDtypeStruct((B, N, Cout), compute_dtype),
        grid=(B, nj, nk),
        in_specs=[
            pl.BlockSpec((None, H + 2, W + 2, tk), lambda b, j, k: (b, 0, 0, k)),
            pl.BlockSpec((None, 9 * tk, tj), lambda b, j, k: (k, 0, j)),
            pl.BlockSpec((1, tj), lambda b, j, k: (0, j)),
            pl.BlockSpec((1, tj), lambda b, j, k: (0, j)),
        ],
        out_specs=pl.BlockSpec((None, N, tj), lambda b, j, k: (b, 0, j)),
        scratch_shapes=[pltpu.VMEM((N, tj), jnp.float32)],
        compiler_params=_cp(("parallel", "parallel", "arbitrary")),
    )(xp, wb, scale.reshape(1, Cout).astype(jnp.float32),
      bias.reshape(1, Cout).astype(jnp.float32))
    return out.reshape(B, H, W, Cout)


def conv3x3_bn_relu_cls(x_nhwc, w9, scale, bias, wcls, bcls, *, tk=256,
                        compute_dtype=jnp.float32):
    B, H, W, Cin = x_nhwc.shape
    Cout = w9.shape[-1]
    ncls = wcls.shape[-1]
    Cp = -(-ncls // 128) * 128            # lane-dense (padded) classifier out
    tk = min(tk, Cin)
    assert Cin % tk == 0
    nk = Cin // tk
    N = H * W

    xp = jnp.pad(x_nhwc, ((0, 0), (1, 1), (1, 1), (0, 0))).astype(compute_dtype)
    wb = _block_conv_weight(w9, tk, compute_dtype)
    wcls_p = _pad_lanes(wcls, Cp, compute_dtype)
    bcls_p = _pad_lanes(bcls.reshape(1, ncls), Cp, jnp.float32)

    out = pl.pallas_call(
        functools.partial(conv3x3_bn_relu_cls_kernel, H=H, W=W),
        out_shape=jax.ShapeDtypeStruct((B, N, Cp), jnp.float32),
        grid=(B, nk),
        in_specs=[
            pl.BlockSpec((None, H + 2, W + 2, tk), lambda b, k: (b, 0, 0, k)),
            pl.BlockSpec((None, 9 * tk, Cout), lambda b, k: (k, 0, 0)),
            pl.BlockSpec((1, Cout), lambda b, k: (0, 0)),
            pl.BlockSpec((1, Cout), lambda b, k: (0, 0)),
            pl.BlockSpec((Cout, Cp), lambda b, k: (0, 0)),
            pl.BlockSpec((1, Cp), lambda b, k: (0, 0)),
        ],
        out_specs=pl.BlockSpec((None, N, Cp), lambda b, k: (b, 0, 0)),
        scratch_shapes=[pltpu.VMEM((N, Cout), jnp.float32)],
        compiler_params=_cp(("parallel", "arbitrary")),
    )(xp, wb, scale.reshape(1, Cout).astype(jnp.float32),
      bias.reshape(1, Cout).astype(jnp.float32), wcls_p, bcls_p)
    return out[:, :, :ncls].reshape(B, H, W, ncls)


def pam(x_nhwc, wq, bq, wk, bk, wv, bv, gamma, *, tq=256, tkv=256,
        compute_dtype=jnp.float32):
    B, H, W, C = x_nhwc.shape
    C8 = wq.shape[-1]
    N = H * W
    tq = min(tq, N)
    tkv = min(tkv, N)
    assert N % tq == 0 and N % tkv == 0
    nq, nkv = N // tq, N // tkv
    QP = -(-C8 // 128) * 128              # lane-dense (zero-padded) q/k width

    xf = x_nhwc.reshape(B, N, C).astype(compute_dtype)
    g = gamma.astype(jnp.float32).reshape(())
    # Zero-pad q/k projections to 128 lanes; fold gamma into the value
    # projection (exact, since softmax rows sum to one); fuse K|V weights.
    wq_p = _pad_lanes(wq, QP, compute_dtype)
    bq_p = _pad_lanes(bq.reshape(1, C8), QP, jnp.float32)
    wk_p = _pad_lanes(wk, QP, compute_dtype)
    bk_p = _pad_lanes(bk.reshape(1, C8), QP, jnp.float32)
    wkv = jnp.concatenate([wk_p, (wv * g).astype(compute_dtype)], axis=1)
    bkv = jnp.concatenate(
        [bk_p, (bv * g).reshape(1, C).astype(jnp.float32)], axis=1)

    out = pl.pallas_call(
        functools.partial(pam_kernel, qp=QP),
        out_shape=jax.ShapeDtypeStruct((B, N, C), compute_dtype),
        grid=(B, nq, nkv),
        in_specs=[
            pl.BlockSpec((None, tq, C), lambda b, qi, ki: (b, qi, 0)),
            pl.BlockSpec((None, tkv, C), lambda b, qi, ki: (b, ki, 0)),
            pl.BlockSpec((C, QP), lambda b, qi, ki: (0, 0)),
            pl.BlockSpec((1, QP), lambda b, qi, ki: (0, 0)),
            pl.BlockSpec((C, QP + C), lambda b, qi, ki: (0, 0)),
            pl.BlockSpec((1, QP + C), lambda b, qi, ki: (0, 0)),
        ],
        out_specs=pl.BlockSpec((None, tq, C), lambda b, qi, ki: (b, qi, 0)),
        scratch_shapes=[
            pltpu.VMEM((tq, QP), jnp.float32),   # q
            pltpu.VMEM((tq, 1), jnp.float32),    # running max
            pltpu.VMEM((tq, 1), jnp.float32),    # running denom
            pltpu.VMEM((tq, C), jnp.float32),    # output accumulator
        ],
        compiler_params=_cp(("parallel", "parallel", "arbitrary")),
    )(xf, xf, wq_p, bq_p, wkv, bkv)
    return out.reshape(B, H, W, C)


def base_forward(x_nchw, params, *, compute_dtype=jnp.float32,
                 conv_tk=256, pam_tile=256):
    # Mirrors Base.forward: conv5a -> my_pam -> conv51 -> [dropout] -> 1x1 conv
    # TODO(synk): training-mode Dropout2d(0.1) is not implemented (eval = id).
    # TODO(synk): for very large H*W on v7x, additionally tile the convs over
    #             spatial rows (halo exchange) to feed both TensorCores.
    x = jnp.transpose(x_nchw, (0, 2, 3, 1))  # NCHW -> NHWC
    x = conv3x3_bn_relu(x, params["w5a"], params["bn1_s"], params["bn1_b"],
                        tk=conv_tk, compute_dtype=compute_dtype)
    x = pam(x, params["wq"], params["bq"], params["wk"], params["bk"],
            params["wv"], params["bv"], params["gamma"],
            tq=pam_tile, tkv=pam_tile, compute_dtype=compute_dtype)
    x = conv3x3_bn_relu_cls(x, params["w51"], params["bn2_s"], params["bn2_b"],
                            params["wcls"], params["bcls"],
                            tk=conv_tk, compute_dtype=compute_dtype)
    return jnp.transpose(x, (0, 3, 1, 2))  # NHWC -> NCHW


# ----------------------------------------------------------------------------
# Pure-JAX reference (for correctness check)
# ----------------------------------------------------------------------------
def ref_forward(x_nchw, p):
    x = jnp.transpose(x_nchw, (0, 2, 3, 1))

    def conv3(x, w9, s, b):
        B, H, W, _ = x.shape
        xp = jnp.pad(x, ((0, 0), (1, 1), (1, 1), (0, 0)))
        acc = 0.0
        for dy in range(3):
            for dx in range(3):
                acc = acc + jnp.einsum("bhwc,cd->bhwd",
                                       xp[:, dy:dy + H, dx:dx + W, :],
                                       w9[dy * 3 + dx])
        return jnp.maximum(acc * s + b, 0.0)

    def pam_ref(x):
        B, H, W, C = x.shape
        xf = x.reshape(B, H * W, C)
        q = xf @ p["wq"] + p["bq"]
        k = xf @ p["wk"] + p["bk"]
        v = xf @ p["wv"] + p["bv"]
        e = jnp.einsum("bnc,bmc->bnm", q, k)
        a = jax.nn.softmax(e, axis=-1)
        o = jnp.einsum("bnm,bmc->bnc", a, v)
        return (p["gamma"][0] * o + xf).reshape(B, H, W, C)

    x = conv3(x, p["w5a"], p["bn1_s"], p["bn1_b"])
    x = pam_ref(x)
    x = conv3(x, p["w51"], p["bn2_s"], p["bn2_b"])
    x = x @ p["wcls"] + p["bcls"]
    return jnp.transpose(x, (0, 3, 1, 2))


# ----------------------------------------------------------------------------
if __name__ == "__main__":
    # Scaled-down analogue of the module (in_channels=2048 -> 256,
    # inter = in_channels // 4, query/key dim = inter // 8).
    B, H, W = 2, 16, 16
    in_channels = 256
    inter = in_channels // 4      # 64
    c8 = inter // 8               # 8
    num_classes = 5

    key = jax.random.PRNGKey(0)
    ks = jax.random.split(key, 12)

    def kaiming(k, shape, fan_in):
        return jax.random.normal(k, shape, jnp.float32) * jnp.sqrt(2.0 / fan_in)

    eps = 1e-5
    bn_scale = jnp.full((inter,), 1.0 / jnp.sqrt(1.0 + eps), jnp.float32)
    bn_bias = jnp.zeros((inter,), jnp.float32)

    params = {
        "w5a": kaiming(ks[1], (9, in_channels, inter), 9 * in_channels),
        "bn1_s": bn_scale, "bn1_b": bn_bias,
        "wq": kaiming(ks[2], (inter, c8), inter),
        "bq": jax.random.normal(ks[3], (c8,), jnp.float32) * 0.01,
        "wk": kaiming(ks[4], (inter, c8), inter),
        "bk": jax.random.normal(ks[5], (c8,), jnp.float32) * 0.01,
        "wv": kaiming(ks[6], (inter, inter), inter),
        "bv": jax.random.normal(ks[7], (inter,), jnp.float32) * 0.01,
        # TODO(synk): PAM's gamma is initialized to 0 in the original module;
        # use a nonzero deterministic value so the attention path is exercised.
        "gamma": jnp.array([0.5], jnp.float32),
        "w51": kaiming(ks[8], (9, inter, inter), 9 * inter),
        "bn2_s": bn_scale, "bn2_b": bn_bias,
        "wcls": kaiming(ks[9], (inter, num_classes), inter),
        "bcls": jax.random.normal(ks[10], (num_classes,), jnp.float32) * 0.01,
    }

    x = jax.random.normal(ks[0], (B, in_channels, H, W), jnp.float32)

    # Small tiles so the test exercises the Cin-accumulation loop and the
    # multi-step online-softmax path (production: tk=256, pam_tile=512,
    # bfloat16 on v6e/v7x).
    out = jax.block_until_ready(
        base_forward(x, params, conv_tk=128, pam_tile=128))
    assert out.shape == (B, num_classes, H, W), out.shape

    ref = jax.block_until_ready(ref_forward(x, params))
    if not bool(jnp.allclose(out, ref, rtol=2e-2, atol=2e-2)):
        raise SystemExit(
            f"mismatch, max abs err = {float(jnp.max(jnp.abs(out - ref)))}")

    # bfloat16 compute path (v6e/v7x MXU): make sure it lowers and runs.
    out_bf16 = jax.block_until_ready(
        base_forward(x, params, compute_dtype=jnp.bfloat16,
                     conv_tk=128, pam_tile=128))
    assert out_bf16.shape == (B, num_classes, H, W)
    assert bool(jnp.all(jnp.isfinite(out_bf16)))

    print("KERNEL_OK")
</pallas_src>

<mosaic_0001>
module attributes {stable_mosaic.version = 11 : i64} {
  func.func @conv3x3_bn_relu_kernel(%arg0: i32, %arg1: i32, %arg2: i32, %arg3: memref<1x18x18x128xf32, #tpu.memory_space<vmem>>, %arg4: memref<1x1152x64xf32, #tpu.memory_space<vmem>>, %arg5: memref<1x64xf32, #tpu.memory_space<vmem>>, %arg6: memref<1x64xf32, #tpu.memory_space<vmem>>, %arg7: memref<1x256x64xf32, #tpu.memory_space<vmem>>, %arg8: memref<256x64xf32, #tpu.memory_space<vmem>>) attributes {dimension_semantics = [#tpu.dimension_semantics<parallel>, #tpu.dimension_semantics<parallel>, #tpu.dimension_semantics<arbitrary>], iteration_bounds = array<i64: 2, 1, 2>, scalar_prefetch = 0 : i64, scratch_operands = 1 : i64, tpu.core_type = #tpu.core_type<tc>, window_params = [{transform_indices = @transform_0, window_bounds = array<i64: 1, 18, 18, 128>}, {transform_indices = @transform_1, window_bounds = array<i64: 1, 1152, 64>}, {transform_indices = @transform_2, window_bounds = array<i64: 1, 64>}, {transform_indices = @transform_3, window_bounds = array<i64: 1, 64>}, {transform_indices = @transform_4, window_bounds = array<i64: 1, 256, 64>}]} {
    %c0_i32 = arith.constant 0 : i32
    %0 = arith.cmpi eq, %arg2, %c0_i32 : i32
    %1 = arith.extui %0 : i1 to i32
    %c0_i32_0 = arith.constant 0 : i32
    %2 = arith.cmpi ne, %1, %c0_i32_0 : i32
    scf.if %2 {
      %cst_12 = arith.constant 0.000000e+00 : f32
      %33 = vector.broadcast %cst_12 : f32 to vector<256x64xf32>
      %c0_13 = arith.constant 0 : index
      %c0_14 = arith.constant 0 : index
      %34 = vector.load %arg8[%c0_13, %c0_14] : memref<256x64xf32, #tpu.memory_space<vmem>>, vector<256x64xf32>
      tpu.vector_store %arg8[%c0_13, %c0_14], %33 {strides = array<i32>} : memref<256x64xf32, #tpu.memory_space<vmem>>, vector<256x64xf32>,
    } else {
    }
    %c0 = arith.constant 0 : index
    %c0_1 = arith.constant 0 : index
    %c0_2 = arith.constant 0 : index
    %c0_3 = arith.constant 0 : index
    %3 = vector.load %arg3[%c0, %c0_1, %c0_2, %c0_3] : memref<1x18x18x128xf32, #tpu.memory_space<vmem>>, vector<1x18x18x128xf32>
    %4 = vector.shape_cast %3 : vector<1x18x18x128xf32> to vector<18x18x128xf32>
    %5 = vector.extract_strided_slice %4 {offsets = [0, 0, 0], sizes = [16, 16, 128], strides = [1, 1, 1]} : vector<18x18x128xf32> to vector<16x16x128xf32>
    %6 = vector.shape_cast %5 : vector<16x16x128xf32> to vector<256x128xf32>
    %7 = vector.extract_strided_slice %4 {offsets = [0, 1, 0], sizes = [16, 16, 128], strides = [1, 1, 1]} : vector<18x18x128xf32> to vector<16x16x128xf32>
    %8 = vector.shape_cast %7 : vector<16x16x128xf32> to vector<256x128xf32>
    %9 = vector.extract_strided_slice %4 {offsets = [0, 2, 0], sizes = [16, 16, 128], strides = [1, 1, 1]} : vector<18x18x128xf32> to vector<16x16x128xf32>
    %10 = vector.shape_cast %9 : vector<16x16x128xf32> to vector<256x128xf32>
    %11 = vector.extract_strided_slice %4 {offsets = [1, 0, 0], sizes = [16, 16, 128], strides = [1, 1, 1]} : vector<18x18x128xf32> to vector<16x16x128xf32>
    %12 = vector.shape_cast %11 : vector<16x16x128xf32> to vector<256x128xf32>
    %13 = vector.extract_strided_slice %4 {offsets = [1, 1, 0], sizes = [16, 16, 128], strides = [1, 1, 1]} : vector<18x18x128xf32> to vector<16x16x128xf32>
    %14 = vector.shape_cast %13 : vector<16x16x128xf32> to vector<256x128xf32>
    %15 = vector.extract_strided_slice %4 {offsets = [1, 2, 0], sizes = [16, 16, 128], strides = [1, 1, 1]} : vector<18x18x128xf32> to vector<16x16x128xf32>
    %16 = vector.shape_cast %15 : vector<16x16x128xf32> to vector<256x128xf32>
    %17 = vector.extract_strided_slice %4 {offsets = [2, 0, 0], sizes = [16, 16, 128], strides = [1, 1, 1]} : vector<18x18x128xf32> to vector<16x16x128xf32>
    %18 = vector.shape_cast %17 : vector<16x16x128xf32> to vector<256x128xf32>
    %19 = vector.extract_strided_slice %4 {offsets = [2, 1, 0], sizes = [16, 16, 128], strides = [1, 1, 1]} : vector<18x18x128xf32> to vector<16x16x128xf32>
    %20 = vector.shape_cast %19 : vector<16x16x128xf32> to vector<256x128xf32>
    %21 = vector.extract_strided_slice %4 {offsets = [2, 2, 0], sizes = [16, 16, 128], strides = [1, 1, 1]} : vector<18x18x128xf32> to vector<16x16x128xf32>
    %22 = vector.shape_cast %21 : vector<16x16x128xf32> to vector<256x128xf32>
    %23 = tpu.concatenate %6, %8, %10, %12, %14, %16, %18, %20, %22 in 1 : vector<256x128xf32>, vector<256x128xf32>, vector<256x128xf32>, vector<256x128xf32>, vector<256x128xf32>, vector<256x128xf32>, vector<256x128xf32>, vector<256x128xf32>, vector<256x128xf32> -> vector<256x1152xf32>
    %c0_4 = arith.constant 0 : index
    %c0_5 = arith.constant 0 : index
    %24 = vector.load %arg8[%c0_4, %c0_5] : memref<256x64xf32, #tpu.memory_space<vmem>>, vector<256x64xf32>
    %c0_6 = arith.constant 0 : index
    %c0_7 = arith.constant 0 : index
    %c0_8 = arith.constant 0 : index
    %25 = vector.load %arg4[%c0_6, %c0_7, %c0_8] : memref<1x1152x64xf32, #tpu.memory_space<vmem>>, vector<1x1152x64xf32>
    %26 = vector.shape_cast %25 : vector<1x1152x64xf32> to vector<1152x64xf32>
    %cst = arith.constant dense<0.000000e+00> : vector<256x64xf32>
    %27 = tpu.matmul %23, %26, %cst {dimension_numbers = #tpu.dot_dimension_numbers<[1], [0], [0], [1], [0, 0, 1, 1], [], []>} : vector<256x1152xf32>, vector<1152x64xf32>, vector<256x64xf32> -> vector<256x64xf32>
    %28 = arith.addf %24, %27 : vector<256x64xf32>
    %c0_9 = arith.constant 0 : index
    %c0_10 = arith.constant 0 : index
    %29 = vector.load %arg8[%c0_9, %c0_10] : memref<256x64xf32, #tpu.memory_space<vmem>>, vector<256x64xf32>
    tpu.vector_store %arg8[%c0_9, %c0_10], %28 {strides = array<i32>} : memref<256x64xf32, #tpu.memory_space<vmem>>, vector<256x64xf32>,
    %c1_i32 = arith.constant 1 : i32
    %30 = arith.cmpi eq, %arg2, %c1_i32 : i32
    %31 = arith.extui %30 : i1 to i32
    %c0_i32_11 = arith.constant 0 : i32
    %32 = arith.cmpi ne, %31, %c0_i32_11 : i32
    scf.if %32 {
      %c0_12 = arith.constant 0 : index
      %c0_13 = arith.constant 0 : index
      %33 = vector.load %arg8[%c0_12, %c0_13] : memref<256x64xf32, #tpu.memory_space<vmem>>, vector<256x64xf32>
      %c0_14 = arith.constant 0 : index
      %c0_15 = arith.constant 0 : index
      %34 = vector.load %arg5[%c0_14, %c0_15] : memref<1x64xf32, #tpu.memory_space<vmem>>, vector<1x64xf32>
      %35 = vector.broadcast %34 : vector<1x64xf32> to vector<256x64xf32>
      %36 = arith.mulf %33, %35 : vector<256x64xf32>
      %c0_16 = arith.constant 0 : index
      %c0_17 = arith.constant 0 : index
      %37 = vector.load %arg6[%c0_16, %c0_17] : memref<1x64xf32, #tpu.memory_space<vmem>>, vector<1x64xf32>
      %38 = vector.broadcast %37 : vector<1x64xf32> to vector<256x64xf32>
      %39 = arith.addf %36, %38 : vector<256x64xf32>
      %cst_18 = arith.constant 0.000000e+00 : f32
      %40 = vector.broadcast %cst_18 : f32 to vector<256x64xf32>
      %41 = arith.maximumf %39, %40 : vector<256x64xf32>
      %c0_19 = arith.constant 0 : index
      %c0_20 = arith.constant 0 : index
      %c0_21 = arith.constant 0 : index
      %42 = vector.load %arg7[%c0_19, %c0_20, %c0_21] : memref<1x256x64xf32, #tpu.memory_space<vmem>>, vector<1x256x64xf32>
      %43 = vector.shape_cast %42 : vector<1x256x64xf32> to vector<256x64xf32>
      %44 = vector.shape_cast %41 : vector<256x64xf32> to vector<1x256x64xf32>
      tpu.vector_store %arg7[%c0_19, %c0_20, %c0_21], %44 {strides = array<i32>} : memref<1x256x64xf32, #tpu.memory_space<vmem>>, vector<1x256x64xf32>,
    } else {
    }
    return
  }
  func.func @transform_0(%arg0: i32, %arg1: i32, %arg2: i32) -> (i32, i32, i32, i32) {
    %c0_i32 = arith.constant 0 : i32
    %c0_i32_0 = arith.constant 0 : i32
    %c0_i32_1 = arith.constant 0 : i32
    return %arg0, %c0_i32, %c0_i32_0, %arg2 : i32, i32, i32, i32
  }
  func.func @transform_1(%arg0: i32, %arg1: i32, %arg2: i32) -> (i32, i32, i32) {
    %c0_i32 = arith.constant 0 : i32
    %c0_i32_0 = arith.constant 0 : i32
    return %arg2, %c0_i32, %arg1 : i32, i32, i32
  }
  func.func @transform_2(%arg0: i32, %arg1: i32, %arg2: i32) -> (i32, i32) {
    %c0_i32 = arith.constant 0 : i32
    %c0_i32_0 = arith.constant 0 : i32
    return %c0_i32, %arg1 : i32, i32
  }
  func.func @transform_3(%arg0: i32, %arg1: i32, %arg2: i32) -> (i32, i32) {
    %c0_i32 = arith.constant 0 : i32
    %c0_i32_0 = arith.constant 0 : i32
    return %c0_i32, %arg1 : i32, i32
  }
  func.func @transform_4(%arg0: i32, %arg1: i32, %arg2: i32) -> (i32, i32, i32) {
    %c0_i32 = arith.constant 0 : i32
    %c0_i32_0 = arith.constant 0 : i32
    return %arg0, %c0_i32, %arg1 : i32, i32, i32
  }
}

</mosaic_0001>

<bundles_post_ra>
// kernel: tpu_custom_call.1
= control target key start
LH: loop header
LB: loop body
LE: loop exit
PB: predicated region body
PF: predicated region fallthrough
CT: control target
= control target key end

     0   :  { %s2735_s15 = smov 0   ;;  %s2737_s16 = smov 0   ;;  %s4143_s0 = inlined_call_operand.vmem [shape: f32[2,18,18,256], index: 0, kind: input, shape index: {}]   ;;  %s4144_s1 = inlined_call_operand.vmem [shape: f32[2,1152,64], index: 1, kind: input, shape index: {}]   ;;  %s4145_s2 = inlined_call_operand.vmem [shape: f32[1,64], index: 2, kind: input, shape index: {}]   ;;  %s4146_s3 = inlined_call_operand.vmem [shape: f32[1,64], index: 3, kind: input, shape index: {}]   ;;  %s4147_s4 = inlined_call_operand.vmem [shape: f32[2,256,64], index: 4, kind: output, shape index: {}]  }
   0x1   :  { %s2739_s17 = smov 0   ;;  %s2741_s18 = smov 0  }
   0x2   :  { %s2743_s19 = smov 0   ;;  %s2745_s20 = smov 0  }
   0x3   :  { %s2747_s21 = smov 0  }
   0x4 LB: > { %s26_s22 = sadd.s32 1, %s2699_s19  ;;  %s33_s23 = sadd.s32 1, %s2703_s20  ;;  %s2707_s21 = sphi %s2747_s21, %s14_s21   ;;  %s2703_s20 = sphi %s2745_s20, %s4297_s20   ;;  %s2699_s19 = sphi %s2743_s19, %s4296_s19   ;;  %s2695_s18 = sphi %s2741_s18, %s4295_s18   ;;  %s2691_s17 = sphi %s2739_s17, %s4294_s17   ;;  %s2687_s16 = sphi %s2737_s16, %s4293_s16   ;;  %s2683_s15 = sphi %s2735_s15, %s4292_s15  }
   0x5   : > { %p27_p0 = scmp.ge.s32.totalorder %s26_s22, 2  ;;  %p49_p1 = scmp.ne.s32.totalorder %s2687_s16, %s2683_s15 }
   0x6   : > { %p50_p2 = scmp.eq.s32.totalorder %s2707_s21, 0  ;;  %s42_s27 = sadd.s32 1, %s2687_s16 }
   0x7   : > { %s4299_s22 = smov (%p27_p0, %s26_s22), 0  ;;  %s4301_s23 = smov (!%p27_p0, %s33_s23), %s2703_s20 }
   0x8   : > { %p51_p3 = por %p50_p2, %p49_p1  ;;  %p35_p4 = scmp.ge.s32.totalorder %s4301_s23, 2 }
   0x9   : > { %s38_s24 = ssub.s32 %s2699_s19, %s4299_s22  ;;  %p2503_p6 = scmp.ge.s32.totalorder %s2707_s21, 4 }
   0xa   : > { %s4303_s23 = smov (%p35_p4, %s4301_s23), 0 }
   0xb   : > { %s37_s25 = ssub.s32 %s2703_s20, %s4303_s23  ;;  %195 = sbr.rel (%p2503_p6) target bundleno = 77 (0x4d), region = 24 }
   0xc   : > { %s39_s26 = sor.u32 %s38_s24, %s37_s25 }
   0xd   : > { %p40_p5 = scmp.eq.s32.totalorder %s39_s26, 0 }
   0xf   : > { %s2786_s28 = scalar_select %p40_p5, %s2687_s16, %s42_s27  }
  0x10   : > { %198 = sbr.rel (!%p51_p3) target bundleno = 77 (0x4d), region = 28  ;;  %s200_s29 = sand.u32 (%p51_p3), 1, %s2687_s16  }
  0x11   : > { %s2563_s30 = smul.u32 (%p51_p3), 108, %s2703_s20 }
  0x12   : > { %s2562_s5 = smul.u32 (%p51_p3), 432, %s200_s29 }
  0x13   : > { %s204_s6 = sadd.s32 (%p51_p3), %s2699_s19, %s2563_s30 }
  0x14   : > { %s2504_s7 = sshll.u32 (%p51_p3), %s204_s6, 3  ;;  %s2800_s11 = scalar_lea.vmem (%p51_p3), [#allocation3], %s2562_s5 }
  0x15   : > { %s2795_s10 = scalar_lea.vmem %s4143_s0, %s2504_s7 }
  0x16   : > { %v341_v0 = vld [vmem:[%s2795_s10] sm:$0xff]  ;;  %v343_v1 = vld [vmem:[%s2795_s10 + $0x10] sm:$0xff] }
  0x17   : > { %v345_v2 = vld [vmem:[%s2795_s10 + $0x20] sm:$0xff]  ;;  %342 = vst [vmem:[%s2800_s11] sm:$0xff] %v341_v0  ;;  %v347_v3 = vld [vmem:[%s2795_s10 + $0x30] sm:$0xff] }
  0x18   : > { %344 = vst [vmem:[%s2800_s11 + $0x8] sm:$0xff] %v343_v1  ;;  %v349_v4 = vld [vmem:[%s2795_s10 + $0x40] sm:$0xff]  ;;  %v351_v5 = vld [vmem:[%s2795_s10 + $0x50] sm:$0xff] }
  0x19   : > { %346 = vst [vmem:[%s2800_s11 + $0x10] sm:$0xff] %v345_v2  ;;  %v353_v6 = vld [vmem:[%s2795_s10 + $0x60] sm:$0xff]  ;;  %v355_v7 = vld [vmem:[%s2795_s10 + $0x70] sm:$0xff] }
  0x1a   : > { %348 = vst [vmem:[%s2800_s11 + $0x18] sm:$0xff] %v347_v3  ;;  %v357_v8 = vld [vmem:[%s2795_s10 + $0x80] sm:$0xff]  ;;  %v359_v9 = vld [vmem:[%s2795_s10 + $0x90] sm:$0xff] }
  0x1b   : > { %350 = vst [vmem:[%s2800_s11 + $0x20] sm:$0xff] %v349_v4  ;;  %v361_v10 = vld [vmem:[%s2795_s10 + $0xa0] sm:$0xff]  ;;  %v363_v11 = vld [vmem:[%s2795_s10 + $0xb0] sm:$0xff] }
  0x1c   : > { %352 = vst [vmem:[%s2800_s11 + $0x28] sm:$0xff] %v351_v5  ;;  %v365_v12 = vld [vmem:[%s2795_s10 + $0xc0] sm:$0xff]  ;;  %v367_v13 = vld [vmem:[%s2795_s10 + $0xd0] sm:$0xff] }
  0x1d   : > { %354 = vst [vmem:[%s2800_s11 + $0x30] sm:$0xff] %v353_v6  ;;  %v369_v14 = vld [vmem:[%s2795_s10 + $0xe0] sm:$0xff]  ;;  %v371_v15 = vld [vmem:[%s2795_s10 + $0xf0] sm:$0xff] }
  0x1e   : > { %356 = vst [vmem:[%s2800_s11 + $0x38] sm:$0xff] %v355_v7  ;;  %v373_v16 = vld [vmem:[%s2795_s10 + $0x100] sm:$0xff]  ;;  %v375_v17 = vld [vmem:[%s2795_s10 + $0x110] sm:$0xff] }
  0x1f   : > { %358 = vst [vmem:[%s2800_s11 + $0x40] sm:$0xff] %v357_v8  ;;  %v377_v18 = vld [vmem:[%s2795_s10 + $0x120] sm:$0xff]  ;;  %v379_v19 = vld [vmem:[%s2795_s10 + $0x130] sm:$0xff] }
  0x20   : > { %360 = vst [vmem:[%s2800_s11 + $0x48] sm:$0xff] %v359_v9  ;;  %v381_v20 = vld [vmem:[%s2795_s10 + $0x140] sm:$0xff]  ;;  %v383_v21 = vld [vmem:[%s2795_s10 + $0x150] sm:$0xff] }
  0x21   : > { %362 = vst [vmem:[%s2800_s11 + $0x50] sm:$0xff] %v361_v10  ;;  %v385_v22 = vld [vmem:[%s2795_s10 + $0x160] sm:$0xff]  ;;  %v387_v23 = vld [vmem:[%s2795_s10 + $0x170] sm:$0xff] }
  0x22   : > { %364 = vst [vmem:[%s2800_s11 + $0x58] sm:$0xff] %v363_v11  ;;  %v389_v24 = vld [vmem:[%s2795_s10 + $0x180] sm:$0xff]  ;;  %v391_v25 = vld [vmem:[%s2795_s10 + $0x190] sm:$0xff] }
  0x23   : > { %366 = vst [vmem:[%s2800_s11 + $0x60] sm:$0xff] %v365_v12  ;;  %v393_v26 = vld [vmem:[%s2795_s10 + $0x1a0] sm:$0xff]  ;;  %v395_v27 = vld [vmem:[%s2795_s10 + $0x1b0] sm:$0xff] }
  0x24   : > { %368 = vst [vmem:[%s2800_s11 + $0x68] sm:$0xff] %v367_v13  ;;  %v397_v28 = vld [vmem:[%s2795_s10 + $0x1c0] sm:$0xff]  ;;  %v399_v29 = vld [vmem:[%s2795_s10 + $0x1d0] sm:$0xff] }
  0x25   : > { %370 = vst [vmem:[%s2800_s11 + $0x70] sm:$0xff] %v369_v14  ;;  %v401_v30 = vld [vmem:[%s2795_s10 + $0x1e0] sm:$0xff]  ;;  %v403_v31 = vld [vmem:[%s2795_s10 + $0x1f0] sm:$0xff] }
  0x26   : > { %372 = vst [vmem:[%s2800_s11 + $0x78] sm:$0xff] %v371_v15  ;;  %v405_v32 = vld [vmem:[%s2795_s10 + $0x200] sm:$0xff]  ;;  %v407_v33 = vld [vmem:[%s2795_s10 + $0x210] sm:$0xff] }
  0x27   : > { %374 = vst [vmem:[%s2800_s11 + $0x80] sm:$0xff] %v373_v16  ;;  %v409_v34 = vld [vmem:[%s2795_s10 + $0x220] sm:$0xff]  ;;  %v411_v35 = vld [vmem:[%s2795_s10 + $0x230] sm:$0xff] }
  0x28   : > { %376 = vst [vmem:[%s2800_s11 + $0x88] sm:$0xff] %v375_v17  ;;  %v413_v36 = vld [vmem:[%s2795_s10 + $0x240] sm:$0xff]  ;;  %v415_v37 = vld [vmem:[%s2795_s10 + $0x250] sm:$0xff] }
  0x29   : > { %378 = vst [vmem:[%s2800_s11 + $0x90] sm:$0xff] %v377_v18  ;;  %v417_v38 = vld [vmem:[%s2795_s10 + $0x260] sm:$0xff]  ;;  %v419_v39 = vld [vmem:[%s2795_s10 + $0x270] sm:$0xff] }
  0x2a   : > { %380 = vst [vmem:[%s2800_s11 + $0x98] sm:$0xff] %v379_v19  ;;  %v421_v40 = vld [vmem:[%s2795_s10 + $0x280] sm:$0xff]  ;;  %v423_v41 = vld [vmem:[%s2795_s10 + $0x290] sm:$0xff] }
  0x2b   : > { %382 = vst [vmem:[%s2800_s11 + $0xa0] sm:$0xff] %v381_v20  ;;  %v425_v42 = vld [vmem:[%s2795_s10 + $0x2a0] sm:$0xff]  ;;  %v427_v43 = vld [vmem:[%s2795_s10 + $0x2b0] sm:$0xff] }
  0x2c   : > { %384 = vst [vmem:[%s2800_s11 + $0xa8] sm:$0xff] %v383_v21  ;;  %v429_v44 = vld [vmem:[%s2795_s10 + $0x2c0] sm:$0xff]  ;;  %v431_v45 = vld [vmem:[%s2795_s10 + $0x2d0] sm:$0xff] }
  0x2d   : > { %386 = vst [vmem:[%s2800_s11 + $0xb0] sm:$0xff] %v385_v22  ;;  %v433_v46 = vld [vmem:[%s2795_s10 + $0x2e0] sm:$0xff]  ;;  %v435_v47 = vld [vmem:[%s2795_s10 + $0x2f0] sm:$0xff] }
  0x2e   : > { %388 = vst [vmem:[%s2800_s11 + $0xb8] sm:$0xff] %v387_v23  ;;  %v437_v48 = vld [vmem:[%s2795_s10 + $0x300] sm:$0xff]  ;;  %v439_v49 = vld [vmem:[%s2795_s10 + $0x310] sm:$0xff] }
  0x2f   : > { %390 = vst [vmem:[%s2800_s11 + $0xc0] sm:$0xff] %v389_v24  ;;  %v441_v50 = vld [vmem:[%s2795_s10 + $0x320] sm:$0xff]  ;;  %v443_v51 = vld [vmem:[%s2795_s10 + $0x330] sm:$0xff] }
  0x30   : > { %392 = vst [vmem:[%s2800_s11 + $0xc8] sm:$0xff] %v391_v25  ;;  %v445_v52 = vld [vmem:[%s2795_s10 + $0x340] sm:$0xff]  ;;  %v447_v53 = vld [vmem:[%s2795_s10 + $0x350] sm:$0xff] }
  0x31   : > { %394 = vst [vmem:[%s2800_s11 + $0xd0] sm:$0xff] %v393_v26 }
  0x32   : > { %396 = vst [vmem:[%s2800_s11 + $0xd8] sm:$0xff] %v395_v27 }
  0x33   : > { %398 = vst [vmem:[%s2800_s11 + $0xe0] sm:$0xff] %v397_v28 }
  0x34   : > { %400 = vst [vmem:[%s2800_s11 + $0xe8] sm:$0xff] %v399_v29 }
  0x35   : > { %402 = vst [vmem:[%s2800_s11 + $0xf0] sm:$0xff] %v401_v30 }
  0x36   : > { %404 = vst [vmem:[%s2800_s11 + $0xf8] sm:$0xff] %v403_v31 }
  0x37   : > { %406 = vst [vmem:[%s2800_s11 + $0x100] sm:$0xff] %v405_v32 }
  0x38   : > { %408 = vst [vmem:[%s2800_s11 + $0x108] sm:$0xff] %v407_v33 }
  0x39   : > { %410 = vst [vmem:[%s2800_s11 + $0x110] sm:$0xff] %v409_v34 }
  0x3a   : > { %412 = vst [vmem:[%s2800_s11 + $0x118] sm:$0xff] %v411_v35 }
  0x3b   : > { %414 = vst [vmem:[%s2800_s11 + $0x120] sm:$0xff] %v413_v36 }
  0x3c   : > { %416 = vst [vmem:[%s2800_s11 + $0x128] sm:$0xff] %v415_v37 }
  0x3d   : > { %418 = vst [vmem:[%s2800_s11 + $0x130] sm:$0xff] %v417_v38 }
  0x3e   : > { %420 = vst [vmem:[%s2800_s11 + $0x138] sm:$0xff] %v419_v39 }
  0x3f   : > { %422 = vst [vmem:[%s2800_s11 + $0x140] sm:$0xff] %v421_v40 }
  0x40   : > { %424 = vst [vmem:[%s2800_s11 + $0x148] sm:$0xff] %v423_v41 }
  0x41   : > { %426 = vst [vmem:[%s2800_s11 + $0x150] sm:$0xff] %v425_v42 }
  0x42   : > { %428 = vst [vmem:[%s2800_s11 + $0x158] sm:$0xff] %v427_v43 }
  0x43   : > { %430 = vst [vmem:[%s2800_s11 + $0x160] sm:$0xff] %v429_v44 }
  0x44   : > { %432 = vst [vmem:[%s2800_s11 + $0x168] sm:$0xff] %v431_v45 }
  0x45   : > { %434 = vst [vmem:[%s2800_s11 + $0x170] sm:$0xff] %v433_v46 }
  0x46   : > { %436 = vst [vmem:[%s2800_s11 + $0x178] sm:$0xff] %v435_v47 }
  0x47   : > { %438 = vst [vmem:[%s2800_s11 + $0x180] sm:$0xff] %v437_v48 }
  0x48   : > { %440 = vst [vmem:[%s2800_s11 + $0x188] sm:$0xff] %v439_v49 }
  0x49   : > { %442 = vst [vmem:[%s2800_s11 + $0x190] sm:$0xff] %v441_v50 }
  0x4a   : > { %444 = vst [vmem:[%s2800_s11 + $0x198] sm:$0xff] %v443_v51 }
  0x4b   : > { %446 = vst [vmem:[%s2800_s11 + $0x1a0] sm:$0xff] %v445_v52 }
  0x4c   : > { %448 = vst [vmem:[%s2800_s11 + $0x1a8] sm:$0xff] %v447_v53 }
  0x4d PF: > { %p2505_p7 = scmp.ge.s32.totalorder %s2707_s21, 1  ;;  %p464_p8 = scmp.lt.s32.totalorder %s2707_s21, 5 }
  0x4f   : > { %p465_p9 = pnand %p2505_p7, %p464_p8 }
  0x51   : > { %468 = sbr.rel (%p465_p9) target bundleno = 912 (0x390), region = 70 }
  0x56   : > { %s471_s12 = sand.u32 1, %s2683_s15   ;;  %p513_p10 = scmp.lt.s32.totalorder %s2691_s17, 1 }
  0x57   : > { %s2564_s13 = smul.u32 432, %s471_s12  ;;  %p527_p11 = scmp.lt.s32.totalorder %s2695_s18, 1 }
  0x58   : > { %s514_s14 = scalar_select %p513_p10, %s2691_s17, 1 }
  0x59   : > { %s4305_s18 = smov (!%p527_p11, %s2695_s18), 1  ;;  %s2924_s7 = scalar_lea.vmem [#allocation3], %s2564_s13 }
  0x5a   : > { %s2565_s24 = smul.u32 1152, %s514_s14  ;;  %s2513_s29 = sshll.u32 %s4305_s18, 8 }
  0x5b   : > { %s2922_s6 = scalar_lea.vmem %s4147_s4, %s2513_s29  ;;  %p2509_p12 = scmp.ne.s32.totalorder %s2691_s17, 0 }
  0x5c   : > { %s2917_s27 = scalar_lea.vmem %s4144_s1, %s2565_s24 }
  0x5d   : > { %538 = sbr.rel (%p2509_p12) target bundleno = 131 (0x83), region = 78 }
  0x62   : > { %vm539_vm0 = vcmask 523264   ;;  %v2709_v54 = vmov 0.0  }
  0x63   : > { %540 = vst.msk [vmem:[#allocation2] sm:$0xff] %vm539_vm0, %v2709_v54 }
  0x64   : > { %541 = vst.msk [vmem:[#allocation2 + $0x8] sm:$0xff] %vm539_vm0, %v2709_v54 }
  0x65   : > { %542 = vst.msk [vmem:[#allocation2 + $0x10] sm:$0xff] %vm539_vm0, %v2709_v54 }
  0x66   : > { %543 = vst.msk [vmem:[#allocation2 + $0x18] sm:$0xff] %vm539_vm0, %v2709_v54 }
  0x67   : > { %544 = vst.msk [vmem:[#allocation2 + $0x20] sm:$0xff] %vm539_vm0, %v2709_v54 }
  0x68   : > { %545 = vst.msk [vmem:[#allocation2 + $0x28] sm:$0xff] %vm539_vm0, %v2709_v54 }
  0x69   : > { %546 = vst.msk [vmem:[#allocation2 + $0x30] sm:$0xff] %vm539_vm0, %v2709_v54 }
  0x6a   : > { %547 = vst.msk [vmem:[#allocation2 + $0x38] sm:$0xff] %vm539_vm0, %v2709_v54 }
  0x6b   : > { %548 = vst.msk [vmem:[#allocation2 + $0x40] sm:$0xff] %vm539_vm0, %v2709_v54 }
  0x6c   : > { %549 = vst.msk [vmem:[#allocation2 + $0x48] sm:$0xff] %vm539_vm0, %v2709_v54 }
  0x6d   : > { %550 = vst.msk [vmem:[#allocation2 + $0x50] sm:$0xff] %vm539_vm0, %v2709_v54 }
  0x6e   : > { %551 = vst.msk [vmem:[#allocation2 + $0x58] sm:$0xff] %vm539_vm0, %v2709_v54 }
  0x6f   : > { %552 = vst.msk [vmem:[#allocation2 + $0x60] sm:$0xff] %vm539_vm0, %v2709_v54 }
  0x70   : > { %553 = vst.msk [vmem:[#allocation2 + $0x68] sm:$0xff] %vm539_vm0, %v2709_v54 }
  0x71   : > { %554 = vst.msk [vmem:[#allocation2 + $0x70] sm:$0xff] %vm539_vm0, %v2709_v54 }
  0x72   : > { %555 = vst.msk [vmem:[#allocation2 + $0x78] sm:$0xff] %vm539_vm0, %v2709_v54 }
  0x73   : > { %556 = vst.msk [vmem:[#allocation2 + $0x80] sm:$0xff] %vm539_vm0, %v2709_v54 }
  0x74   : > { %557 = vst.msk [vmem:[#allocation2 + $0x88] sm:$0xff] %vm539_vm0, %v2709_v54 }
  0x75   : > { %558 = vst.msk [vmem:[#allocation2 + $0x90] sm:$0xff] %vm539_vm0, %v2709_v54 }
  0x76   : > { %559 = vst.msk [vmem:[#allocation2 + $0x98] sm:$0xff] %vm539_vm0, %v2709_v54 }
  0x77   : > { %560 = vst.msk [vmem:[#allocation2 + $0xa0] sm:$0xff] %vm539_vm0, %v2709_v54 }
  0x78   : > { %561 = vst.msk [vmem:[#allocation2 + $0xa8] sm:$0xff] %vm539_vm0, %v2709_v54 }
  0x79   : > { %562 = vst.msk [vmem:[#allocation2 + $0xb0] sm:$0xff] %vm539_vm0, %v2709_v54 }
  0x7a   : > { %563 = vst.msk [vmem:[#allocation2 + $0xb8] sm:$0xff] %vm539_vm0, %v2709_v54 }
  0x7b   : > { %564 = vst.msk [vmem:[#allocation2 + $0xc0] sm:$0xff] %vm539_vm0, %v2709_v54 }
  0x7c   : > { %565 = vst.msk [vmem:[#allocation2 + $0xc8] sm:$0xff] %vm539_vm0, %v2709_v54 }
  0x7d   : > { %566 = vst.msk [vmem:[#allocation2 + $0xd0] sm:$0xff] %vm539_vm0, %v2709_v54 }
  0x7e   : > { %567 = vst.msk [vmem:[#allocation2 + $0xd8] sm:$0xff] %vm539_vm0, %v2709_v54 }
  0x7f   : > { %568 = vst.msk [vmem:[#allocation2 + $0xe0] sm:$0xff] %vm539_vm0, %v2709_v54 }
  0x80   : > { %569 = vst.msk [vmem:[#allocation2 + $0xe8] sm:$0xff] %vm539_vm0, %v2709_v54 }
  0x81   : > { %570 = vst.msk [vmem:[#allocation2 + $0xf0] sm:$0xff] %vm539_vm0, %v2709_v54 }
  0x82   : > { %571 = vst.msk [vmem:[#allocation2 + $0xf8] sm:$0xff] %vm539_vm0, %v2709_v54 }
  0x83 PF: > { %v981_v55 = vld [vmem:[%s2917_s27 + $0x78] sm:$0xff]  ;;  %v980_v56 = vld [vmem:[%s2917_s27 + $0x70] sm:$0xff]  ;;  %v979_v57 = vld [vmem:[%s2917_s27 + $0x68] sm:$0xff]  ;;  %vm674_vm1 = vcmask 1046528   ;;  %vm787_vm2 = vcmask 1045504   ;;  %vm2159_vm3 = vcmask 523264  }
  0x84   : > { %2514 = vmatpush.msra.mxu1 %v981_v55  ;;  %2515 = vmatpush.msra.mxu2 %v981_v55  ;;  %v978_v58 = vld [vmem:[%s2917_s27 + $0x60] sm:$0xff]  ;;  %v977_v59 = vld [vmem:[%s2917_s27 + $0x58] sm:$0xff]  ;;  %v976_v60 = vld [vmem:[%s2917_s27 + $0x50] sm:$0xff]  ;;  %p2510_p13 = scmp.ne.s32.totalorder %s2691_s17, 1 }
  0x85   : > { %2516 = vmatpush.msra.mxu3 %v981_v55  ;;  %1110 = vmatpush.msra.mxu0 %v981_v55  ;;  %v975_v61 = vld [vmem:[%s2917_s27 + $0x48] sm:$0xff]  ;;  %v974_v62 = vld [vmem:[%s2917_s27 + $0x40] sm:$0xff]  ;;  %v973_v63 = vld [vmem:[%s2917_s27 + $0x38] sm:$0xff] }
  0x86   : > { %2517 = vmatpush.msra.mxu1 %v980_v56  ;;  %2518 = vmatpush.msra.mxu2 %v980_v56  ;;  %v972_v0 = vld [vmem:[%s2917_s27 + $0x30] sm:$0xff]  ;;  %v971_v1 = vld [vmem:[%s2917_s27 + $0x28] sm:$0xff]  ;;  %v970_v2 = vld [vmem:[%s2917_s27 + $0x20] sm:$0xff] }
  0x87   : > { %2519 = vmatpush.msra.mxu3 %v980_v56  ;;  %1111 = vmatpush.msra.mxu0 %v980_v56  ;;  %v969_v3 = vld [vmem:[%s2917_s27 + $0x18] sm:$0xff]  ;;  %v968_v4 = vld [vmem:[%s2917_s27 + $0x10] sm:$0xff]  ;;  %v967_v5 = vld [vmem:[%s2917_s27 + $0x8] sm:$0xff] }
  0x88   : > { %2520 = vmatpush.msra.mxu1 %v979_v57  ;;  %2521 = vmatpush.msra.mxu2 %v979_v57  ;;  %v966_v6 = vld [vmem:[%s2917_s27] sm:$0xff]  ;;  %v1013_v9 = vld [vmem:[%s2917_s27 + $0x178] sm:$0xff]  ;;  %v1012_v13 = vld [vmem:[%s2917_s27 + $0x170] sm:$0xff] }
  0x89   : > { %2522 = vmatpush.msra.mxu3 %v979_v57  ;;  %1112 = vmatpush.msra.mxu0 %v979_v57  ;;  %v2976_v7 = vld [vmem:[%s2924_s7 + $0x60] sm:$0xff]  ;;  %v997_v11 = vld [vmem:[%s2917_s27 + $0xf8] sm:$0xff]  ;;  %v1011_v16 = vld [vmem:[%s2917_s27 + $0x168] sm:$0xff] }
  0x8a   : > { %2523 = vmatpush.msra.mxu1 %v978_v58  ;;  %2524 = vmatpush.msra.mxu2 %v978_v58  ;;  %v2979_v8 = vld [vmem:[%s2924_s7 + $0xc0] sm:$0xff]  ;;  %v1029_v12 = vld [vmem:[%s2917_s27 + $0x1f8] sm:$0xff]  ;;  %v995_v18 = vld [vmem:[%s2917_s27 + $0xe8] sm:$0xff] }
  0x8b   : > { %2525 = vmatpush.msra.mxu3 %v978_v58  ;;  %1113 = vmatpush.msra.mxu0 %v978_v58  ;;  %v608_v10 = vld [vmem:[%s2924_s7 + $0x120] sm:$0xff]  ;;  %v1027_v19 = vld [vmem:[%s2917_s27 + $0x1e8] sm:$0xff]  ;;  %v1045_v20 = vld [vmem:[%s2917_s27 + $0x278] sm:$0xff] }
  0x8c   : > { %2526 = vmatpush.msra.mxu1 %v977_v59  ;;  %2527 = vmatpush.msra.mxu2 %v977_v59  ;;  %v996_v14 = vld [vmem:[%s2917_s27 + $0xf0] sm:$0xff]  ;;  %v2998_v21 = vld [vmem:[%s2924_s7 + $0x68] sm:$0xff]  ;;  %v1010_v23 = vld [vmem:[%s2917_s27 + $0x160] sm:$0xff] }
  0x8d   : > { %2528 = vmatpush.msra.mxu3 %v977_v59  ;;  %1114 = vmatpush.msra.mxu0 %v977_v59  ;;  %v1028_v15 = vld [vmem:[%s2917_s27 + $0x1f0] sm:$0xff]  ;;  %v3001_v22 = vld [vmem:[%s2924_s7 + $0xc8] sm:$0xff]  ;;  %v1026_v24 = vld [vmem:[%s2917_s27 + $0x1e0] sm:$0xff] }
  0x8e   : > { %2529 = vmatpush.msra.mxu1 %v976_v60  ;;  %2530 = vmatpush.msra.mxu2 %v976_v60  ;;  %v2992_v17 = vld [vmem:[%s2924_s7] sm:$0xff]  ;;  %v609_v25 = vld [vmem:[%s2924_s7 + $0x128] sm:$0xff]  ;;  %v3023_v37 = vld [vmem:[%s2924_s7 + $0x78] sm:$0xff] }
  0x8f   : > { %2531 = vmatpush.msra.mxu3 %v976_v60  ;;  %1115 = vmatpush.msra.mxu0 %v976_v60  ;;  %v1044_v26 = vld [vmem:[%s2917_s27 + $0x270] sm:$0xff]  ;;  %v994_v27 = vld [vmem:[%s2917_s27 + $0xe0] sm:$0xff]  ;;  %v1009_v28 = vld [vmem:[%s2917_s27 + $0x158] sm:$0xff] }
  0x90   : > { %2532 = vmatpush.msra.mxu1 %v975_v61  ;;  %2533 = vmatpush.msra.mxu2 %v975_v61  ;;  %v1025_v29 = vld [vmem:[%s2917_s27 + $0x1d8] sm:$0xff]  ;;  %v1043_v30 = vld [vmem:[%s2917_s27 + $0x268] sm:$0xff]  ;;  %v1008_v32 = vld [vmem:[%s2917_s27 + $0x150] sm:$0xff] }
  0x91   : > { %2534 = vmatpush.msra.mxu3 %v975_v61  ;;  %1116 = vmatpush.msra.mxu0 %v975_v61  ;;  %v993_v31 = vld [vmem:[%s2917_s27 + $0xd8] sm:$0xff]  ;;  %v1024_v34 = vld [vmem:[%s2917_s27 + $0x1d0] sm:$0xff]  ;;  %v1042_v35 = vld [vmem:[%s2917_s27 + $0x260] sm:$0xff] }
  0x92   : > { %2535 = vmatpush.msra.mxu1 %v974_v62  ;;  %2536 = vmatpush.msra.mxu2 %v974_v62  ;;  %v3017_v33 = vld [vmem:[%s2924_s7 + $0x8] sm:$0xff]  ;;  %v992_v36 = vld [vmem:[%s2917_s27 + $0xd0] sm:$0xff]  ;;  %v3026_v38 = vld [vmem:[%s2924_s7 + $0xd8] sm:$0xff] }
  0x93   : > { %2537 = vmatpush.msra.mxu3 %v974_v62  ;;  %1117 = vmatpush.msra.mxu0 %v974_v62  ;;  %v1007_v39 = vld [vmem:[%s2917_s27 + $0x148] sm:$0xff]  ;;  %v1041_v42 = vld [vmem:[%s2917_s27 + $0x258] sm:$0xff]  ;;  %v1006_v44 = vld [vmem:[%s2917_s27 + $0x140] sm:$0xff] }
  0x94   : > { %2538 = vmatpush.msra.mxu1 %v973_v63  ;;  %2539 = vmatpush.msra.mxu2 %v973_v63  ;;  %v1023_v40 = vld [vmem:[%s2917_s27 + $0x1c8] sm:$0xff]  ;;  %v1022_v45 = vld [vmem:[%s2917_s27 + $0x1c0] sm:$0xff]  ;;  %v1040_v46 = vld [vmem:[%s2917_s27 + $0x250] sm:$0xff] }
  0x95   : > { %2540 = vmatpush.msra.mxu3 %v973_v63  ;;  %1118 = vmatpush.msra.mxu0 %v973_v63  ;;  %v611_v41 = vld [vmem:[%s2924_s7 + $0x138] sm:$0xff]  ;;  %v990_v47 = vld [vmem:[%s2917_s27 + $0xc0] sm:$0xff]  ;;  %v1004_v55 = vld [vmem:[%s2917_s27 + $0x130] sm:$0xff] }
  0x96   : > { %2541 = vmatpush.msra.mxu1 %v972_v0  ;;  %2542 = vmatpush.msra.mxu2 %v972_v0  ;;  %v991_v43 = vld [vmem:[%s2917_s27 + $0xc8] sm:$0xff]  ;;  %v1005_v48 = vld [vmem:[%s2917_s27 + $0x138] sm:$0xff]  ;;  %v3048_v53 = vld [vmem:[%s2924_s7 + $0x80] sm:$0xff] }
  0x97   : > { %2543 = vmatpush.msra.mxu3 %v972_v0  ;;  %1119 = vmatpush.msra.mxu0 %v972_v0  ;;  %v3042_v49 = vld [vmem:[%s2924_s7 + $0x18] sm:$0xff]  ;;  %v3051_v54 = vld [vmem:[%s2924_s7 + $0xe0] sm:$0xff] }
  0x98   : > { %2544 = vmatpush.msra.mxu1 %v971_v1  ;;  %2545 = vmatpush.msra.mxu2 %v971_v1  ;;  %v1021_v50 = vld [vmem:[%s2917_s27 + $0x1b8] sm:$0xff]  ;;  %v1039_v51 = vld [vmem:[%s2917_s27 + $0x248] sm:$0xff]  ;;  %v1020_v56 = vld [vmem:[%s2917_s27 + $0x1b0] sm:$0xff] }
  0x99   : > { %2546 = vmatpush.msra.mxu3 %v971_v1  ;;  %1120 = vmatpush.msra.mxu0 %v971_v1  ;;  %v989_v52 = vld [vmem:[%s2917_s27 + $0xb8] sm:$0xff]  ;;  %v612_v57 = vld [vmem:[%s2924_s7 + $0x140] sm:$0xff]  ;;  %v1003_v60 = vld [vmem:[%s2917_s27 + $0x128] sm:$0xff] }
  0x9a   : > { %2547 = vmatpush.msra.mxu1 %v970_v2  ;;  %2548 = vmatpush.msra.mxu2 %v970_v2  ;;  %v1038_v58 = vld [vmem:[%s2917_s27 + $0x240] sm:$0xff]  ;;  %v988_v59 = vld [vmem:[%s2917_s27 + $0xb0] sm:$0xff]  ;;  %v1019_v61 = vld [vmem:[%s2917_s27 + $0x1a8] sm:$0xff] }
  0x9b   : > { %2549 = vmatpush.msra.mxu3 %v970_v2  ;;  %1121 = vmatpush.msra.mxu0 %v970_v2  ;;  %v1037_v62 = vld [vmem:[%s2917_s27 + $0x238] sm:$0xff]  ;;  %v987_v63 = vld [vmem:[%s2917_s27 + $0xa8] sm:$0xff]  ;;  %v1002_v0 = vld [vmem:[%s2917_s27 + $0x120] sm:$0xff] }
  0x9c   : > { %2550 = vmatpush.msra.mxu1 %v969_v3  ;;  %2551 = vmatpush.msra.mxu2 %v969_v3  ;;  %v3067_v1 = vld [vmem:[%s2924_s7 + $0x20] sm:$0xff] }
  0x9d   : > { %2552 = vmatpush.msra.mxu3 %v969_v3  ;;  %1122 = vmatpush.msra.mxu0 %v969_v3  ;;  %v1018_v2 = vld [vmem:[%s2917_s27 + $0x1a0] sm:$0xff]  ;;  %v1036_v3 = vld [vmem:[%s2917_s27 + $0x230] sm:$0xff] }
  0x9e   : > { %2553 = vmatpush.msra.mxu1 %v968_v4  ;;  %2554 = vmatpush.msra.mxu2 %v968_v4 }
  0x9f   : > { %2555 = vmatpush.msra.mxu3 %v968_v4  ;;  %1123 = vmatpush.msra.mxu0 %v968_v4  ;;  %v986_v4 = vld [vmem:[%s2917_s27 + $0xa0] sm:$0xff] }
  0xa0   : > { %2556 = vmatpush.msra.mxu1 %v967_v5  ;;  %2557 = vmatpush.msra.mxu2 %v967_v5 }
  0xa1   : > { %2558 = vmatpush.msra.mxu3 %v967_v5  ;;  %1124 = vmatpush.msra.mxu0 %v967_v5  ;;  %v3073_v5 = vld [vmem:[%s2924_s7 + $0x90] sm:$0xff] }
  0xa2   : > { %2559 = vmatpush.msra.mxu1 %v966_v6  ;;  %2560 = vmatpush.msra.mxu2 %v966_v6 }
  0xa3   : > { %1150 = vmatmul.f32.vlgmr.msra.gmra.mxu1 %v2976_v7  ;;  %1174 = vmatmul.f32.vlgmr.msra.gmra.mxu2 %v2979_v8 }
  0xa4   : > { %1336 = vmatpush.msrb.mxu2 %v1013_v9  ;;  %2561 = vmatpush.msra.mxu3 %v966_v6  ;;  %v1001_v9 = vld [vmem:[%s2917_s27 + $0x118] sm:$0xff] }
  0xa5   : > { %1198 = vmatmul.f32.vlgmr.msra.gmra.mxu3 %v608_v10  ;;  %1223 = vmatpush.msrb.mxu1 %v997_v11  ;;  %v1017_v10 = vld [vmem:[%s2917_s27 + $0x198] sm:$0xff]  ;;  %v614_v11 = vld [vmem:[%s2924_s7 + $0x150] sm:$0xff] }
  0xa6   : > { %1449 = vmatpush.msrb.mxu3 %v1029_v12  ;;  %1337 = vmatpush.msrb.mxu2 %v1012_v13  ;;  %v1035_v12 = vld [vmem:[%s2917_s27 + $0x228] sm:$0xff]  ;;  %v985_v13 = vld [vmem:[%s2917_s27 + $0x98] sm:$0xff] }
  0xa7   : > { %1224 = vmatpush.msrb.mxu1 %v996_v14  ;;  %1125 = vmatpush.msra.mxu0 %v966_v6  ;;  %v3076_v6 = vld [vmem:[%s2924_s7 + $0xf0] sm:$0xff] }
  0xa8   : > { %1450 = vmatpush.msrb.mxu3 %v1028_v15  ;;  %1338 = vmatpush.msrb.mxu2 %v1011_v16  ;;  %v1000_v14 = vld [vmem:[%s2917_s27 + $0x110] sm:$0xff]  ;;  %v1034_v16 = vld [vmem:[%s2917_s27 + $0x220] sm:$0xff] }
  0xa9   : > { %1126 = vmatmul.f32.vlgmr.msra.gmra.mxu0 %v2992_v17  ;;  %1225 = vmatpush.msrb.mxu1 %v995_v18  ;;  %v1016_v15 = vld [vmem:[%s2917_s27 + $0x190] sm:$0xff] }
  0xaa   : > { %1451 = vmatpush.msrb.mxu3 %v1027_v19  ;;  %1562 = vmatpush.msrb.mxu0 %v1045_v20  ;;  %v984_v18 = vld [vmem:[%s2917_s27 + $0x90] sm:$0xff]  ;;  %v999_v19 = vld [vmem:[%s2917_s27 + $0x108] sm:$0xff] }
  0xab   : > { %1153 = vmatmul.f32.gmra.mxu1 %v2998_v21  ;;  %1177 = vmatmul.f32.gmra.mxu2 %v3001_v22  ;;  %v3092_v20 = vld [vmem:[%s2924_s7 + $0x30] sm:$0xff] }
  0xac   : > { %1339 = vmatpush.msrb.mxu2 %v1010_v23  ;;  %1452 = vmatpush.msrb.mxu3 %v1026_v24  ;;  %v1015_v23 = vld [vmem:[%s2917_s27 + $0x188] sm:$0xff]  ;;  %v1033_v24 = vld [vmem:[%s2917_s27 + $0x218] sm:$0xff] }
  0xad   : > { %1201 = vmatmul.f32.gmra.mxu3 %v609_v25  ;;  %1563 = vmatpush.msrb.mxu0 %v1044_v26  ;;  %v983_v25 = vld [vmem:[%s2917_s27 + $0x88] sm:$0xff] }
  0xae   : > { %1226 = vmatpush.msrb.mxu1 %v994_v27  ;;  %1340 = vmatpush.msrb.mxu2 %v1009_v28  ;;  %v3098_v26 = vld [vmem:[%s2924_s7 + $0x98] sm:$0xff]  ;;  %v998_v28 = vld [vmem:[%s2917_s27 + $0x100] sm:$0xff] }
  0xaf   : > { %1453 = vmatpush.msrb.mxu3 %v1025_v29  ;;  %1564 = vmatpush.msrb.mxu0 %v1043_v30  ;;  %v3101_v27 = vld [vmem:[%s2924_s7 + $0xf8] sm:$0xff]  ;;  %v1014_v29 = vld [vmem:[%s2917_s27 + $0x180] sm:$0xff] }
  0xb0   : > { %1227 = vmatpush.msrb.mxu1 %v993_v31  ;;  %1341 = vmatpush.msrb.mxu2 %v1008_v32  ;;  %v615_v30 = vld [vmem:[%s2924_s7 + $0x158] sm:$0xff]  ;;  %v1032_v31 = vld [vmem:[%s2917_s27 + $0x210] sm:$0xff]  ;;  %v982_v32 = vld [vmem:[%s2917_s27 + $0x80] sm:$0xff] }
  0xb1   : > { %1129 = vmatmul.f32.gmra.mxu0 %v3017_v33  ;;  %1454 = vmatpush.msrb.mxu3 %v1024_v34  ;;  %v1077_v34 = vld [vmem:[%s2917_s27 + $0x378] sm:$0xff] }
  0xb2   : > { %1565 = vmatpush.msrb.mxu0 %v1042_v35  ;;  %1228 = vmatpush.msrb.mxu1 %v992_v36  ;;  %v1031_v35 = vld [vmem:[%s2917_s27 + $0x208] sm:$0xff]  ;;  %v1093_v36 = vld [vmem:[%s2917_s27 + $0x3f8] sm:$0xff] }
  0xb3   : > { %1156 = vmatmul.f32.gmra.mxu1 %v3023_v37  ;;  %1180 = vmatmul.f32.gmra.mxu2 %v3026_v38 }
  0xb4   : > { %1342 = vmatpush.msrb.mxu2 %v1007_v39  ;;  %1455 = vmatpush.msrb.mxu3 %v1023_v40  ;;  %v1061_v39 = vld [vmem:[%s2917_s27 + $0x2f8] sm:$0xff] }
  0xb5   : > { %1204 = vmatmul.f32.gmra.mxu3 %v611_v41  ;;  %1566 = vmatpush.msrb.mxu0 %v1041_v42  ;;  %v3116_v40 = vld [vmem:[%s2924_s7 + $0x38] sm:$0xff]  ;;  %v1030_v41 = vld [vmem:[%s2917_s27 + $0x200] sm:$0xff]  ;;  %v3120_v42 = vld [vmem:[%s2924_s7 + $0xa8] sm:$0xff] }
  0xb6   : > { %1229 = vmatpush.msrb.mxu1 %v991_v43  ;;  %1343 = vmatpush.msrb.mxu2 %v1006_v44  ;;  %v3123_v43 = vld [vmem:[%s2924_s7 + $0x108] sm:$0xff] }
  0xb7   : > { %1456 = vmatpush.msrb.mxu3 %v1022_v45  ;;  %1567 = vmatpush.msrb.mxu0 %v1040_v46  ;;  %v1109_v44 = vld [vmem:[%s2917_s27 + $0x478] sm:$0xff]  ;;  %v1076_v46 = vld [vmem:[%s2917_s27 + $0x370] sm:$0xff] }
  0xb8   : > { %1230 = vmatpush.msrb.mxu1 %v990_v47  ;;  %1344 = vmatpush.msrb.mxu2 %v1005_v48  ;;  %v617_v45 = vld [vmem:[%s2924_s7 + $0x168] sm:$0xff]  ;;  %v1092_v47 = vld [vmem:[%s2917_s27 + $0x3f0] sm:$0xff] }
  0xb9   : > { %1132 = vmatmul.f32.gmra.mxu0 %v3042_v49  ;;  %1457 = vmatpush.msrb.mxu3 %v1021_v50  ;;  %v1060_v48 = vld [vmem:[%s2917_s27 + $0x2f0] sm:$0xff]  ;;  %v3134_v50 = vld [vmem:[%s2924_s7 + $0x48] sm:$0xff] }
  0xba   : > { %1568 = vmatpush.msrb.mxu0 %v1039_v51  ;;  %1231 = vmatpush.msrb.mxu1 %v989_v52  ;;  %v3137_v51 = vld [vmem:[%s2924_s7 + $0xb0] sm:$0xff] }
  0xbb   : > { %1159 = vmatmul.f32.gmra.mxu1 %v3048_v53  ;;  %1183 = vmatmul.f32.gmra.mxu2 %v3051_v54  ;;  %v3140_v52 = vld [vmem:[%s2924_s7 + $0x110] sm:$0xff] }
  0xbc   : > { %1345 = vmatpush.msrb.mxu2 %v1004_v55  ;;  %1458 = vmatpush.msrb.mxu3 %v1020_v56  ;;  %v618_v55 = vld [vmem:[%s2924_s7 + $0x170] sm:$0xff]  ;;  %v675_v56 = vrot.slane %v2992_v17, 1 }
  0xbd   : > { %1207 = vmatmul.f32.gmra.mxu3 %v612_v57  ;;  %1569 = vmatpush.msrb.mxu0 %v1038_v58  ;;  %v788_v57 = vrot.slane %v2992_v17, 2  ;;  %v676_v58 = vrot.slane %v3017_v33, 1  ;;  %v574_v17 = vld [vmem:[%s2924_s7 + $0x10] sm:$0x3] }
  0xbe   : > { %1232 = vmatpush.msrb.mxu1 %v988_v59  ;;  %1346 = vmatpush.msrb.mxu2 %v1003_v60  ;;  %v789_v59 = vrot.slane %v3017_v33, 2  ;;  %v1108_v60 = vld [vmem:[%s2917_s27 + $0x470] sm:$0xff]  ;;  %v681_v33 = vrot.slane %v3067_v1, 1 }
  0xbf   : > { %1459 = vmatpush.msrb.mxu3 %v1019_v61  ;;  %1570 = vmatpush.msrb.mxu0 %v1037_v62  ;;  %v3152_v61 = vld [vmem:[%s2924_s7 + $0x50] sm:$0xff]  ;;  %v677_v62 = vsel %vm674_vm1, %v675_v56, %v676_v58  ;;  %v1057_v56 = vld [vmem:[%s2917_s27 + $0x2d8] sm:$0xff] }
  0xc0   : > { %1233 = vmatpush.msrb.mxu1 %v987_v63  ;;  %1347 = vmatpush.msrb.mxu2 %v1002_v0  ;;  %v790_v63 = vsel %vm787_vm2, %v788_v57, %v789_v59  ;;  %v680_v0 = vrot.slane %v3042_v49, 1  ;;  %v583_v57 = vld [vmem:[%s2924_s7 + $0x58] sm:$0x3] }
  0xc1   : > { %1135 = vmatmul.f32.gmra.mxu0 %v3067_v1  ;;  %1460 = vmatpush.msrb.mxu3 %v1018_v2  ;;  %v1075_v2 = vld [vmem:[%s2917_s27 + $0x368] sm:$0xff] }
  0xc2   : > { %1571 = vmatpush.msrb.mxu0 %v1036_v3  ;;  %1234 = vmatpush.msrb.mxu1 %v986_v4  ;;  %v678_v3 = vrot.slane %v574_v17, 1  ;;  %v791_v4 = vrot.slane %v574_v17, 2 }
  0xc3   : > { %1162 = vmatmul.f32.gmra.mxu1 %v3073_v5  ;;  %1186 = vmatmul.f32.gmra.mxu2 %v3076_v6 }
  0xc4   : > { %1348 = vmatpush.msrb.mxu2 %v1001_v9  ;;  %1461 = vmatpush.msrb.mxu3 %v1017_v10  ;;  %v1091_v9 = vld [vmem:[%s2917_s27 + $0x3e8] sm:$0xff] }
  0xc5   : > { %1210 = vmatmul.f32.gmra.mxu3 %v614_v11  ;;  %1572 = vmatpush.msrb.mxu0 %v1035_v12  ;;  %v1059_v10 = vld [vmem:[%s2917_s27 + $0x2e8] sm:$0xff]  ;;  %v682_v11 = vsel %vm674_vm1, %v680_v0, %v681_v33 }
  0xc6   : > { %1235 = vmatpush.msrb.mxu1 %v985_v13  ;;  %1349 = vmatpush.msrb.mxu2 %v1000_v14  ;;  %v577_v12 = vld [vmem:[%s2924_s7 + $0x28] sm:$0x3]  ;;  %v679_v13 = vsel %vm674_vm1, %v676_v58, %v678_v3  ;;  %v792_v14 = vsel %vm787_vm2, %v789_v59, %v791_v4  ;;  %v693_v59 = vrot.slane %v583_v57, 1  ;;  %v1088_v3 = vld [vmem:[%s2917_s27 + $0x3d0] sm:$0xff] }
  0xc7   : > { %1462 = vmatpush.msrb.mxu3 %v1016_v15  ;;  %1573 = vmatpush.msrb.mxu0 %v1034_v16  ;;  %v683_v15 = vrot.slane %v577_v12, 1  ;;  %v793_v16 = vrot.slane %v3042_v49, 2 }
  0xc8   : > { %1236 = vmatpush.msrb.mxu1 %v984_v18  ;;  %1350 = vmatpush.msrb.mxu2 %v999_v19  ;;  %v794_v18 = vrot.slane %v3067_v1, 2  ;;  %v1107_v19 = vld [vmem:[%s2917_s27 + $0x468] sm:$0xff] }
  0xc9   : > { %1138 = vmatmul.f32.gmra.mxu0 %v3092_v20  ;;  %1463 = vmatpush.msrb.mxu3 %v1015_v23  ;;  %v684_v23 = vsel %vm674_vm1, %v681_v33, %v683_v15  ;;  %v695_v33 = vrot.slane %v2976_v7, 1  ;;  %v1104_v15 = vld [vmem:[%s2917_s27 + $0x450] sm:$0xff] }
  0xca   : > { %1574 = vmatpush.msrb.mxu0 %v1033_v24  ;;  %1237 = vmatpush.msrb.mxu1 %v983_v25  ;;  %v3174_v24 = vsel %vm787_vm2, %v793_v16, %v794_v18  ;;  %v685_v25 = vrot.slane %v3092_v20, 1 }
  0xcb   : > { %1165 = vmatmul.f32.gmra.mxu1 %v3098_v26  ;;  %1189 = vmatmul.f32.gmra.mxu2 %v3101_v27 }
  0xcc   : > { %1351 = vmatpush.msrb.mxu2 %v998_v28  ;;  %1464 = vmatpush.msrb.mxu3 %v1014_v29  ;;  %v686_v28 = vrot.slane %v3116_v40, 1  ;;  %v796_v29 = vrot.slane %v577_v12, 2 }
  0xcd   : > { %1213 = vmatmul.f32.gmra.mxu3 %v615_v30  ;;  %1575 = vmatpush.msrb.mxu0 %v1032_v31  ;;  %v1058_v30 = vld [vmem:[%s2917_s27 + $0x2e0] sm:$0xff] }
  0xce   : > { %1238 = vmatpush.msrb.mxu1 %v982_v32  ;;  %1788 = vmatpush.msra.mxu2 %v1077_v34  ;;  %v3184_v31 = vsel %vm674_vm1, %v685_v25, %v686_v28  ;;  %v580_v32 = vld [vmem:[%s2924_s7 + $0x40] sm:$0x3]  ;;  %v3188_v34 = vsel %vm787_vm2, %v794_v18, %v796_v29 }
  0xcf   : > { %1576 = vmatpush.msrb.mxu0 %v1031_v35  ;;  %1901 = vmatpush.msra.mxu3 %v1093_v36  ;;  %v688_v35 = vrot.slane %v580_v32, 1  ;;  %v798_v36 = vrot.slane %v3092_v20, 2 }
  0xd0   : > { %1675 = vmatpush.msra.mxu1 %v1061_v39  ;;  %1789 = vmatpush.msra.mxu2 %v1076_v46  ;;  %v799_v39 = vrot.slane %v3116_v40, 2  ;;  %v690_v46 = vrot.slane %v3134_v50, 1 }
  0xd1   : > { %1141 = vmatmul.f32.gmra.mxu0 %v3116_v40  ;;  %1902 = vmatpush.msra.mxu3 %v1092_v47  ;;  %v801_v47 = vrot.slane %v580_v32, 2  ;;  %v589_v32 = vld [vmem:[%s2924_s7 + $0x88] sm:$0x3] }
  0xd2   : > { %1577 = vmatpush.msrb.mxu0 %v1030_v41  ;;  %1676 = vmatpush.msra.mxu1 %v1060_v48  ;;  %v1106_v41 = vld [vmem:[%s2917_s27 + $0x460] sm:$0xff]  ;;  %v1089_v48 = vld [vmem:[%s2917_s27 + $0x3d8] sm:$0xff] }
  0xd3   : > { %1168 = vmatmul.f32.gmra.mxu1 %v3120_v42  ;;  %1192 = vmatmul.f32.gmra.mxu2 %v3123_v43  ;;  %v3216_v58 = vsel %vm787_vm2, %v799_v39, %v801_v47 }
  0xd4   : > { %2014 = vmatpush.msra.mxu0 %v1109_v44  ;;  %1790 = vmatpush.msra.mxu2 %v1075_v2  ;;  %v3197_v44 = vsel %vm674_vm1, %v686_v28, %v688_v35  ;;  %v806_v2 = vrot.slane %v583_v57, 2  ;;  %v1087_v28 = vld [vmem:[%s2917_s27 + $0x3c8] sm:$0xff] }
  0xd5   : > { %1216 = vmatmul.f32.gmra.mxu3 %v617_v45  ;;  %1677 = vmatpush.msra.mxu1 %v1059_v10  ;;  %v3200_v45 = vsel %vm787_vm2, %v798_v36, %v799_v39  ;;  %v586_v10 = vld [vmem:[%s2924_s7 + $0x70] sm:$0x3] }
  0xd6   : > { %2015 = vmatpush.msra.mxu0 %v1108_v60  ;;  %1903 = vmatpush.msra.mxu3 %v1091_v9  ;;  %v803_v60 = vrot.slane %v3134_v50, 2  ;;  %v1056_v9 = vld [vmem:[%s2917_s27 + $0x2d0] sm:$0xff]  ;;  %v698_v12 = vrot.slane %v586_v10, 1  ;;  %v811_v25 = vrot.slane %v586_v10, 2 }
  0xd7   : > { %1678 = vmatpush.msra.mxu1 %v1058_v30  ;;  %v1055_v30 = vld [vmem:[%s2917_s27 + $0x2c8] sm:$0xff] }
  0xd8   : > { %2016 = vmatpush.msra.mxu0 %v1107_v19 }
  0xd9   : > { %1144 = vmatmul.f32.gmra.mxu0 %v3134_v50  ;;  %1679 = vmatpush.msra.mxu1 %v1057_v56 }
  0xda   : > { %2017 = vmatpush.msra.mxu0 %v1106_v41  ;;  %v703_v41 = vrot.slane %v589_v32, 1 }
  0xdb   : > { %1171 = vmatmul.f32.gmra.mxu1 %v3137_v51  ;;  %1195 = vmatmul.f32.gmra.mxu2 %v3140_v52 }
  0xdc   : > { %1680 = vmatpush.msra.mxu1 %v1056_v9  ;;  %v592_v9 = vld [vmem:[%s2924_s7 + $0xa0] sm:$0x3] }
  0xdd   : > { %1219 = vmatmul.f32.gmra.mxu3 %v618_v55 }
  0xde   : > { %1681 = vmatpush.msra.mxu1 %v1055_v30 }
  0xe1   : > { %1147 = vmatmul.f32.gmra.mxu0 %v3152_v61 }
  0xe3   : > { %1239 = vmatmul.f32.vlgmr.msrb.gmra.mxu1 %v677_v62  ;;  %1352 = vmatmul.f32.vlgmr.msrb.gmra.mxu2 %v790_v63  ;;  %v804_v62 = vrot.slane %v3152_v61, 2  ;;  %v1105_v63 = vld [vmem:[%s2917_s27 + $0x458] sm:$0xff] }
  0xe4   : > { %2018 = vmatpush.msra.mxu0 %v1105_v63  ;;  %v816_v63 = vrot.slane %v589_v32, 2 }
  0xe5   : > { %1465 = vmatmul.f32.vlgmr.msrb.gmra.mxu3 %v3042_v49  ;;  %v1074_v49 = vld [vmem:[%s2917_s27 + $0x360] sm:$0xff]  ;;  %v3229_v0 = vsel %vm787_vm2, %v803_v60, %v804_v62  ;;  %v706_v60 = vrot.slane %v3098_v26, 1 }
  0xe6   : > { %1791 = vmatpush.msra.mxu2 %v1074_v49  ;;  %2019 = vmatpush.msra.mxu0 %v1104_v15  ;;  %v818_v15 = vrot.slane %v3073_v5, 2 }
  0xe9   : > { %1578 = vmatmul.f32.vlgmr.msrb.gmra.mxu0 %v682_v11 }
  0xeb   : > { %1242 = vmatmul.f32.gmra.mxu1 %v679_v13  ;;  %1355 = vmatmul.f32.gmra.mxu2 %v792_v14  ;;  %v808_v13 = vrot.slane %v2976_v7, 2  ;;  %v809_v14 = vrot.slane %v2998_v21, 2 }
  0xed   : > { %1468 = vmatmul.f32.gmra.mxu3 %v3067_v1  ;;  %v1090_v1 = vld [vmem:[%s2917_s27 + $0x3e0] sm:$0xff]  ;;  %v3260_v19 = vsel %vm787_vm2, %v808_v13, %v809_v14  ;;  %v3284_v39 = vsel %vm787_vm2, %v809_v14, %v811_v25  ;;  %v708_v14 = vrot.slane %v592_v9, 1 }
  0xee   : > { %1904 = vmatpush.msra.mxu3 %v1090_v1 }
  0xf0   : > { %1905 = vmatpush.msra.mxu3 %v1089_v48 }
  0xf1   : > { %1581 = vmatmul.f32.gmra.mxu0 %v684_v23 }
  0xf2   : > { %1906 = vmatpush.msra.mxu3 %v1088_v3  ;;  %v1054_v3 = vld [vmem:[%s2917_s27 + $0x2c0] sm:$0xff] }
  0xf3   : > { %1245 = vmatmul.f32.gmra.mxu1 %v682_v11  ;;  %1358 = vmatmul.f32.gmra.mxu2 %v3174_v24  ;;  %v3245_v11 = vsel %vm787_vm2, %v804_v62, %v806_v2  ;;  %v1070_v62 = vld [vmem:[%s2917_s27 + $0x340] sm:$0xff] }
  0xf4   : > { %1907 = vmatpush.msra.mxu3 %v1087_v28  ;;  %1682 = vmatpush.msra.mxu1 %v1054_v3  ;;  %v3343_v28 = vsel %vm674_vm1, %v706_v60, %v708_v14 }
  0xf5   : > { %1471 = vmatmul.f32.gmra.mxu3 %v3092_v20  ;;  %v691_v20 = vrot.slane %v3152_v61, 1  ;;  %4194 = vst [vmem:[#allocation10_spill] sm:$0xff] %v3343_v28 }
  0xf7   : > { %v3211_v55 = vsel %vm674_vm1, %v690_v46, %v691_v20  ;;  %v3226_v17 = vsel %vm674_vm1, %v691_v20, %v693_v59  ;;  %v813_v46 = vrot.slane %v3023_v37, 2  ;;  %v814_v20 = vrot.slane %v3048_v53, 2 }
  0xf9   : > { %1584 = vmatmul.f32.gmra.mxu0 %v3184_v31  ;;  %v3329_v13 = vsel %vm787_vm2, %v814_v20, %v816_v63  ;;  %v595_v63 = vld [vmem:[%s2924_s7 + $0xb8] sm:$0x3] }
  0xfa   : > { %4193 = vst [vmem:[#allocation9_spill] sm:$0xff] %v3329_v13 }
  0xfb   : > { %1248 = vmatmul.f32.gmra.mxu1 %v684_v23  ;;  %1361 = vmatmul.f32.gmra.mxu2 %v3188_v34  ;;  %v701_v23 = vrot.slane %v3048_v53, 1 }
  0xfd   : > { %1474 = vmatmul.f32.gmra.mxu3 %v3116_v40  ;;  %v1073_v40 = vld [vmem:[%s2917_s27 + $0x358] sm:$0xff]  ;;  %v3298_v56 = vsel %vm674_vm1, %v701_v23, %v703_v41  ;;  %v711_v41 = vrot.slane %v3137_v51, 1 }
  0xfe   : > { %1792 = vmatpush.msra.mxu2 %v1073_v40  ;;  %v1103_v40 = vld [vmem:[%s2917_s27 + $0x448] sm:$0xff]  ;;  %4189 = vst [vmem:[#allocation5_spill] sm:$0xff] %v3298_v56 }
  0xff   : > { %2020 = vmatpush.msra.mxu0 %v1103_v40  ;;  %v1085_v40 = vld [vmem:[%s2917_s27 + $0x3b8] sm:$0xff] }
 0x101   : > { %1587 = vmatmul.f32.gmra.mxu0 %v3197_v44 }
 0x103   : > { %1251 = vmatmul.f32.gmra.mxu1 %v3184_v31  ;;  %1364 = vmatmul.f32.gmra.mxu2 %v3200_v45 }
 0x105   : > { %1477 = vmatmul.f32.gmra.mxu3 %v3134_v50  ;;  %v696_v50 = vrot.slane %v2998_v21, 1 }
 0x107   : > { %v3240_v4 = vsel %vm674_vm1, %v695_v33, %v696_v50  ;;  %v3255_v16 = vsel %vm674_vm1, %v696_v50, %v698_v12  ;;  %v1086_v33 = vld [vmem:[%s2917_s27 + $0x3c0] sm:$0xff] }
 0x108   : > { %1908 = vmatpush.msra.mxu3 %v1086_v33  ;;  %v1053_v33 = vld [vmem:[%s2917_s27 + $0x2b8] sm:$0xff] }
 0x109   : > { %1590 = vmatmul.f32.gmra.mxu0 %v3211_v55  ;;  %1683 = vmatpush.msra.mxu1 %v1053_v33 }
 0x10a   : > { %1909 = vmatpush.msra.mxu3 %v1085_v40 }
 0x10b   : > { %1254 = vmatmul.f32.gmra.mxu1 %v3197_v44  ;;  %1367 = vmatmul.f32.gmra.mxu2 %v3216_v58 }
 0x10d   : > { %1480 = vmatmul.f32.gmra.mxu3 %v3152_v61  ;;  %v1072_v61 = vld [vmem:[%s2917_s27 + $0x350] sm:$0xff] }
 0x10e   : > { %1793 = vmatpush.msra.mxu2 %v1072_v61 }
 0x111   : > { %1593 = vmatmul.f32.gmra.mxu0 %v3226_v17 }
 0x113   : > { %1257 = vmatmul.f32.gmra.mxu1 %v3211_v55  ;;  %1370 = vmatmul.f32.gmra.mxu2 %v3229_v0 }
 0x115   : > { %1483 = vmatmul.f32.gmra.mxu3 %v2976_v7  ;;  %v700_v7 = vrot.slane %v3023_v37, 1 }
 0x117   : > { %v3275_v1 = vsel %vm674_vm1, %v700_v7, %v701_v23  ;;  %v819_v7 = vrot.slane %v3098_v26, 2  ;;  %v1102_v23 = vld [vmem:[%s2917_s27 + $0x440] sm:$0xff] }
 0x118   : > { %2021 = vmatpush.msra.mxu0 %v1102_v23  ;;  %v823_v23 = vrot.slane %v3120_v42, 2 }
 0x119   : > { %1596 = vmatmul.f32.gmra.mxu0 %v3240_v4 }
 0x11b   : > { %1260 = vmatmul.f32.gmra.mxu1 %v3226_v17  ;;  %1373 = vmatmul.f32.gmra.mxu2 %v3245_v11 }
 0x11d   : > { %1486 = vmatmul.f32.gmra.mxu3 %v2998_v21  ;;  %v1071_v21 = vld [vmem:[%s2917_s27 + $0x348] sm:$0xff] }
 0x11e   : > { %1794 = vmatpush.msra.mxu2 %v1071_v21 }
 0x120   : > { %v3257_v18 = vpop.f32.mrf.mxu1  ;;  %1795 = vmatpush.msra.mxu2 %v1070_v62 }
 0x121   : > { %1599 = vmatmul.f32.gmra.mxu0 %v3255_v16 }
 0x123   : > { %1263 = vmatmul.f32.gmra.mxu1 %v3240_v4  ;;  %1376 = vmatmul.f32.gmra.mxu2 %v3260_v19 }
 0x125   : > { %1489 = vmatmul.f32.gmra.mxu3 %v3023_v37  ;;  %v3305_v37 = vsel %vm787_vm2, %v813_v46, %v814_v20  ;;  %v1069_v46 = vld [vmem:[%s2917_s27 + $0x338] sm:$0xff]  ;;  %v821_v20 = vrot.slane %v592_v9, 2 }
 0x126   : > { %v3270_v49 = vpop.f32.mrf.mxu2  ;;  %v3272_v29 = vpop.f32.mrf.mxu0  ;;  %1796 = vmatpush.msra.mxu2 %v1069_v46  ;;  %v1101_v46 = vld [vmem:[%s2917_s27 + $0x438] sm:$0xff] }
 0x127   : > { %v3374_v9 = vsel %vm787_vm2, %v819_v7, %v821_v20  ;;  %2022 = vmatpush.msra.mxu0 %v1101_v46  ;;  %v1084_v46 = vld [vmem:[%s2917_s27 + $0x3b0] sm:$0xff] }
 0x128   : > { %v3279_v35 = vpop.f32.mrf.mxu1  ;;  %v3281_v36 = vpop.f32.mrf.mxu3  ;;  %4199 = vst [vmem:[#allocation15_spill] sm:$0xff] %v3374_v9  ;;  %1910 = vmatpush.msra.mxu3 %v1084_v46  ;;  %v829_v46 = vrot.slane %v3001_v22, 2 }
 0x129   : > { %4188 = vst [vmem:[#allocation4_spill] sm:$0xff] %v3281_v36  ;;  %1602 = vmatmul.f32.gmra.mxu0 %v3275_v1 }
 0x12b   : > { %1266 = vmatmul.f32.gmra.mxu1 %v3255_v16  ;;  %1379 = vmatmul.f32.gmra.mxu2 %v3284_v39 }
 0x12d   : > { %1492 = vmatmul.f32.gmra.mxu3 %v3048_v53  ;;  %v705_v53 = vrot.slane %v3073_v5, 1 }
 0x12e   : > { %v3293_v47 = vpop.f32.mrf.mxu2  ;;  %v3295_v48 = vpop.f32.mrf.mxu0 }
 0x12f   : > { %v3320_v2 = vsel %vm674_vm1, %v705_v53, %v706_v60 }
 0x130   : > { %v3300_v57 = vpop.f32.mrf.mxu1  ;;  %v3302_v59 = vpop.f32.mrf.mxu3  ;;  %4191 = vst [vmem:[#allocation7_spill] sm:$0xff] %v3320_v2 }
 0x131   : > { %4190 = vst [vmem:[#allocation6_spill] sm:$0xff] %v3302_v59  ;;  %1605 = vmatmul.f32.gmra.mxu0 %v3298_v56  ;;  %v1100_v59 = vld [vmem:[%s2917_s27 + $0x430] sm:$0xff] }
 0x132   : > { %2023 = vmatpush.msra.mxu0 %v1100_v59 }
 0x133   : > { %1269 = vmatmul.f32.gmra.mxu1 %v3275_v1  ;;  %1382 = vmatmul.f32.gmra.mxu2 %v3305_v37 }
 0x135   : > { %1495 = vmatmul.f32.gmra.mxu3 %v3073_v5  ;;  %v3350_v5 = vsel %vm787_vm2, %v818_v15, %v819_v7  ;;  %v713_v15 = vrot.slane %v595_v63, 1 }
 0x136   : > { %v3315_v50 = vpop.f32.mrf.mxu2  ;;  %v3317_v61 = vpop.f32.mrf.mxu0  ;;  %4196 = vst [vmem:[#allocation12_spill] sm:$0xff] %v3350_v5 }
 0x137   : > { %v3388_v20 = vsel %vm674_vm1, %v711_v41, %v713_v15  ;;  %v826_v15 = vrot.slane %v595_v63, 2 }
 0x138   : > { %v3324_v10 = vpop.f32.mrf.mxu1  ;;  %v3326_v12 = vpop.f32.mrf.mxu3  ;;  %4200 = vst [vmem:[#allocation16_spill] sm:$0xff] %v3388_v20 }
 0x139   : > { %4192 = vst [vmem:[#allocation8_spill] sm:$0xff] %v3326_v12  ;;  %1608 = vmatmul.f32.gmra.mxu0 %v3320_v2 }
 0x13b   : > { %1272 = vmatmul.f32.gmra.mxu1 %v3298_v56  ;;  %1385 = vmatmul.f32.gmra.mxu2 %v3329_v13  ;;  %v601_v13 = vld [vmem:[%s2924_s7 + $0xe8] sm:$0x3] }
 0x13d   : > { %1498 = vmatmul.f32.gmra.mxu3 %v3098_v26  ;;  %v710_v26 = vrot.slane %v3120_v42, 1 }
 0x13e   : > { %v3338_v21 = vpop.f32.mrf.mxu2  ;;  %v3340_v25 = vpop.f32.mrf.mxu0 }
 0x13f   : > { %v3365_v62 = vsel %vm674_vm1, %v710_v26, %v711_v41  ;;  %v824_v26 = vrot.slane %v3137_v51, 2  ;;  %v1068_v41 = vld [vmem:[%s2917_s27 + $0x330] sm:$0xff] }
 0x140   : > { %v3345_v30 = vpop.f32.mrf.mxu1  ;;  %v3347_v32 = vpop.f32.mrf.mxu3  ;;  %4197 = vst [vmem:[#allocation13_spill] sm:$0xff] %v3365_v62  ;;  %1797 = vmatpush.msra.mxu2 %v1068_v41 }
 0x141   : > { %4195 = vst [vmem:[#allocation11_spill] sm:$0xff] %v3347_v32  ;;  %1611 = vmatmul.f32.gmra.mxu0 %v3343_v28  ;;  %v716_v32 = vrot.slane %v3001_v22, 1  ;;  %v3419_v63 = vsel %vm787_vm2, %v824_v26, %v826_v15 }
 0x142   : > { %4205 = vst [vmem:[#allocation21_spill] sm:$0xff] %v3419_v63 }
 0x143   : > { %1275 = vmatmul.f32.gmra.mxu1 %v3320_v2  ;;  %1388 = vmatmul.f32.gmra.mxu2 %v3350_v5 }
 0x145   : > { %1501 = vmatmul.f32.gmra.mxu3 %v3120_v42  ;;  %v3395_v42 = vsel %vm787_vm2, %v823_v23, %v824_v26 }
 0x146   : > { %v3360_v53 = vpop.f32.mrf.mxu2  ;;  %v3362_v60 = vpop.f32.mrf.mxu0  ;;  %4202 = vst [vmem:[#allocation18_spill] sm:$0xff] %v3395_v42 }
 0x148   : > { %v3369_v3 = vpop.f32.mrf.mxu1  ;;  %v3371_v14 = vpop.f32.mrf.mxu3 }
 0x149   : > { %4198 = vst [vmem:[#allocation14_spill] sm:$0xff] %v3371_v14  ;;  %1614 = vmatmul.f32.gmra.mxu0 %v3365_v62 }
 0x14b   : > { %1278 = vmatmul.f32.gmra.mxu1 %v3343_v28  ;;  %1391 = vmatmul.f32.gmra.mxu2 %v3374_v9  ;;  %v598_v9 = vld [vmem:[%s2924_s7 + $0xd0] sm:$0x3] }
 0x14c   : > { %v1052_v28 = vld [vmem:[%s2917_s27 + $0x2b0] sm:$0xff]  ;;  %v718_v41 = vrot.slane %v598_v9, 1  ;;  %v831_v59 = vrot.slane %v598_v9, 2 }
 0x14d   : > { %1504 = vmatmul.f32.gmra.mxu3 %v3137_v51  ;;  %v715_v51 = vrot.slane %v2979_v8, 1  ;;  %1684 = vmatpush.msra.mxu1 %v1052_v28 }
 0x14e   : > { %v3383_v40 = vpop.f32.mrf.mxu2  ;;  %v3385_v7 = vpop.f32.mrf.mxu0  ;;  %v3433_v28 = vsel %vm674_vm1, %v716_v32, %v718_v41  ;;  %v3455_v9 = vsel %vm787_vm2, %v829_v46, %v831_v59 }
 0x14f   : > { %v3410_v12 = vsel %vm674_vm1, %v715_v51, %v716_v32  ;;  %v828_v51 = vrot.slane %v2979_v8, 2  ;;  %v1067_v32 = vld [vmem:[%s2917_s27 + $0x328] sm:$0xff] }
 0x150   : > { %v3390_v33 = vpop.f32.mrf.mxu1  ;;  %v3392_v14 = vpop.f32.mrf.mxu3  ;;  %4203 = vst [vmem:[#allocation19_spill] sm:$0xff] %v3410_v12  ;;  %1798 = vmatpush.msra.mxu2 %v1067_v32 }
 0x151   : > { %4201 = vst [vmem:[#allocation17_spill] sm:$0xff] %v3392_v14  ;;  %1617 = vmatmul.f32.gmra.mxu0 %v3388_v20 }
 0x153   : > { %1281 = vmatmul.f32.gmra.mxu1 %v3365_v62  ;;  %1394 = vmatmul.f32.gmra.mxu2 %v3395_v42 }
 0x155   : > { %1507 = vmatmul.f32.gmra.mxu3 %v2979_v8  ;;  %v3438_v8 = vsel %vm787_vm2, %v828_v51, %v829_v46  ;;  %v1083_v51 = vld [vmem:[%s2917_s27 + $0x3a8] sm:$0xff] }
 0x156   : > { %v3405_v14 = vpop.f32.mrf.mxu2  ;;  %v3407_v23 = vpop.f32.mrf.mxu0  ;;  %4207 = vst [vmem:[#allocation23_spill] sm:$0xff] %v3438_v8  ;;  %1911 = vmatpush.msra.mxu3 %v1083_v51  ;;  %v1099_v46 = vld [vmem:[%s2917_s27 + $0x428] sm:$0xff] }
 0x157   : > { %2024 = vmatpush.msra.mxu0 %v1099_v46 }
 0x158   : > { %v3414_v62 = vpop.f32.mrf.mxu1  ;;  %v3416_v42 = vpop.f32.mrf.mxu3 }
 0x159   : > { %4204 = vst [vmem:[#allocation20_spill] sm:$0xff] %v3416_v42  ;;  %1620 = vmatmul.f32.gmra.mxu0 %v3410_v12 }
 0x15b   : > { %1284 = vmatmul.f32.gmra.mxu1 %v3388_v20  ;;  %1397 = vmatmul.f32.gmra.mxu2 %v3419_v63  ;;  %v721_v20 = vrot.slane %v3051_v54, 1 }
 0x15d   : > { %1510 = vmatmul.f32.gmra.mxu3 %v3001_v22  ;;  %v720_v22 = vrot.slane %v3026_v38, 1 }
 0x15e   : > { %v3428_v42 = vpop.f32.mrf.mxu2  ;;  %v3430_v26 = vpop.f32.mrf.mxu0 }
 0x15f   : > { %v3450_v2 = vsel %vm674_vm1, %v720_v22, %v721_v20  ;;  %v834_v22 = vrot.slane %v3051_v54, 2 }
 0x160   : > { %v3435_v15 = vpop.f32.mrf.mxu3  ;;  %v1240_v63 = vpop.f32.mrf.mxu1 }
 0x161   : > { %4206 = vst [vmem:[#allocation22_spill] sm:$0xff] %v3435_v15  ;;  %1623 = vmatmul.f32.gmra.mxu0 %v3433_v28  ;;  %v1241_v41 = vadd.f32 %v1240_v63, %v3272_v29  ;;  %v723_v63 = vrot.slane %v601_v13, 1 }
 0x163   : > { %1287 = vmatmul.f32.gmra.mxu1 %v3410_v12  ;;  %1400 = vmatmul.f32.gmra.mxu2 %v3438_v8  ;;  %v1051_v12 = vld [vmem:[%s2917_s27 + $0x2a8] sm:$0xff] }
 0x164   : > { %1685 = vmatpush.msra.mxu1 %v1051_v12 }
 0x165   : > { %1513 = vmatmul.f32.gmra.mxu3 %v3026_v38 }
 0x166   : > { %v1353_v15 = vpop.f32.mrf.mxu2  ;;  %v1579_v5 = vpop.f32.mrf.mxu0 }
 0x167   : > { %v1354_v36 = vadd.f32 %v1353_v15, %v1241_v41  ;;  %v833_v15 = vrot.slane %v3026_v38, 2 }
 0x168   : > { %v1243_v56 = vpop.f32.mrf.mxu1  ;;  %v1466_v8 = vpop.f32.mrf.mxu3 }
 0x169   : > { %v1467_v29 = vadd.f32 %v1466_v8, %v1354_v36  ;;  %1626 = vmatmul.f32.gmra.mxu0 %v3450_v2  ;;  %v1244_v41 = vadd.f32 %v1243_v56, %v3295_v48  ;;  %v3468_v8 = vsel %vm674_vm1, %v721_v20, %v723_v63  ;;  %v3471_v38 = vsel %vm787_vm2, %v833_v15, %v834_v22  ;;  %v1066_v20 = vld [vmem:[%s2917_s27 + $0x320] sm:$0xff] }
 0x16a   : > { %v726_v48 = vrot.slane %v3101_v27, 1  ;;  %v836_v63 = vrot.slane %v601_v13, 2  ;;  %1799 = vmatpush.msra.mxu2 %v1066_v20 }
 0x16b   : > { %v3458_v32 = vadd.f32 %v1579_v5, %v1467_v29  ;;  %1290 = vmatmul.f32.gmra.mxu1 %v3433_v28  ;;  %1403 = vmatmul.f32.gmra.mxu2 %v3455_v9 }
 0x16c   : > { %v3490_v13 = vsel %vm787_vm2, %v834_v22, %v836_v63  ;;  %v1098_v22 = vld [vmem:[%s2917_s27 + $0x420] sm:$0xff] }
 0x16d   : > { %4208 = vst [vmem:[#allocation24_spill] sm:$0xff] %v3458_v32  ;;  %1516 = vmatmul.f32.gmra.mxu3 %v3051_v54  ;;  %v725_v54 = vrot.slane %v3076_v6, 1  ;;  %2025 = vmatpush.msra.mxu0 %v1098_v22 }
 0x16e   : > { %v1356_v36 = vpop.f32.mrf.mxu2  ;;  %v1582_v12 = vpop.f32.mrf.mxu0 }
 0x16f   : > { %v1357_v5 = vadd.f32 %v1356_v36, %v1244_v41  ;;  %v1082_v41 = vld [vmem:[%s2917_s27 + $0x3a0] sm:$0xff] }
 0x170   : > { %v1246_v59 = vpop.f32.mrf.mxu1  ;;  %v1469_v51 = vpop.f32.mrf.mxu3  ;;  %1912 = vmatpush.msra.mxu3 %v1082_v41 }
 0x171   : > { %v1470_v29 = vadd.f32 %v1469_v51, %v1357_v5  ;;  %1629 = vmatmul.f32.gmra.mxu0 %v3468_v8  ;;  %v1247_v15 = vadd.f32 %v1246_v59, %v3317_v61  ;;  %v3485_v5 = vsel %vm674_vm1, %v725_v54, %v726_v48  ;;  %v604_v51 = vld [vmem:[%s2924_s7 + $0x100] sm:$0x3]  ;;  %v838_v54 = vrot.slane %v3076_v6, 2 }
 0x172   : > { %v728_v59 = vrot.slane %v604_v51, 1 }
 0x173   : > { %v3476_v56 = vadd.f32 %v1582_v12, %v1470_v29  ;;  %1293 = vmatmul.f32.gmra.mxu1 %v3450_v2  ;;  %1406 = vmatmul.f32.gmra.mxu2 %v3471_v38  ;;  %v1050_v29 = vld [vmem:[%s2917_s27 + $0x2a0] sm:$0xff] }
 0x174   : > { %1686 = vmatpush.msra.mxu1 %v1050_v29 }
 0x175   : > { %4209 = vst [vmem:[#allocation25_spill] sm:$0xff] %v3476_v56  ;;  %1519 = vmatmul.f32.gmra.mxu3 %v3076_v6 }
 0x176   : > { %v1359_v46 = vpop.f32.mrf.mxu2  ;;  %v1585_v36 = vpop.f32.mrf.mxu0 }
 0x177   : > { %v1360_v12 = vadd.f32 %v1359_v46, %v1247_v15  ;;  %v839_v15 = vrot.slane %v3101_v27, 2  ;;  %v3503_v46 = vsel %vm674_vm1, %v726_v48, %v728_v59  ;;  %v1065_v48 = vld [vmem:[%s2917_s27 + $0x318] sm:$0xff]  ;;  %v841_v59 = vrot.slane %v604_v51, 2 }
 0x178   : > { %v1249_v56 = vpop.f32.mrf.mxu1  ;;  %v1472_v32 = vpop.f32.mrf.mxu3  ;;  %1800 = vmatpush.msra.mxu2 %v1065_v48 }
 0x179   : > { %v1473_v61 = vadd.f32 %v1472_v32, %v1360_v12  ;;  %1632 = vmatmul.f32.gmra.mxu0 %v3485_v5  ;;  %v1250_v41 = vadd.f32 %v1249_v56, %v3340_v25  ;;  %v3506_v6 = vsel %vm787_vm2, %v838_v54, %v839_v15  ;;  %v731_v25 = vrot.slane %v3140_v52, 1 }
 0x17a   : > { %v3525_v51 = vsel %vm787_vm2, %v839_v15, %v841_v59 }
 0x17b   : > { %v3493_v20 = vadd.f32 %v1585_v36, %v1473_v61  ;;  %1296 = vmatmul.f32.gmra.mxu1 %v3468_v8  ;;  %1409 = vmatmul.f32.gmra.mxu2 %v3490_v13 }
 0x17d   : > { %4210 = vst [vmem:[#allocation26_spill] sm:$0xff] %v3493_v20  ;;  %1522 = vmatmul.f32.gmra.mxu3 %v3101_v27  ;;  %v730_v27 = vrot.slane %v3123_v43, 1 }
 0x17e   : > { %v1362_v32 = vpop.f32.mrf.mxu2  ;;  %v1588_v63 = vpop.f32.mrf.mxu0 }
 0x17f   : > { %v1363_v36 = vadd.f32 %v1362_v32, %v1250_v41  ;;  %v1081_v41 = vld [vmem:[%s2917_s27 + $0x398] sm:$0xff] }
 0x180   : > { %v1252_v12 = vpop.f32.mrf.mxu1  ;;  %v1475_v29 = vpop.f32.mrf.mxu3  ;;  %1913 = vmatpush.msra.mxu3 %v1081_v41 }
 0x181   : > { %v1476_v61 = vadd.f32 %v1475_v29, %v1363_v36  ;;  %1635 = vmatmul.f32.gmra.mxu0 %v3503_v46  ;;  %v1253_v54 = vadd.f32 %v1252_v12, %v3362_v60  ;;  %v3520_v36 = vsel %vm674_vm1, %v730_v27, %v731_v25  ;;  %v607_v29 = vld [vmem:[%s2924_s7 + $0x118] sm:$0x3]  ;;  %v843_v27 = vrot.slane %v3123_v43, 2 }
 0x182   : > { %4212 = vst [vmem:[#allocation28_spill] sm:$0xff] %v3520_v36  ;;  %v733_v12 = vrot.slane %v607_v29, 1 }
 0x183   : > { %v3511_v56 = vadd.f32 %v1588_v63, %v1476_v61  ;;  %1299 = vmatmul.f32.gmra.mxu1 %v3485_v5  ;;  %1412 = vmatmul.f32.gmra.mxu2 %v3506_v6  ;;  %v1049_v61 = vld [vmem:[%s2917_s27 + $0x298] sm:$0xff] }
 0x184   : > { %1687 = vmatpush.msra.mxu1 %v1049_v61 }
 0x185   : > { %4211 = vst [vmem:[#allocation27_spill] sm:$0xff] %v3511_v56  ;;  %1525 = vmatmul.f32.gmra.mxu3 %v3123_v43 }
 0x186   : > { %v1365_v22 = vpop.f32.mrf.mxu2  ;;  %v1591_v32 = vpop.f32.mrf.mxu0 }
 0x187   : > { %v1366_v63 = vadd.f32 %v1365_v22, %v1253_v54  ;;  %v844_v54 = vrot.slane %v3140_v52, 2  ;;  %v3538_v22 = vsel %vm674_vm1, %v731_v25, %v733_v12 }
 0x188   : > { %v1255_v56 = vpop.f32.mrf.mxu1  ;;  %v1478_v20 = vpop.f32.mrf.mxu3 }
 0x189   : > { %v1479_v60 = vadd.f32 %v1478_v20, %v1366_v63  ;;  %1638 = vmatmul.f32.gmra.mxu0 %v3520_v36  ;;  %v1256_v15 = vadd.f32 %v1255_v56, %v3385_v7  ;;  %v1097_v20 = vld [vmem:[%s2917_s27 + $0x418] sm:$0xff]  ;;  %v3541_v43 = vsel %vm787_vm2, %v843_v27, %v844_v54  ;;  %v3545_v7 = vld [vmem:[%s2924_s7 + $0x120] sm:$0xff] }
 0x18a   : > { %2026 = vmatpush.msra.mxu0 %v1097_v20  ;;  %4214 = vst [vmem:[#allocation30_spill] sm:$0xff] %v3541_v43  ;;  %v3549_v56 = vld [vmem:[%s2924_s7 + $0x128] sm:$0xff]  ;;  %v1064_v27 = vld [vmem:[%s2917_s27 + $0x310] sm:$0xff] }
 0x18b   : > { %v3528_v48 = vadd.f32 %v1591_v32, %v1479_v60  ;;  %1302 = vmatmul.f32.gmra.mxu1 %v3503_v46  ;;  %1415 = vmatmul.f32.gmra.mxu2 %v3525_v51  ;;  %4215 = vst [vmem:[#allocation31_spill] sm:$0xff] %v3545_v7  ;;  %v736_v25 = vrot.slane %v3549_v56, 1 }
 0x18c   : > { %4216 = vst [vmem:[#allocation32_spill] sm:$0xff] %v3549_v56  ;;  %1801 = vmatpush.msra.mxu2 %v1064_v27 }
 0x18d   : > { %4213 = vst [vmem:[#allocation29_spill] sm:$0xff] %v3528_v48  ;;  %1528 = vmatmul.f32.gmra.mxu3 %v3140_v52  ;;  %v735_v52 = vrot.slane %v3545_v7, 1 }
 0x18e   : > { %v1368_v59 = vpop.f32.mrf.mxu2  ;;  %v1594_v41 = vpop.f32.mrf.mxu0 }
 0x18f   : > { %v1369_v32 = vadd.f32 %v1368_v59, %v1256_v15  ;;  %v846_v15 = vrot.slane %v607_v29, 2  ;;  %v1080_v59 = vld [vmem:[%s2917_s27 + $0x390] sm:$0xff]  ;;  %v3561_v48 = vsel %vm674_vm1, %v735_v52, %v736_v25  ;;  %v848_v52 = vrot.slane %v3545_v7, 2 }
 0x190   : > { %v1258_v63 = vpop.f32.mrf.mxu1  ;;  %v1481_v61 = vpop.f32.mrf.mxu3  ;;  %4218 = vst [vmem:[#allocation34_spill] sm:$0xff] %v3561_v48  ;;  %1914 = vmatpush.msra.mxu3 %v1080_v59 }
 0x191   : > { %v1482_v60 = vadd.f32 %v1481_v61, %v1369_v32  ;;  %1641 = vmatmul.f32.gmra.mxu0 %v3538_v22  ;;  %v1259_v20 = vadd.f32 %v1258_v63, %v3407_v23  ;;  %v3566_v29 = vsel %vm787_vm2, %v844_v54, %v846_v15 }
 0x193   : > { %v3552_v12 = vadd.f32 %v1594_v41, %v1482_v60  ;;  %1305 = vmatmul.f32.gmra.mxu1 %v3520_v36  ;;  %1418 = vmatmul.f32.gmra.mxu2 %v3541_v43  ;;  %v610_v60 = vld [vmem:[%s2924_s7 + $0x130] sm:$0x3] }
 0x194   : > { %v738_v63 = vrot.slane %v610_v60, 1 }
 0x195   : > { %4217 = vst [vmem:[#allocation33_spill] sm:$0xff] %v3552_v12  ;;  %1531 = vmatmul.f32.gmra.mxu3 %v3545_v7  ;;  %v1048_v12 = vld [vmem:[%s2917_s27 + $0x290] sm:$0xff] }
 0x196   : > { %v1371_v32 = vpop.f32.mrf.mxu2  ;;  %v1597_v61 = vpop.f32.mrf.mxu0  ;;  %1688 = vmatpush.msra.mxu1 %v1048_v12  ;;  %v3579_v59 = vsel %vm674_vm1, %v736_v25, %v738_v63 }
 0x197   : > { %v1372_v41 = vadd.f32 %v1371_v32, %v1259_v20  ;;  %v849_v20 = vrot.slane %v3549_v56, 2 }
 0x198   : > { %v1261_v36 = vpop.f32.mrf.mxu1  ;;  %v1484_v43 = vpop.f32.mrf.mxu3 }
 0x199   : > { %v1485_v23 = vadd.f32 %v1484_v43, %v1372_v41  ;;  %1644 = vmatmul.f32.gmra.mxu0 %v3561_v48  ;;  %v1262_v54 = vadd.f32 %v1261_v36, %v3430_v26  ;;  %v1096_v43 = vld [vmem:[%s2917_s27 + $0x410] sm:$0xff]  ;;  %v3586_v26 = vld [vmem:[%s2924_s7 + $0x138] sm:$0xff] }
 0x19a   : > { %2027 = vmatpush.msra.mxu0 %v1096_v43  ;;  %4221 = vst [vmem:[#allocation37_spill] sm:$0xff] %v3586_v26  ;;  %v740_v36 = vrot.slane %v3586_v26, 1 }
 0x19b   : > { %v3569_v27 = vadd.f32 %v1597_v61, %v1485_v23  ;;  %1308 = vmatmul.f32.gmra.mxu1 %v3538_v22  ;;  %1421 = vmatmul.f32.gmra.mxu2 %v3566_v29  ;;  %v3582_v23 = vsel %vm787_vm2, %v848_v52, %v849_v20  ;;  %v1063_v52 = vld [vmem:[%s2917_s27 + $0x308] sm:$0xff] }
 0x19c   : > { %4220 = vst [vmem:[#allocation36_spill] sm:$0xff] %v3582_v23  ;;  %1802 = vmatpush.msra.mxu2 %v1063_v52 }
 0x19d   : > { %4219 = vst [vmem:[#allocation35_spill] sm:$0xff] %v3569_v27  ;;  %1534 = vmatmul.f32.gmra.mxu3 %v3549_v56  ;;  %v3590_v56 = vld [vmem:[%s2924_s7 + $0x140] sm:$0xff] }
 0x19e   : > { %v1374_v12 = vpop.f32.mrf.mxu2  ;;  %v1600_v15 = vpop.f32.mrf.mxu0  ;;  %4222 = vst [vmem:[#allocation38_spill] sm:$0xff] %v3590_v56  ;;  %v741_v25 = vrot.slane %v3590_v56, 1 }
 0x19f   : > { %v1375_v32 = vadd.f32 %v1374_v12, %v1262_v54  ;;  %v851_v54 = vrot.slane %v610_v60, 2  ;;  %v1079_v12 = vld [vmem:[%s2917_s27 + $0x388] sm:$0xff] }
 0x1a0   : > { %v1264_v61 = vpop.f32.mrf.mxu1  ;;  %v1487_v41 = vpop.f32.mrf.mxu3  ;;  %v3602_v7 = vsel %vm674_vm1, %v740_v36, %v741_v25  ;;  %1915 = vmatpush.msra.mxu3 %v1079_v12  ;;  %v853_v36 = vrot.slane %v3586_v26, 2 }
 0x1a1   : > { %v1488_v27 = vadd.f32 %v1487_v41, %v1375_v32  ;;  %1647 = vmatmul.f32.gmra.mxu0 %v3579_v59  ;;  %v1265_v43 = vadd.f32 %v1264_v61, %v3257_v18  ;;  %4224 = vst [vmem:[#allocation40_spill] sm:$0xff] %v3602_v7  ;;  %v3607_v60 = vsel %vm787_vm2, %v849_v20, %v851_v54 }
 0x1a3   : > { %v3593_v63 = vadd.f32 %v1600_v15, %v1488_v27  ;;  %1311 = vmatmul.f32.gmra.mxu1 %v3561_v48  ;;  %1424 = vmatmul.f32.gmra.mxu2 %v3582_v23  ;;  %v613_v15 = vld [vmem:[%s2924_s7 + $0x148] sm:$0x3] }
 0x1a4   : > { %v743_v61 = vrot.slane %v613_v15, 1 }
 0x1a5   : > { %4223 = vst [vmem:[#allocation39_spill] sm:$0xff] %v3593_v63  ;;  %1537 = vmatmul.f32.gmra.mxu3 %v3586_v26  ;;  %v1047_v63 = vld [vmem:[%s2917_s27 + $0x288] sm:$0xff] }
 0x1a6   : > { %v1377_v32 = vpop.f32.mrf.mxu2  ;;  %v1603_v41 = vpop.f32.mrf.mxu0  ;;  %1689 = vmatpush.msra.mxu1 %v1047_v63  ;;  %v3620_v12 = vsel %vm674_vm1, %v741_v25, %v743_v61 }
 0x1a7   : > { %v1378_v27 = vadd.f32 %v1377_v32, %v1265_v43  ;;  %v854_v43 = vrot.slane %v3590_v56, 2  ;;  %4226 = vst [vmem:[#allocation42_spill] sm:$0xff] %v3620_v12 }
 0x1a8   : > { %v1267_v48 = vpop.f32.mrf.mxu1  ;;  %v1490_v23 = vpop.f32.mrf.mxu3 }
 0x1a9   : > { %v1491_v18 = vadd.f32 %v1490_v23, %v1378_v27  ;;  %1650 = vmatmul.f32.gmra.mxu0 %v3602_v7  ;;  %v1268_v20 = vadd.f32 %v1267_v48, %v3279_v35  ;;  %v1095_v23 = vld [vmem:[%s2917_s27 + $0x408] sm:$0xff]  ;;  %v3627_v35 = vld [vmem:[%s2924_s7 + $0x150] sm:$0xff] }
 0x1aa   : > { %2028 = vmatpush.msra.mxu0 %v1095_v23  ;;  %4228 = vst [vmem:[#allocation44_spill] sm:$0xff] %v3627_v35  ;;  %v745_v48 = vrot.slane %v3627_v35, 1 }
 0x1ab   : > { %v3610_v52 = vadd.f32 %v1603_v41, %v1491_v18  ;;  %1314 = vmatmul.f32.gmra.mxu1 %v3579_v59  ;;  %1427 = vmatmul.f32.gmra.mxu2 %v3607_v60  ;;  %v3623_v18 = vsel %vm787_vm2, %v853_v36, %v854_v43  ;;  %v1062_v36 = vld [vmem:[%s2917_s27 + $0x300] sm:$0xff] }
 0x1ac   : > { %4227 = vst [vmem:[#allocation43_spill] sm:$0xff] %v3623_v18  ;;  %1803 = vmatpush.msra.mxu2 %v1062_v36 }
 0x1ad   : > { %4225 = vst [vmem:[#allocation41_spill] sm:$0xff] %v3610_v52  ;;  %1540 = vmatmul.f32.gmra.mxu3 %v3590_v56  ;;  %v3631_v56 = vld [vmem:[%s2924_s7 + $0x158] sm:$0xff] }
 0x1ae   : > { %v1380_v63 = vpop.f32.mrf.mxu2  ;;  %v1606_v54 = vpop.f32.mrf.mxu0  ;;  %4229 = vst [vmem:[#allocation45_spill] sm:$0xff] %v3631_v56  ;;  %v746_v25 = vrot.slane %v3631_v56, 1 }
 0x1af   : > { %v1381_v32 = vadd.f32 %v1380_v63, %v1268_v20  ;;  %v856_v20 = vrot.slane %v613_v15, 2  ;;  %v1078_v63 = vld [vmem:[%s2917_s27 + $0x380] sm:$0xff] }
 0x1b0   : > { %v1270_v41 = vpop.f32.mrf.mxu1  ;;  %v1493_v27 = vpop.f32.mrf.mxu3  ;;  %v3643_v26 = vsel %vm674_vm1, %v745_v48, %v746_v25  ;;  %1916 = vmatpush.msra.mxu3 %v1078_v63  ;;  %v858_v48 = vrot.slane %v3627_v35, 2 }
 0x1b1   : > { %v1494_v52 = vadd.f32 %v1493_v27, %v1381_v32  ;;  %1653 = vmatmul.f32.gmra.mxu0 %v3620_v12  ;;  %v1271_v23 = vadd.f32 %v1270_v41, %v3300_v57  ;;  %v3648_v15 = vsel %vm787_vm2, %v854_v43, %v856_v20 }
 0x1b2   : > { %4231 = vst [vmem:[#allocation47_spill] sm:$0xff] %v3648_v15 }
 0x1b3   : > { %v3634_v61 = vadd.f32 %v1606_v54, %v1494_v52  ;;  %1317 = vmatmul.f32.gmra.mxu1 %v3602_v7  ;;  %1430 = vmatmul.f32.gmra.mxu2 %v3623_v18  ;;  %v616_v54 = vld [vmem:[%s2924_s7 + $0x160] sm:$0x3] }
 0x1b4   : > { %v748_v41 = vrot.slane %v616_v54, 1 }
 0x1b5   : > { %4230 = vst [vmem:[#allocation46_spill] sm:$0xff] %v3634_v61  ;;  %1543 = vmatmul.f32.gmra.mxu3 %v3627_v35  ;;  %v1046_v61 = vld [vmem:[%s2917_s27 + $0x280] sm:$0xff]  ;;  %v619_v35 = vld [vmem:[%s2924_s7 + $0x178] sm:$0x3] }
 0x1b6   : > { %v1383_v32 = vpop.f32.mrf.mxu2  ;;  %v1609_v27 = vpop.f32.mrf.mxu0  ;;  %1690 = vmatpush.msra.mxu1 %v1046_v61  ;;  %v3661_v63 = vsel %vm674_vm1, %v746_v25, %v748_v41 }
 0x1b7   : > { %v1384_v52 = vadd.f32 %v1383_v32, %v1271_v23  ;;  %v859_v23 = vrot.slane %v3631_v56, 2 }
 0x1b8   : > { %v1273_v7 = vpop.f32.mrf.mxu1  ;;  %v1496_v18 = vpop.f32.mrf.mxu3 }
 0x1b9   : > { %v1497_v57 = vadd.f32 %v1496_v18, %v1384_v52  ;;  %1656 = vmatmul.f32.gmra.mxu0 %v3643_v26  ;;  %v1274_v43 = vadd.f32 %v1273_v7, %v3324_v10  ;;  %v1094_v18 = vld [vmem:[%s2917_s27 + $0x400] sm:$0xff]  ;;  %v3668_v10 = vld [vmem:[%s2924_s7 + $0x168] sm:$0xff] }
 0x1ba   : > { %2029 = vmatpush.msra.mxu0 %v1094_v18  ;;  %4233 = vst [vmem:[#allocation49_spill] sm:$0xff] %v3668_v10  ;;  %v750_v7 = vrot.slane %v3668_v10, 1 }
 0x1bb   : > { %v3651_v36 = vadd.f32 %v1609_v27, %v1497_v57  ;;  %1320 = vmatmul.f32.gmra.mxu1 %v3620_v12  ;;  %1433 = vmatmul.f32.gmra.mxu2 %v3648_v15  ;;  %v3664_v57 = vsel %vm787_vm2, %v858_v48, %v859_v23  ;;  %v861_v48 = vrot.slane %v616_v54, 2  ;;  %v753_v54 = vrot.slane %v619_v35, 1 }
 0x1bd   : > { %4232 = vst [vmem:[#allocation48_spill] sm:$0xff] %v3651_v36  ;;  %1546 = vmatmul.f32.gmra.mxu3 %v3631_v56  ;;  %v3672_v56 = vld [vmem:[%s2924_s7 + $0x170] sm:$0xff] }
 0x1be   : > { %v1386_v61 = vpop.f32.mrf.mxu2  ;;  %v1612_v20 = vpop.f32.mrf.mxu0  ;;  %4234 = vst [vmem:[#allocation50_spill] sm:$0xff] %v3672_v56  ;;  %v751_v25 = vrot.slane %v3672_v56, 1 }
 0x1bf   : > { %v1387_v32 = vadd.f32 %v1386_v61, %v1274_v43 }
 0x1c0   : > { %v1276_v27 = vpop.f32.mrf.mxu1  ;;  %v1499_v52 = vpop.f32.mrf.mxu3 }
 0x1c1   : > { %v1500_v36 = vadd.f32 %v1499_v52, %v1387_v32  ;;  %1659 = vmatmul.f32.gmra.mxu0 %v3661_v63  ;;  %v1277_v43 = vadd.f32 %v1276_v27, %v3345_v30  ;;  %v3682_v32 = vsel %vm674_vm1, %v750_v7, %v751_v25  ;;  %v863_v27 = vrot.slane %v3668_v10, 2 }
 0x1c2   : > { %v864_v7 = vrot.slane %v3672_v56, 2 }
 0x1c3   : > { %v3675_v41 = vadd.f32 %v1612_v20, %v1500_v36  ;;  %1323 = vmatmul.f32.gmra.mxu1 %v3643_v26  ;;  %1436 = vmatmul.f32.gmra.mxu2 %v3664_v57  ;;  %v3686_v36 = vsel %vm787_vm2, %v859_v23, %v861_v48  ;;  %v3698_v48 = vsel %vm674_vm1, %v751_v25, %v753_v54  ;;  %v866_v54 = vrot.slane %v619_v35, 2 }
 0x1c4   : > { %4236 = vst [vmem:[#allocation52_spill] sm:$0xff] %v3686_v36 }
 0x1c5   : > { %4235 = vst [vmem:[#allocation51_spill] sm:$0xff] %v3675_v41  ;;  %1549 = vmatmul.f32.gmra.mxu3 %v3668_v10  ;;  %v3707_v10 = vld [vmem:[%s2924_s7 + $0x180] sm:$0xff] }
 0x1c6   : > { %v1389_v18 = vpop.f32.mrf.mxu2  ;;  %v1615_v61 = vpop.f32.mrf.mxu0 }
 0x1c7   : > { %v1390_v52 = vadd.f32 %v1389_v18, %v1277_v43 }
 0x1c8   : > { %v1279_v15 = vpop.f32.mrf.mxu1  ;;  %v1502_v12 = vpop.f32.mrf.mxu3 }
 0x1c9   : > { %v1503_v20 = vadd.f32 %v1502_v12, %v1390_v52  ;;  %1662 = vmatmul.f32.gmra.mxu0 %v3682_v32  ;;  %v1280_v43 = vadd.f32 %v1279_v15, %v3369_v3  ;;  %v903_v3 = vrot.slane %v3707_v10, 1 }
 0x1cb   : > { %v3689_v30 = vadd.f32 %v1615_v61, %v1503_v20  ;;  %1326 = vmatmul.f32.gmra.mxu1 %v3661_v63  ;;  %1439 = vmatmul.f32.gmra.mxu2 %v3686_v36  ;;  %v3701_v61 = vld [vmem:[%s2924_s7 + $0x188] sm:$0xff] }
 0x1cc   : > { %v904_v15 = vrot.slane %v3701_v61, 1 }
 0x1cd   : > { %4237 = vst [vmem:[#allocation53_spill] sm:$0xff] %v3689_v30  ;;  %1552 = vmatmul.f32.gmra.mxu3 %v3672_v56  ;;  %v3704_v30 = vsel %vm787_vm2, %v863_v27, %v864_v7  ;;  %v3722_v56 = vld [vmem:[%s2924_s7 + $0x190] sm:$0x3] }
 0x1ce   : > { %v1392_v23 = vpop.f32.mrf.mxu2  ;;  %v1618_v12 = vpop.f32.mrf.mxu0 }
 0x1cf   : > { %v1393_v18 = vadd.f32 %v1392_v23, %v1280_v43 }
 0x1d0   : > { %v1282_v52 = vpop.f32.mrf.mxu1  ;;  %v1505_v20 = vpop.f32.mrf.mxu3 }
 0x1d1   : > { %v1506_v41 = vadd.f32 %v1505_v20, %v1393_v18  ;;  %1665 = vmatmul.f32.gmra.mxu0 %v3698_v48  ;;  %v1283_v27 = vadd.f32 %v1282_v52, %v3390_v33  ;;  %v3719_v18 = vsel %vm674_vm1, %v903_v3, %v904_v15  ;;  %v906_v33 = vrot.slane %v3722_v56, 1 }
 0x1d3   : > { %v3712_v25 = vadd.f32 %v1618_v12, %v1506_v41  ;;  %1329 = vmatmul.f32.gmra.mxu1 %v3682_v32  ;;  %1442 = vmatmul.f32.gmra.mxu2 %v3704_v30  ;;  %v3725_v12 = vsel %vm787_vm2, %v864_v7, %v866_v54  ;;  %v3736_v7 = vsel %vm674_vm1, %v904_v15, %v906_v33 }
 0x1d5   : > { %4238 = vst [vmem:[#allocation54_spill] sm:$0xff] %v3712_v25  ;;  %1555 = vmatmul.f32.gmra.mxu3 %v3707_v10 }
 0x1d6   : > { %v1395_v43 = vpop.f32.mrf.mxu2  ;;  %v1621_v23 = vpop.f32.mrf.mxu0 }
 0x1d7   : > { %v1396_v20 = vadd.f32 %v1395_v43, %v1283_v27 }
 0x1d8   : > { %v1285_v36 = vpop.f32.mrf.mxu1  ;;  %v1508_v41 = vpop.f32.mrf.mxu3 }
 0x1d9   : > { %v1509_v25 = vadd.f32 %v1508_v41, %v1396_v20  ;;  %1668 = vmatmul.f32.gmra.mxu0 %v3719_v18  ;;  %v1286_v52 = vadd.f32 %v1285_v36, %v3414_v62 }
 0x1db   : > { %v3729_v35 = vadd.f32 %v1621_v23, %v1509_v25  ;;  %1332 = vmatmul.f32.gmra.mxu1 %v3698_v48  ;;  %1445 = vmatmul.f32.gmra.mxu2 %v3725_v12  ;;  %v2631_v23 = vld [vmem:[%s2924_s7 + $0x30] sm:$0xff] }
 0x1dd   : > { %4239 = vst [vmem:[#allocation55_spill] sm:$0xff] %v3729_v35  ;;  %1558 = vmatmul.f32.gmra.mxu3 %v3701_v61 }
 0x1de   : > { %v1398_v3 = vpop.f32.mrf.mxu2  ;;  %v1624_v27 = vpop.f32.mrf.mxu0 }
 0x1df   : > { %v1399_v54 = vadd.f32 %v1398_v3, %v1286_v52 }
 0x1e0   : > { %v1288_v43 = vpop.f32.mrf.mxu1  ;;  %v1511_v20 = vpop.f32.mrf.mxu3 }
 0x1e1   : > { %v1512_v41 = vadd.f32 %v1511_v20, %v1399_v54  ;;  %1671 = vmatmul.f32.gmra.mxu0 %v3736_v7  ;;  %v1289_v62 = vadd.f32 %v1288_v43, %v3270_v49 }
 0x1e3   : > { %v3739_v25 = vadd.f32 %v1624_v27, %v1512_v41  ;;  %1691 = vmatmul.f32.vlgmr.msra.gmra.mxu1 %v3174_v24  ;;  %1804 = vmatmul.f32.vlgmr.msra.gmra.mxu2 %v2631_v23  ;;  %v2632_v24 = vld [vmem:[%s2924_s7 + $0x38] sm:$0xff] }
 0x1e5   : > { %1917 = vmatmul.f32.vlgmr.msra.gmra.mxu3 %v3184_v31 }
 0x1e6   : > { %v1401_v36 = vpop.f32.mrf.mxu2  ;;  %v1627_v15 = vpop.f32.mrf.mxu0 }
 0x1e7   : > { %v1402_v33 = vadd.f32 %v1401_v36, %v1289_v62 }
 0x1e8   : > { %v1291_v52 = vpop.f32.mrf.mxu1  ;;  %v1514_v3 = vpop.f32.mrf.mxu3 }
 0x1e9   : > { %v1515_v35 = vadd.f32 %v1514_v3, %v1402_v33  ;;  %2030 = vmatmul.f32.vlgmr.msra.gmra.mxu0 %v3200_v45  ;;  %v1292_v27 = vadd.f32 %v1291_v52, %v3293_v47 }
 0x1eb   : > { %v3746_v54 = vadd.f32 %v1627_v15, %v1515_v35  ;;  %1694 = vmatmul.f32.gmra.mxu1 %v3188_v34  ;;  %1807 = vmatmul.f32.gmra.mxu2 %v2632_v24  ;;  %v2633_v34 = vld [vmem:[%s2924_s7 + $0x48] sm:$0xff] }
 0x1ed   : > { %1920 = vmatmul.f32.gmra.mxu3 %v3197_v44 }
 0x1ee   : > { %v1404_v31 = vpop.f32.mrf.mxu2  ;;  %v1630_v49 = vpop.f32.mrf.mxu0 }
 0x1ef   : > { %v1405_v43 = vadd.f32 %v1404_v31, %v1292_v27 }
 0x1f0   : > { %v1294_v20 = vpop.f32.mrf.mxu1  ;;  %v1517_v41 = vpop.f32.mrf.mxu3 }
 0x1f1   : > { %v1518_v23 = vadd.f32 %v1517_v41, %v1405_v43  ;;  %2033 = vmatmul.f32.gmra.mxu0 %v3216_v58  ;;  %v1295_v35 = vadd.f32 %v1294_v20, %v3315_v50 }
 0x1f3   : > { %v3753_v62 = vadd.f32 %v1630_v49, %v1518_v23  ;;  %1697 = vmatmul.f32.gmra.mxu1 %v3200_v45  ;;  %1810 = vmatmul.f32.gmra.mxu2 %v2633_v34  ;;  %v2634_v45 = vld [vmem:[%s2924_s7 + $0x50] sm:$0xff] }
 0x1f5   : > { %1923 = vmatmul.f32.gmra.mxu3 %v3211_v55 }
 0x1f6   : > { %v1407_v44 = vpop.f32.mrf.mxu2  ;;  %v1633_v47 = vpop.f32.mrf.mxu0 }
 0x1f7   : > { %v1408_v36 = vadd.f32 %v1407_v44, %v1295_v35 }
 0x1f8   : > { %v1297_v15 = vpop.f32.mrf.mxu1  ;;  %v1520_v33 = vpop.f32.mrf.mxu3 }
 0x1f9   : > { %v1521_v52 = vadd.f32 %v1520_v33, %v1408_v36  ;;  %2036 = vmatmul.f32.gmra.mxu0 %v3229_v0  ;;  %v1298_v24 = vadd.f32 %v1297_v15, %v3338_v21 }
 0x1fb   : > { %v3760_v3 = vadd.f32 %v1633_v47, %v1521_v52  ;;  %1700 = vmatmul.f32.gmra.mxu1 %v3216_v58  ;;  %1813 = vmatmul.f32.gmra.mxu2 %v2634_v45  ;;  %v2635_v58 = vld [vmem:[%s2924_s7 + $0x60] sm:$0xff] }
 0x1fd   : > { %1926 = vmatmul.f32.gmra.mxu3 %v3226_v17 }
 0x1fe   : > { %v1410_v55 = vpop.f32.mrf.mxu2  ;;  %v1636_v50 = vpop.f32.mrf.mxu0 }
 0x1ff   : > { %v1411_v27 = vadd.f32 %v1410_v55, %v1298_v24 }
 0x200   : > { %v1300_v31 = vpop.f32.mrf.mxu1  ;;  %v1523_v49 = vpop.f32.mrf.mxu3 }
 0x201   : > { %v1524_v43 = vadd.f32 %v1523_v49, %v1411_v27  ;;  %2039 = vmatmul.f32.gmra.mxu0 %v3245_v11  ;;  %v1301_v41 = vadd.f32 %v1300_v31, %v3360_v53 }
 0x203   : > { %v3767_v20 = vadd.f32 %v1636_v50, %v1524_v43  ;;  %1703 = vmatmul.f32.gmra.mxu1 %v3229_v0  ;;  %1816 = vmatmul.f32.gmra.mxu2 %v2635_v58  ;;  %v2636_v0 = vld [vmem:[%s2924_s7 + $0x68] sm:$0xff] }
 0x205   : > { %1929 = vmatmul.f32.gmra.mxu3 %v3240_v4 }
 0x206   : > { %v1413_v17 = vpop.f32.mrf.mxu2  ;;  %v1639_v21 = vpop.f32.mrf.mxu0 }
 0x207   : > { %v1414_v23 = vadd.f32 %v1413_v17, %v1301_v41 }
 0x208   : > { %v1303_v34 = vpop.f32.mrf.mxu1  ;;  %v1526_v35 = vpop.f32.mrf.mxu3 }
 0x209   : > { %v1527_v44 = vadd.f32 %v1526_v35, %v1414_v23  ;;  %2042 = vmatmul.f32.gmra.mxu0 %v3260_v19  ;;  %v1304_v36 = vadd.f32 %v1303_v34, %v3383_v40  ;;  %v4241_v35 = vld [vmem:[#allocation9_spill] sm:$0xff] }
 0x20b   : > { %v3774_v47 = vadd.f32 %v1639_v21, %v1527_v44  ;;  %1706 = vmatmul.f32.gmra.mxu1 %v3245_v11  ;;  %1819 = vmatmul.f32.gmra.mxu2 %v2636_v0  ;;  %v2637_v11 = vld [vmem:[%s2924_s7 + $0x78] sm:$0xff]  ;;  %v4242_v0 = vld [vmem:[#allocation4_spill] sm:$0xff] }
 0x20d   : > { %1932 = vmatmul.f32.gmra.mxu3 %v3255_v16 }
 0x20e   : > { %v1416_v4 = vpop.f32.mrf.mxu2  ;;  %v1642_v53 = vpop.f32.mrf.mxu0 }
 0x20f   : > { %v1417_v15 = vadd.f32 %v1416_v4, %v1304_v36 }
 0x210   : > { %v1306_v33 = vpop.f32.mrf.mxu1  ;;  %v1529_v52 = vpop.f32.mrf.mxu3 }
 0x211   : > { %v1530_v45 = vadd.f32 %v1529_v52, %v1417_v15  ;;  %2045 = vmatmul.f32.gmra.mxu0 %v3284_v39  ;;  %v1307_v55 = vadd.f32 %v1306_v33, %v3405_v14  ;;  %v4240_v14 = vld [vmem:[#allocation5_spill] sm:$0xff] }
 0x213   : > { %v3781_v24 = vadd.f32 %v1642_v53, %v1530_v45  ;;  %1709 = vmatmul.f32.gmra.mxu1 %v3260_v19  ;;  %1822 = vmatmul.f32.gmra.mxu2 %v2637_v11  ;;  %v2638_v19 = vld [vmem:[%s2924_s7 + $0x80] sm:$0xff] }
 0x214   : > { %v4244_v11 = vld [vmem:[#allocation12_spill] sm:$0xff] }
 0x215   : > { %1935 = vmatmul.f32.gmra.mxu3 %v3275_v1 }
 0x216   : > { %v1419_v16 = vpop.f32.mrf.mxu2  ;;  %v1645_v40 = vpop.f32.mrf.mxu0 }
 0x217   : > { %v1420_v50 = vadd.f32 %v1419_v16, %v1307_v55  ;;  %v4245_v16 = vld [vmem:[#allocation6_spill] sm:$0xff] }
 0x218   : > { %v1309_v27 = vpop.f32.mrf.mxu1  ;;  %v1532_v31 = vpop.f32.mrf.mxu3 }
 0x219   : > { %v1533_v49 = vadd.f32 %v1532_v31, %v1420_v50  ;;  %2048 = vmatmul.f32.gmra.mxu0 %v3305_v37  ;;  %v1310_v58 = vadd.f32 %v1309_v27, %v3428_v42  ;;  %v4243_v42 = vld [vmem:[#allocation7_spill] sm:$0xff]  ;;  %v4246_v50 = vld [vmem:[#allocation10_spill] sm:$0xff] }
 0x21b   : > { %v3788_v43 = vadd.f32 %v1645_v40, %v1533_v49  ;;  %1712 = vmatmul.f32.gmra.mxu1 %v3284_v39  ;;  %1825 = vmatmul.f32.gmra.mxu2 %v2638_v19  ;;  %v2639_v39 = vld [vmem:[%s2924_s7 + $0x90] sm:$0xff] }
 0x21d   : > { %1938 = vmatmul.f32.gmra.mxu3 %v4240_v14 }
 0x21e   : > { %v1422_v1 = vpop.f32.mrf.mxu2  ;;  %v1648_v41 = vpop.f32.mrf.mxu0 }
 0x21f   : > { %v1423_v17 = vadd.f32 %v1422_v1, %v1310_v58  ;;  %v4247_v1 = vld [vmem:[#allocation15_spill] sm:$0xff] }
 0x220   : > { %v1312_v21 = vpop.f32.mrf.mxu1  ;;  %v1535_v23 = vpop.f32.mrf.mxu3 }
 0x221   : > { %v1536_v34 = vadd.f32 %v1535_v23, %v1423_v17  ;;  %2051 = vmatmul.f32.gmra.mxu0 %v4241_v35  ;;  %v1313_v36 = vadd.f32 %v1312_v21, %v4242_v0  ;;  %v2641_v17 = vld [vmem:[%s2924_s7 + $0xa8] sm:$0xff]  ;;  %v4248_v21 = vld [vmem:[#allocation8_spill] sm:$0xff] }
 0x223   : > { %v3795_v44 = vadd.f32 %v1648_v41, %v1536_v34  ;;  %1715 = vmatmul.f32.gmra.mxu1 %v3305_v37  ;;  %1828 = vmatmul.f32.gmra.mxu2 %v2639_v39  ;;  %v2640_v37 = vld [vmem:[%s2924_s7 + $0x98] sm:$0xff] }
 0x224   : > { %v4249_v34 = vld [vmem:[#allocation13_spill] sm:$0xff] }
 0x225   : > { %1941 = vmatmul.f32.gmra.mxu3 %v4243_v42 }
 0x226   : > { %v1425_v4 = vpop.f32.mrf.mxu2  ;;  %v1651_v53 = vpop.f32.mrf.mxu0 }
 0x227   : > { %v1426_v15 = vadd.f32 %v1425_v4, %v1313_v36 }
 0x228   : > { %v1315_v33 = vpop.f32.mrf.mxu1  ;;  %v1538_v52 = vpop.f32.mrf.mxu3 }
 0x229   : > { %v1539_v45 = vadd.f32 %v1538_v52, %v1426_v15  ;;  %2054 = vmatmul.f32.gmra.mxu0 %v4244_v11  ;;  %v1316_v40 = vadd.f32 %v1315_v33, %v4245_v16  ;;  %v2642_v33 = vld [vmem:[%s2924_s7 + $0xb0] sm:$0xff]  ;;  %v4251_v52 = vld [vmem:[#allocation11_spill] sm:$0xff] }
 0x22b   : > { %v3802_v55 = vadd.f32 %v1651_v53, %v1539_v45  ;;  %1718 = vmatmul.f32.gmra.mxu1 %v4241_v35  ;;  %1831 = vmatmul.f32.gmra.mxu2 %v2640_v37  ;;  %v4250_v53 = vld [vmem:[#allocation18_spill] sm:$0xff] }
 0x22d   : > { %1944 = vmatmul.f32.gmra.mxu3 %v4246_v50 }
 0x22e   : > { %v1428_v27 = vpop.f32.mrf.mxu2  ;;  %v1654_v31 = vpop.f32.mrf.mxu0 }
 0x22f   : > { %v1429_v49 = vadd.f32 %v1428_v27, %v1316_v40 }
 0x230   : > { %v1318_v19 = vpop.f32.mrf.mxu1  ;;  %v1541_v58 = vpop.f32.mrf.mxu3 }
 0x231   : > { %v1542_v14 = vadd.f32 %v1541_v58, %v1429_v49  ;;  %2057 = vmatmul.f32.gmra.mxu0 %v4247_v1  ;;  %v1319_v23 = vadd.f32 %v1318_v19, %v4248_v21  ;;  %v4253_v49 = vld [vmem:[#allocation21_spill] sm:$0xff]  ;;  %v2643_v58 = vld [vmem:[%s2924_s7 + $0xc0] sm:$0xff] }
 0x233   : > { %v3809_v41 = vadd.f32 %v1654_v31, %v1542_v14  ;;  %1721 = vmatmul.f32.gmra.mxu1 %v4244_v11  ;;  %1834 = vmatmul.f32.gmra.mxu2 %v2641_v17  ;;  %v4252_v11 = vld [vmem:[#allocation16_spill] sm:$0xff]  ;;  %v4254_v14 = vld [vmem:[#allocation14_spill] sm:$0xff]  ;;  %v4255_v17 = vld [vmem:[#allocation19_spill] sm:$0xff] }
 0x235   : > { %1947 = vmatmul.f32.gmra.mxu3 %v4249_v34 }
 0x236   : > { %v1431_v35 = vpop.f32.mrf.mxu2  ;;  %v1657_v39 = vpop.f32.mrf.mxu0 }
 0x237   : > { %v1432_v0 = vadd.f32 %v1431_v35, %v1319_v23 }
 0x238   : > { %v1321_v36 = vpop.f32.mrf.mxu1  ;;  %v1544_v42 = vpop.f32.mrf.mxu3 }
 0x239   : > { %v1545_v4 = vadd.f32 %v1544_v42, %v1432_v0  ;;  %2060 = vmatmul.f32.gmra.mxu0 %v4250_v53  ;;  %v1322_v45 = vadd.f32 %v1321_v36, %v4251_v52  ;;  %v4256_v36 = vld [vmem:[#allocation23_spill] sm:$0xff] }
 0x23b   : > { %v3816_v15 = vadd.f32 %v1657_v39, %v1545_v4  ;;  %1724 = vmatmul.f32.gmra.mxu1 %v4247_v1  ;;  %1837 = vmatmul.f32.gmra.mxu2 %v2642_v33  ;;  %v2644_v4 = vld [vmem:[%s2924_s7 + $0xc8] sm:$0xff] }
 0x23d   : > { %1950 = vmatmul.f32.gmra.mxu3 %v4252_v11 }
 0x23e   : > { %v1434_v37 = vpop.f32.mrf.mxu2  ;;  %v1660_v16 = vpop.f32.mrf.mxu0 }
 0x23f   : > { %v1435_v40 = vadd.f32 %v1434_v37, %v1322_v45 }
 0x240   : > { %v1324_v50 = vpop.f32.mrf.mxu1  ;;  %v1547_v27 = vpop.f32.mrf.mxu3 }
 0x241   : > { %v1548_v31 = vadd.f32 %v1547_v27, %v1435_v40  ;;  %2063 = vmatmul.f32.gmra.mxu0 %v4253_v49  ;;  %v1325_v1 = vadd.f32 %v1324_v50, %v4254_v14  ;;  %v2645_v27 = vld [vmem:[%s2924_s7 + $0xd8] sm:$0xff] }
 0x243   : > { %v3823_v19 = vadd.f32 %v1660_v16, %v1548_v31  ;;  %1727 = vmatmul.f32.gmra.mxu1 %v4250_v53  ;;  %1840 = vmatmul.f32.gmra.mxu2 %v2643_v58  ;;  %v4257_v53 = vld [vmem:[#allocation17_spill] sm:$0xff]  ;;  %v4258_v31 = vld [vmem:[#allocation20_spill] sm:$0xff] }
 0x245   : > { %1953 = vmatmul.f32.gmra.mxu3 %v4255_v17 }
 0x246   : > { %v1437_v21 = vpop.f32.mrf.mxu2  ;;  %v1663_v23 = vpop.f32.mrf.mxu0 }
 0x247   : > { %v1438_v34 = vadd.f32 %v1437_v21, %v1325_v1 }
 0x248   : > { %v1327_v35 = vpop.f32.mrf.mxu1  ;;  %v1550_v39 = vpop.f32.mrf.mxu3 }
 0x249   : > { %v1551_v0 = vadd.f32 %v1550_v39, %v1438_v34  ;;  %2066 = vmatmul.f32.gmra.mxu0 %v4256_v36  ;;  %v1328_v33 = vadd.f32 %v1327_v35, %v4257_v53  ;;  %v2646_v34 = vld [vmem:[%s2924_s7 + $0xe0] sm:$0xff] }
 0x24a   : > { %v4259_v35 = vld [vmem:[#allocation22_spill] sm:$0xff] }
 0x24b   : > { %v3830_v42 = vadd.f32 %v1663_v23, %v1551_v0  ;;  %1730 = vmatmul.f32.gmra.mxu1 %v4253_v49  ;;  %1843 = vmatmul.f32.gmra.mxu2 %v2644_v4 }
 0x24d   : > { %1956 = vmatmul.f32.gmra.mxu3 %v3433_v28 }
 0x24e   : > { %v1440_v52 = vpop.f32.mrf.mxu2  ;;  %v1666_v45 = vpop.f32.mrf.mxu0 }
 0x24f   : > { %v1441_v11 = vadd.f32 %v1440_v52, %v1328_v33 }
 0x250   : > { %v1330_v37 = vpop.f32.mrf.mxu1  ;;  %v1553_v16 = vpop.f32.mrf.mxu3 }
 0x251   : > { %v1554_v40 = vadd.f32 %v1553_v16, %v1441_v11  ;;  %2069 = vmatmul.f32.gmra.mxu0 %v3455_v9  ;;  %v1331_v49 = vadd.f32 %v1330_v37, %v4258_v31 }
 0x253   : > { %v3837_v50 = vadd.f32 %v1666_v45, %v1554_v40  ;;  %1733 = vmatmul.f32.gmra.mxu1 %v4256_v36  ;;  %1846 = vmatmul.f32.gmra.mxu2 %v2645_v27  ;;  %v4260_v45 = vld [vmem:[#allocation24_spill] sm:$0xff] }
 0x255   : > { %1959 = vmatmul.f32.gmra.mxu3 %v3450_v2 }
 0x256   : > { %v1443_v28 = vpop.f32.mrf.mxu2  ;;  %v1669_v58 = vpop.f32.mrf.mxu0 }
 0x257   : > { %v1444_v14 = vadd.f32 %v1443_v28, %v1331_v49  ;;  %v934_v49 = vld [vmem:[#allocation2] sm:$0xff] }
 0x258   : > { %v1333_v1 = vpop.f32.mrf.mxu1  ;;  %v1556_v17 = vpop.f32.mrf.mxu3 }
 0x259   : > { %v1557_v21 = vadd.f32 %v1556_v17, %v1444_v14  ;;  %2072 = vmatmul.f32.gmra.mxu0 %v3471_v38  ;;  %v1334_v39 = vadd.f32 %v1333_v1, %v4259_v35 }
 0x25b   : > { %v3844_v23 = vadd.f32 %v1669_v58, %v1557_v21  ;;  %1736 = vmatmul.f32.gmra.mxu1 %v3455_v9  ;;  %1849 = vmatmul.f32.gmra.mxu2 %v2646_v34  ;;  %v2647_v9 = vld [vmem:[%s2924_s7 + $0xf0] sm:$0xff]  ;;  %v2648_v58 = vld [vmem:[%s2924_s7 + $0xf8] sm:$0xff] }
 0x25d   : > { %1962 = vmatmul.f32.gmra.mxu3 %v3468_v8 }
 0x25e   : > { %v1446_v2 = vpop.f32.mrf.mxu2  ;;  %v1672_v0 = vpop.f32.mrf.mxu0 }
 0x25f   : > { %v1447_v36 = vadd.f32 %v1446_v2, %v1334_v39 }
 0x260   : > { %v1559_v4 = vpop.f32.mrf.mxu3  ;;  %v1692_v53 = vpop.f32.mrf.mxu1 }
 0x261   : > { %v1560_v33 = vadd.f32 %v1559_v4, %v1447_v36  ;;  %2075 = vmatmul.f32.gmra.mxu0 %v3490_v13  ;;  %v1693_v11 = vadd.f32 %v1692_v53, %v4260_v45  ;;  %v4262_v36 = vld [vmem:[#allocation26_spill] sm:$0xff]  ;;  %v4263_v53 = vld [vmem:[#allocation28_spill] sm:$0xff] }
 0x263   : > { %v3851_v52 = vadd.f32 %v1672_v0, %v1560_v33  ;;  %1739 = vmatmul.f32.gmra.mxu1 %v3471_v38  ;;  %1852 = vmatmul.f32.gmra.mxu2 %v2647_v9  ;;  %v4261_v38 = vld [vmem:[#allocation25_spill] sm:$0xff] }
 0x264   : > { %v2649_v0 = vld [vmem:[%s2924_s7 + $0x108] sm:$0xff] }
 0x265   : > { %1965 = vmatmul.f32.gmra.mxu3 %v3485_v5 }
 0x266   : > { %v1805_v8 = vpop.f32.mrf.mxu2  ;;  %v2031_v37 = vpop.f32.mrf.mxu0 }
 0x267   : > { %v1806_v16 = vadd.f32 %v1805_v8, %v1693_v11 }
 0x268   : > { %v1695_v40 = vpop.f32.mrf.mxu1  ;;  %v1918_v27 = vpop.f32.mrf.mxu3 }
 0x269   : > { %v1919_v31 = vadd.f32 %v1918_v27, %v1806_v16  ;;  %2078 = vmatmul.f32.gmra.mxu0 %v3506_v6  ;;  %v1696_v14 = vadd.f32 %v1695_v40, %v4261_v38  ;;  %v4264_v16 = vld [vmem:[#allocation30_spill] sm:$0xff] }
 0x26a   : > { %v936_v40 = vld [vmem:[#allocation2 + $0x10] sm:$0xff] }
 0x26b   : > { %v2032_v28 = vadd.f32 %v2031_v37, %v1919_v31  ;;  %1742 = vmatmul.f32.gmra.mxu1 %v3490_v13  ;;  %1855 = vmatmul.f32.gmra.mxu2 %v2648_v58  ;;  %v935_v13 = vld [vmem:[#allocation2 + $0x8] sm:$0xff]  ;;  %v2650_v27 = vld [vmem:[%s2924_s7 + $0x110] sm:$0xff]  ;;  %v4265_v31 = vld [vmem:[#allocation27_spill] sm:$0xff] }
 0x26d   : > { %v2127_v1 = vadd.f32 %v2032_v28, %v934_v49  ;;  %1968 = vmatmul.f32.gmra.mxu3 %v3503_v46 }
 0x26e   : > { %v1808_v5 = vpop.f32.mrf.mxu2  ;;  %v2034_v17 = vpop.f32.mrf.mxu0 }
 0x26f   : > { %2160 = vst.msk [vmem:[#allocation2] sm:$0xff] %vm2159_vm3, %v2127_v1  ;;  %v1809_v21 = vadd.f32 %v1808_v5, %v1696_v14 }
 0x270   : > { %v1698_v34 = vpop.f32.mrf.mxu1  ;;  %v1921_v35 = vpop.f32.mrf.mxu3 }
 0x271   : > { %v1922_v39 = vadd.f32 %v1921_v35, %v1809_v21  ;;  %2081 = vmatmul.f32.gmra.mxu0 %v3525_v51  ;;  %v1699_v4 = vadd.f32 %v1698_v34, %v4262_v36  ;;  %v937_v21 = vld [vmem:[#allocation2 + $0x18] sm:$0xff]  ;;  %v4267_v35 = vld [vmem:[#allocation29_spill] sm:$0xff] }
 0x273   : > { %v2035_v2 = vadd.f32 %v2034_v17, %v1922_v39  ;;  %1745 = vmatmul.f32.gmra.mxu1 %v3506_v6  ;;  %1858 = vmatmul.f32.gmra.mxu2 %v2649_v0 }
 0x275   : > { %v2128_v46 = vadd.f32 %v2035_v2, %v935_v13  ;;  %1971 = vmatmul.f32.gmra.mxu3 %v4263_v53 }
 0x276   : > { %v1811_v33 = vpop.f32.mrf.mxu2  ;;  %v2037_v9 = vpop.f32.mrf.mxu0 }
 0x277   : > { %2161 = vst.msk [vmem:[#allocation2 + $0x8] sm:$0xff] %vm2159_vm3, %v2128_v46  ;;  %v1812_v45 = vadd.f32 %v1811_v33, %v1699_v4  ;;  %v4269_v33 = vld [vmem:[#allocation36_spill] sm:$0xff] }
 0x278   : > { %v1701_v11 = vpop.f32.mrf.mxu1  ;;  %v1924_v8 = vpop.f32.mrf.mxu3 }
 0x279   : > { %v1925_v37 = vadd.f32 %v1924_v8, %v1812_v45  ;;  %2084 = vmatmul.f32.gmra.mxu0 %v4264_v16  ;;  %v1702_v49 = vadd.f32 %v1701_v11, %v4265_v31  ;;  %v4270_v11 = vld [vmem:[#allocation32_spill] sm:$0xff]  ;;  %v4271_v8 = vld [vmem:[#allocation33_spill] sm:$0xff] }
 0x27b   : > { %v2038_v6 = vadd.f32 %v2037_v9, %v1925_v37  ;;  %1748 = vmatmul.f32.gmra.mxu1 %v3525_v51  ;;  %1861 = vmatmul.f32.gmra.mxu2 %v2650_v27  ;;  %v4266_v51 = vld [vmem:[#allocation31_spill] sm:$0xff]  ;;  %v938_v9 = vld [vmem:[#allocation2 + $0x20] sm:$0xff] }
 0x27d   : > { %v2129_v28 = vadd.f32 %v2038_v6, %v936_v40  ;;  %1974 = vmatmul.f32.gmra.mxu3 %v3538_v22  ;;  %v4268_v22 = vld [vmem:[#allocation34_spill] sm:$0xff] }
 0x27e   : > { %v1814_v58 = vpop.f32.mrf.mxu2  ;;  %v2040_v38 = vpop.f32.mrf.mxu0 }
 0x27f   : > { %2162 = vst.msk [vmem:[#allocation2 + $0x10] sm:$0xff] %vm2159_vm3, %v2129_v28  ;;  %v1815_v14 = vadd.f32 %v1814_v58, %v1702_v49  ;;  %v939_v58 = vld [vmem:[#allocation2 + $0x28] sm:$0xff] }
 0x280   : > { %v1704_v1 = vpop.f32.mrf.mxu1  ;;  %v1927_v5 = vpop.f32.mrf.mxu3 }
 0x281   : > { %v1928_v17 = vadd.f32 %v1927_v5, %v1815_v14  ;;  %2087 = vmatmul.f32.gmra.mxu0 %v3566_v29  ;;  %v1705_v39 = vadd.f32 %v1704_v1, %v4267_v35  ;;  %v4273_v14 = vld [vmem:[#allocation35_spill] sm:$0xff] }
 0x283   : > { %v2041_v34 = vadd.f32 %v2040_v38, %v1928_v17  ;;  %1751 = vmatmul.f32.gmra.mxu1 %v4264_v16  ;;  %1864 = vmatmul.f32.gmra.mxu2 %v4266_v51 }
 0x285   : > { %v2130_v13 = vadd.f32 %v2041_v34, %v937_v21  ;;  %1977 = vmatmul.f32.gmra.mxu3 %v4268_v22  ;;  %v940_v22 = vld [vmem:[#allocation2 + $0x30] sm:$0xff] }
 0x286   : > { %v1817_v2 = vpop.f32.mrf.mxu2  ;;  %v2043_v0 = vpop.f32.mrf.mxu0 }
 0x287   : > { %2163 = vst.msk [vmem:[#allocation2 + $0x18] sm:$0xff] %vm2159_vm3, %v2130_v13  ;;  %v1818_v36 = vadd.f32 %v1817_v2, %v1705_v39  ;;  %v4275_v13 = vld [vmem:[#allocation43_spill] sm:$0xff] }
 0x288   : > { %v1707_v4 = vpop.f32.mrf.mxu1  ;;  %v1930_v46 = vpop.f32.mrf.mxu3 }
 0x289   : > { %v1931_v53 = vadd.f32 %v1930_v46, %v1818_v36  ;;  %2090 = vmatmul.f32.gmra.mxu0 %v4269_v33  ;;  %v1708_v37 = vadd.f32 %v1707_v4, %v4271_v8  ;;  %v4277_v36 = vld [vmem:[#allocation39_spill] sm:$0xff] }
 0x28b   : > { %v2044_v45 = vadd.f32 %v2043_v0, %v1931_v53  ;;  %1754 = vmatmul.f32.gmra.mxu1 %v3566_v29  ;;  %1867 = vmatmul.f32.gmra.mxu2 %v4270_v11  ;;  %v4272_v29 = vld [vmem:[#allocation37_spill] sm:$0xff]  ;;  %v4276_v0 = vld [vmem:[#allocation38_spill] sm:$0xff] }
 0x28c   : > { %v4278_v53 = vld [vmem:[#allocation42_spill] sm:$0xff] }
 0x28d   : > { %v2131_v16 = vadd.f32 %v2044_v45, %v938_v9  ;;  %1980 = vmatmul.f32.gmra.mxu3 %v3579_v59  ;;  %v4274_v59 = vld [vmem:[#allocation40_spill] sm:$0xff] }
 0x28e   : > { %v1820_v40 = vpop.f32.mrf.mxu2  ;;  %v2046_v6 = vpop.f32.mrf.mxu0 }
 0x28f   : > { %2164 = vst.msk [vmem:[#allocation2 + $0x20] sm:$0xff] %vm2159_vm3, %v2131_v16  ;;  %v1821_v27 = vadd.f32 %v1820_v40, %v1708_v37  ;;  %v4279_v16 = vld [vmem:[#allocation47_spill] sm:$0xff] }
 0x290   : > { %v1710_v31 = vpop.f32.mrf.mxu1  ;;  %v1933_v49 = vpop.f32.mrf.mxu3  ;;  %v941_v40 = vld [vmem:[#allocation2 + $0x38] sm:$0xff] }
 0x291   : > { %v1934_v28 = vadd.f32 %v1933_v49, %v1821_v27  ;;  %2093 = vmatmul.f32.gmra.mxu0 %v3607_v60  ;;  %v1711_v1 = vadd.f32 %v1710_v31, %v4273_v14  ;;  %v4281_v27 = vld [vmem:[#allocation41_spill] sm:$0xff] }
 0x293   : > { %v2047_v38 = vadd.f32 %v2046_v6, %v1934_v28  ;;  %1757 = vmatmul.f32.gmra.mxu1 %v4269_v33  ;;  %1870 = vmatmul.f32.gmra.mxu2 %v4272_v29 }
 0x295   : > { %v2132_v5 = vadd.f32 %v2047_v38, %v939_v58  ;;  %1983 = vmatmul.f32.gmra.mxu3 %v4274_v59 }
 0x296   : > { %v1823_v17 = vpop.f32.mrf.mxu2  ;;  %v2049_v21 = vpop.f32.mrf.mxu0 }
 0x297   : > { %2165 = vst.msk [vmem:[#allocation2 + $0x28] sm:$0xff] %vm2159_vm3, %v2132_v5  ;;  %v1824_v34 = vadd.f32 %v1823_v17, %v1711_v1  ;;  %v942_v5 = vld [vmem:[#allocation2 + $0x40] sm:$0xff]  ;;  %v4282_v17 = vld [vmem:[#allocation45_spill] sm:$0xff] }
 0x298   : > { %v1713_v51 = vpop.f32.mrf.mxu1  ;;  %v1936_v35 = vpop.f32.mrf.mxu3 }
 0x299   : > { %v1937_v39 = vadd.f32 %v1936_v35, %v1824_v34  ;;  %2096 = vmatmul.f32.gmra.mxu0 %v4275_v13  ;;  %v1714_v4 = vadd.f32 %v1713_v51, %v4277_v36  ;;  %v943_v36 = vld [vmem:[#allocation2 + $0x48] sm:$0xff] }
 0x29b   : > { %v2050_v2 = vadd.f32 %v2049_v21, %v1937_v39  ;;  %1760 = vmatmul.f32.gmra.mxu1 %v3607_v60  ;;  %1873 = vmatmul.f32.gmra.mxu2 %v4276_v0  ;;  %v4280_v60 = vld [vmem:[#allocation44_spill] sm:$0xff]  ;;  %v4283_v21 = vld [vmem:[#allocation46_spill] sm:$0xff] }
 0x29c   : > { %v4284_v0 = vld [vmem:[#allocation52_spill] sm:$0xff] }
 0x29d   : > { %v2133_v46 = vadd.f32 %v2050_v2, %v940_v22  ;;  %1986 = vmatmul.f32.gmra.mxu3 %v4278_v53  ;;  %v4286_v53 = vld [vmem:[#allocation48_spill] sm:$0xff] }
 0x29e   : > { %v1826_v33 = vpop.f32.mrf.mxu2  ;;  %v2052_v9 = vpop.f32.mrf.mxu0 }
 0x29f   : > { %2166 = vst.msk [vmem:[#allocation2 + $0x30] sm:$0xff] %vm2159_vm3, %v2133_v46  ;;  %v1827_v45 = vadd.f32 %v1826_v33, %v1714_v4  ;;  %v4285_v46 = vld [vmem:[#allocation49_spill] sm:$0xff] }
 0x2a0   : > { %v1716_v11 = vpop.f32.mrf.mxu1  ;;  %v1939_v8 = vpop.f32.mrf.mxu3 }
 0x2a1   : > { %v1940_v37 = vadd.f32 %v1939_v8, %v1827_v45  ;;  %2099 = vmatmul.f32.gmra.mxu0 %v4279_v16  ;;  %v1717_v31 = vadd.f32 %v1716_v11, %v4281_v27 }
 0x2a3   : > { %v2053_v6 = vadd.f32 %v2052_v9, %v1940_v37  ;;  %1763 = vmatmul.f32.gmra.mxu1 %v4275_v13  ;;  %1876 = vmatmul.f32.gmra.mxu2 %v4280_v60  ;;  %v4288_v60 = vld [vmem:[#allocation51_spill] sm:$0xff] }
 0x2a5   : > { %v2134_v49 = vadd.f32 %v2053_v6, %v941_v40  ;;  %1989 = vmatmul.f32.gmra.mxu3 %v3643_v26  ;;  %v944_v40 = vld [vmem:[#allocation2 + $0x50] sm:$0xff] }
 0x2a6   : > { %v1829_v28 = vpop.f32.mrf.mxu2  ;;  %v2055_v58 = vpop.f32.mrf.mxu0 }
 0x2a7   : > { %2167 = vst.msk [vmem:[#allocation2 + $0x38] sm:$0xff] %vm2159_vm3, %v2134_v49  ;;  %v1830_v38 = vadd.f32 %v1829_v28, %v1717_v31 }
 0x2a8   : > { %v1719_v29 = vpop.f32.mrf.mxu1  ;;  %v1942_v14 = vpop.f32.mrf.mxu3 }
 0x2a9   : > { %v1943_v1 = vadd.f32 %v1942_v14, %v1830_v38  ;;  %2102 = vmatmul.f32.gmra.mxu0 %v3664_v57  ;;  %v1720_v34 = vadd.f32 %v1719_v29, %v4283_v21  ;;  %v945_v14 = vld [vmem:[#allocation2 + $0x58] sm:$0xff] }
 0x2ab   : > { %v2056_v59 = vadd.f32 %v2055_v58, %v1943_v1  ;;  %1766 = vmatmul.f32.gmra.mxu1 %v4279_v16  ;;  %1879 = vmatmul.f32.gmra.mxu2 %v4282_v17  ;;  %v910_v1 = vrot.slane %v3707_v10, 2 }
 0x2ad   : > { %v2135_v51 = vadd.f32 %v2056_v59, %v942_v5  ;;  %1992 = vmatmul.f32.gmra.mxu3 %v3661_v63  ;;  %v911_v5 = vrot.slane %v3701_v61, 2 }
 0x2ae   : > { %v1832_v26 = vpop.f32.mrf.mxu2  ;;  %v2058_v35 = vpop.f32.mrf.mxu0 }
 0x2af   : > { %2168 = vst.msk [vmem:[#allocation2 + $0x40] sm:$0xff] %vm2159_vm3, %v2135_v51  ;;  %v1833_v39 = vadd.f32 %v1832_v26, %v1720_v34  ;;  %v912_v26 = vsel %vm787_vm2, %v910_v1, %v911_v5  ;;  %v948_v1 = vld [vmem:[#allocation2 + $0x70] sm:$0xff] }
 0x2b0   : > { %v1722_v13 = vpop.f32.mrf.mxu1  ;;  %v1945_v22 = vpop.f32.mrf.mxu3 }
 0x2b1   : > { %v1946_v2 = vadd.f32 %v1945_v22, %v1833_v39  ;;  %2105 = vmatmul.f32.gmra.mxu0 %v4284_v0  ;;  %v1723_v33 = vadd.f32 %v1722_v13, %v4286_v53 }
 0x2b3   : > { %v2059_v4 = vadd.f32 %v2058_v35, %v1946_v2  ;;  %1769 = vmatmul.f32.gmra.mxu1 %v3664_v57  ;;  %1882 = vmatmul.f32.gmra.mxu2 %v4285_v46  ;;  %v4287_v57 = vld [vmem:[#allocation50_spill] sm:$0xff] }
 0x2b5   : > { %v2136_v9 = vadd.f32 %v2059_v4, %v943_v36  ;;  %1995 = vmatmul.f32.gmra.mxu3 %v3682_v32  ;;  %v4290_v36 = vld [vmem:[#allocation54_spill] sm:$0xff] }
 0x2b6   : > { %v1835_v63 = vpop.f32.mrf.mxu2  ;;  %v2061_v45 = vpop.f32.mrf.mxu0 }
 0x2b7   : > { %2169 = vst.msk [vmem:[#allocation2 + $0x48] sm:$0xff] %vm2159_vm3, %v2136_v9  ;;  %v1836_v11 = vadd.f32 %v1835_v63, %v1723_v33 }
 0x2b8   : > { %v1725_v8 = vpop.f32.mrf.mxu1  ;;  %v1948_v37 = vpop.f32.mrf.mxu3 }
 0x2b9   : > { %v1949_v16 = vadd.f32 %v1948_v37, %v1836_v11  ;;  %2108 = vmatmul.f32.gmra.mxu0 %v3704_v30  ;;  %v1726_v27 = vadd.f32 %v1725_v8, %v4288_v60  ;;  %v947_v8 = vld [vmem:[#allocation2 + $0x68] sm:$0xff] }
 0x2bb   : > { %v2062_v6 = vadd.f32 %v2061_v45, %v1949_v16  ;;  %1772 = vmatmul.f32.gmra.mxu1 %v4284_v0  ;;  %1885 = vmatmul.f32.gmra.mxu2 %v4287_v57  ;;  %v624_v0 = vld [vmem:[%s2924_s7 + $0x1a0] sm:$0xff]  ;;  %v4291_v57 = vld [vmem:[#allocation55_spill] sm:$0xff] }
 0x2bc   : > { %v921_v63 = vrot.slane %v624_v0, 1 }
 0x2bd   : > { %v2137_v31 = vadd.f32 %v2062_v6, %v944_v40  ;;  %1998 = vmatmul.f32.gmra.mxu3 %v3698_v48  ;;  %v4289_v48 = vld [vmem:[#allocation53_spill] sm:$0xff]  ;;  %v928_v40 = vrot.slane %v624_v0, 2 }
 0x2be   : > { %v1838_v32 = vpop.f32.mrf.mxu2  ;;  %v2064_v49 = vpop.f32.mrf.mxu0  ;;  %v625_v6 = vld [vmem:[%s2924_s7 + $0x1a8] sm:$0x3] }
 0x2bf   : > { %2170 = vst.msk [vmem:[#allocation2 + $0x50] sm:$0xff] %vm2159_vm3, %v2137_v31  ;;  %v1839_v28 = vadd.f32 %v1838_v32, %v1726_v27 }
 0x2c0   : > { %v1728_v58 = vpop.f32.mrf.mxu1  ;;  %v1951_v38 = vpop.f32.mrf.mxu3 }
 0x2c1   : > { %v1952_v29 = vadd.f32 %v1951_v38, %v1839_v28  ;;  %2111 = vmatmul.f32.gmra.mxu0 %v3725_v12  ;;  %v1729_v17 = vadd.f32 %v1728_v58, %v4289_v48 }
 0x2c3   : > { %v2065_v59 = vadd.f32 %v2064_v49, %v1952_v29  ;;  %1775 = vmatmul.f32.gmra.mxu1 %v3704_v30  ;;  %1888 = vmatmul.f32.gmra.mxu2 %v3707_v10  ;;  %v946_v30 = vld [vmem:[#allocation2 + $0x60] sm:$0xff]  ;;  %v913_v10 = vrot.slane %v3722_v56, 2  ;;  %v923_v49 = vrot.slane %v625_v6, 1 }
 0x2c5   : > { %v2138_v21 = vadd.f32 %v2065_v59, %v945_v14  ;;  %2001 = vmatmul.f32.gmra.mxu3 %v3719_v18  ;;  %v623_v18 = vld [vmem:[%s2924_s7 + $0x198] sm:$0xff]  ;;  %v914_v45 = vsel %vm787_vm2, %v911_v5, %v913_v10  ;;  %v924_v5 = vsel %vm674_vm1, %v921_v63, %v923_v49  ;;  %v930_v59 = vrot.slane %v625_v6, 2 }
 0x2c6   : > { %v1841_v34 = vpop.f32.mrf.mxu2  ;;  %v2067_v51 = vpop.f32.mrf.mxu0  ;;  %v920_v9 = vrot.slane %v623_v18, 1  ;;  %v927_v37 = vrot.slane %v623_v18, 2 }
 0x2c7   : > { %2171 = vst.msk [vmem:[#allocation2 + $0x58] sm:$0xff] %vm2159_vm3, %v2138_v21  ;;  %v1842_v35 = vadd.f32 %v1841_v34, %v1729_v17 }
 0x2c8   : > { %v1731_v39 = vpop.f32.mrf.mxu1  ;;  %v1954_v13 = vpop.f32.mrf.mxu3  ;;  %v922_v16 = vsel %vm674_vm1, %v920_v9, %v921_v63  ;;  %v929_v28 = vsel %vm787_vm2, %v927_v37, %v928_v40  ;;  %v951_v37 = vld [vmem:[#allocation2 + $0x88] sm:$0xff] }
 0x2c9   : > { %v1955_v22 = vadd.f32 %v1954_v13, %v1842_v35  ;;  %2114 = vmatmul.f32.gmra.mxu0 %v912_v26  ;;  %v1732_v4 = vadd.f32 %v1731_v39, %v4290_v36 }
 0x2cb   : > { %v2068_v2 = vadd.f32 %v2067_v51, %v1955_v22  ;;  %1778 = vmatmul.f32.gmra.mxu1 %v3725_v12  ;;  %1891 = vmatmul.f32.gmra.mxu2 %v3701_v61 }
 0x2cd   : > { %v2139_v46 = vadd.f32 %v2068_v2, %v946_v30  ;;  %2004 = vmatmul.f32.gmra.mxu3 %v3736_v7  ;;  %v949_v30 = vld [vmem:[#allocation2 + $0x78] sm:$0xff] }
 0x2ce   : > { %v1844_v53 = vpop.f32.mrf.mxu2  ;;  %v2070_v33 = vpop.f32.mrf.mxu0 }
 0x2cf   : > { %2172 = vst.msk [vmem:[#allocation2 + $0x60] sm:$0xff] %vm2159_vm3, %v2139_v46  ;;  %v1845_v56 = vadd.f32 %v1844_v53, %v1732_v4 }
 0x2d0   : > { %v1734_v12 = vpop.f32.mrf.mxu1  ;;  %v1957_v11 = vpop.f32.mrf.mxu3 }
 0x2d1   : > { %v1958_v61 = vadd.f32 %v1957_v11, %v1845_v56  ;;  %2117 = vmatmul.f32.gmra.mxu0 %v914_v45  ;;  %v1735_v60 = vadd.f32 %v1734_v12, %v4291_v57 }
 0x2d3   : > { %v2071_v7 = vadd.f32 %v2070_v33, %v1958_v61  ;;  %1781 = vmatmul.f32.gmra.mxu1 %v912_v26  ;;  %1894 = vmatmul.f32.gmra.mxu2 %v623_v18  ;;  %v931_v26 = vsel %vm787_vm2, %v928_v40, %v930_v59  ;;  %v950_v33 = vld [vmem:[#allocation2 + $0x80] sm:$0xff]  ;;  %v953_v59 = vld [vmem:[#allocation2 + $0x98] sm:$0xff] }
 0x2d5   : > { %v2140_v27 = vadd.f32 %v2071_v7, %v947_v8  ;;  %2007 = vmatmul.f32.gmra.mxu3 %v922_v16 }
 0x2d6   : > { %v1847_v31 = vpop.f32.mrf.mxu2  ;;  %v2073_v32 = vpop.f32.mrf.mxu0 }
 0x2d7   : > { %2173 = vst.msk [vmem:[#allocation2 + $0x68] sm:$0xff] %vm2159_vm3, %v2140_v27  ;;  %v1848_v58 = vadd.f32 %v1847_v31, %v1735_v60 }
 0x2d8   : > { %v1737_v38 = vpop.f32.mrf.mxu1  ;;  %v1960_v29 = vpop.f32.mrf.mxu3 }
 0x2d9   : > { %v1961_v14 = vadd.f32 %v1960_v29, %v1848_v58  ;;  %2120 = vmatmul.f32.gmra.mxu0 %v929_v28  ;;  %v1738_v17 = vadd.f32 %v1737_v38, %v3739_v25 }
 0x2db   : > { %v2074_v48 = vadd.f32 %v2073_v32, %v1961_v14  ;;  %1784 = vmatmul.f32.gmra.mxu1 %v914_v45  ;;  %1897 = vmatmul.f32.gmra.mxu2 %v624_v0  ;;  %v952_v32 = vld [vmem:[#allocation2 + $0x90] sm:$0xff] }
 0x2dd   : > { %v2141_v21 = vadd.f32 %v2074_v48, %v948_v1  ;;  %2010 = vmatmul.f32.gmra.mxu3 %v924_v5 }
 0x2de   : > { %v1850_v34 = vpop.f32.mrf.mxu2  ;;  %v2076_v51 = vpop.f32.mrf.mxu0 }
 0x2df   : > { %2174 = vst.msk [vmem:[#allocation2 + $0x70] sm:$0xff] %vm2159_vm3, %v2141_v21  ;;  %v1851_v35 = vadd.f32 %v1850_v34, %v1738_v17 }
 0x2e0   : > { %v1740_v39 = vpop.f32.mrf.mxu1  ;;  %v1963_v13 = vpop.f32.mrf.mxu3 }
 0x2e1   : > { %v1964_v22 = vadd.f32 %v1963_v13, %v1851_v35  ;;  %2123 = vmatmul.f32.gmra.mxu0 %v931_v26  ;;  %v1741_v2 = vadd.f32 %v1740_v39, %v3746_v54  ;;  %v954_v13 = vld [vmem:[#allocation2 + $0xa0] sm:$0xff] }
 0x2e3   : > { %v2077_v10 = vadd.f32 %v2076_v51, %v1964_v22 }
 0x2e5   : > { %v2142_v18 = vadd.f32 %v2077_v10, %v949_v30 }
 0x2e6   : > { %v1853_v0 = vpop.f32.mrf.mxu2  ;;  %v2079_v25 = vpop.f32.mrf.mxu0 }
 0x2e7   : > { %2175 = vst.msk [vmem:[#allocation2 + $0x78] sm:$0xff] %vm2159_vm3, %v2142_v18  ;;  %v1854_v36 = vadd.f32 %v1853_v0, %v1741_v2 }
 0x2e8   : > { %v1743_v4 = vpop.f32.mrf.mxu1  ;;  %v1966_v46 = vpop.f32.mrf.mxu3 }
 0x2e9   : > { %v1967_v53 = vadd.f32 %v1966_v46, %v1854_v36  ;;  %v1744_v63 = vadd.f32 %v1743_v4, %v3753_v62  ;;  %v955_v4 = vld [vmem:[#allocation2 + $0xa8] sm:$0xff] }
 0x2eb   : > { %v2080_v9 = vadd.f32 %v2079_v25, %v1967_v53 }
 0x2ed   : > { %v2143_v45 = vadd.f32 %v2080_v9, %v950_v33 }
 0x2ee   : > { %v1856_v56 = vpop.f32.mrf.mxu2  ;;  %v2082_v12 = vpop.f32.mrf.mxu0 }
 0x2ef   : > { %2176 = vst.msk [vmem:[#allocation2 + $0x80] sm:$0xff] %vm2159_vm3, %v2143_v45  ;;  %v1857_v11 = vadd.f32 %v1856_v56, %v1744_v63 }
 0x2f0   : > { %v1746_v54 = vpop.f32.mrf.mxu1  ;;  %v1969_v61 = vpop.f32.mrf.mxu3 }
 0x2f1   : > { %v1970_v8 = vadd.f32 %v1969_v61, %v1857_v11  ;;  %v1747_v40 = vadd.f32 %v1746_v54, %v3760_v3  ;;  %v956_v11 = vld [vmem:[#allocation2 + $0xb0] sm:$0xff] }
 0x2f3   : > { %v2083_v16 = vadd.f32 %v2082_v12, %v1970_v8 }
 0x2f5   : > { %v2144_v7 = vadd.f32 %v2083_v16, %v951_v37 }
 0x2f6   : > { %v1859_v6 = vpop.f32.mrf.mxu2  ;;  %v2085_v57 = vpop.f32.mrf.mxu0 }
 0x2f7   : > { %2177 = vst.msk [vmem:[#allocation2 + $0x88] sm:$0xff] %vm2159_vm3, %v2144_v7  ;;  %v1860_v60 = vadd.f32 %v1859_v6, %v1747_v40 }
 0x2f8   : > { %v1749_v62 = vpop.f32.mrf.mxu1  ;;  %v1972_v27 = vpop.f32.mrf.mxu3 }
 0x2f9   : > { %v1973_v31 = vadd.f32 %v1972_v27, %v1860_v60  ;;  %v1750_v28 = vadd.f32 %v1749_v62, %v3767_v20 }
 0x2fb   : > { %v2086_v49 = vadd.f32 %v2085_v57, %v1973_v31  ;;  %v957_v57 = vld [vmem:[#allocation2 + $0xb8] sm:$0xff] }
 0x2fd   : > { %v2145_v58 = vadd.f32 %v2086_v49, %v952_v32 }
 0x2fe   : > { %v1862_v38 = vpop.f32.mrf.mxu2  ;;  %v2088_v29 = vpop.f32.mrf.mxu0 }
 0x2ff   : > { %2178 = vst.msk [vmem:[#allocation2 + $0x90] sm:$0xff] %vm2159_vm3, %v2145_v58  ;;  %v1863_v14 = vadd.f32 %v1862_v38, %v1750_v28  ;;  %v958_v38 = vld [vmem:[#allocation2 + $0xc0] sm:$0xff] }
 0x300   : > { %v1752_v3 = vpop.f32.mrf.mxu1  ;;  %v1975_v1 = vpop.f32.mrf.mxu3 }
 0x301   : > { %v1976_v5 = vadd.f32 %v1975_v1, %v1863_v14  ;;  %v1753_v17 = vadd.f32 %v1752_v3, %v3774_v47 }
 0x303   : > { %v2089_v48 = vadd.f32 %v2088_v29, %v1976_v5 }
 0x305   : > { %v2146_v21 = vadd.f32 %v2089_v48, %v953_v59 }
 0x306   : > { %v1865_v34 = vpop.f32.mrf.mxu2  ;;  %v2091_v51 = vpop.f32.mrf.mxu0 }
 0x307   : > { %2179 = vst.msk [vmem:[#allocation2 + $0x98] sm:$0xff] %vm2159_vm3, %v2146_v21  ;;  %v1866_v26 = vadd.f32 %v1865_v34, %v1753_v17  ;;  %v959_v21 = vld [vmem:[#allocation2 + $0xc8] sm:$0xff] }
 0x308   : > { %v1755_v20 = vpop.f32.mrf.mxu1  ;;  %v1978_v35 = vpop.f32.mrf.mxu3 }
 0x309   : > { %v1979_v39 = vadd.f32 %v1978_v35, %v1866_v26  ;;  %v1756_v30 = vadd.f32 %v1755_v20, %v3781_v24 }
 0x30b   : > { %v2092_v22 = vadd.f32 %v2091_v51, %v1979_v39 }
 0x30d   : > { %v2147_v10 = vadd.f32 %v2092_v22, %v954_v13 }
 0x30e   : > { %v1868_v2 = vpop.f32.mrf.mxu2  ;;  %v2094_v18 = vpop.f32.mrf.mxu0 }
 0x30f   : > { %2180 = vst.msk [vmem:[#allocation2 + $0xa0] sm:$0xff] %vm2159_vm3, %v2147_v10  ;;  %v1869_v0 = vadd.f32 %v1868_v2, %v1756_v30  ;;  %v960_v30 = vld [vmem:[#allocation2 + $0xd0] sm:$0xff] }
 0x310   : > { %v1758_v47 = vpop.f32.mrf.mxu1  ;;  %v1981_v25 = vpop.f32.mrf.mxu3 }
 0x311   : > { %v1982_v36 = vadd.f32 %v1981_v25, %v1869_v0  ;;  %v1759_v53 = vadd.f32 %v1758_v47, %v3788_v43 }
 0x313   : > { %v2095_v46 = vadd.f32 %v2094_v18, %v1982_v36 }
 0x315   : > { %v2148_v33 = vadd.f32 %v2095_v46, %v955_v4  ;;  %v961_v46 = vld [vmem:[#allocation2 + $0xd8] sm:$0xff] }
 0x316   : > { %v1871_v9 = vpop.f32.mrf.mxu2  ;;  %v2097_v63 = vpop.f32.mrf.mxu0 }
 0x317   : > { %2181 = vst.msk [vmem:[#allocation2 + $0xa8] sm:$0xff] %vm2159_vm3, %v2148_v33  ;;  %v1872_v45 = vadd.f32 %v1871_v9, %v1759_v53 }
 0x318   : > { %v1761_v24 = vpop.f32.mrf.mxu1  ;;  %v1984_v56 = vpop.f32.mrf.mxu3 }
 0x319   : > { %v1985_v12 = vadd.f32 %v1984_v56, %v1872_v45  ;;  %v1762_v61 = vadd.f32 %v1761_v24, %v3795_v44 }
 0x31b   : > { %v2098_v54 = vadd.f32 %v2097_v63, %v1985_v12 }
 0x31d   : > { %v2149_v8 = vadd.f32 %v2098_v54, %v956_v11  ;;  %v962_v11 = vld [vmem:[#allocation2 + $0xe0] sm:$0xff] }
 0x31e   : > { %v1874_v37 = vpop.f32.mrf.mxu2  ;;  %v2100_v16 = vpop.f32.mrf.mxu0 }
 0x31f   : > { %2182 = vst.msk [vmem:[#allocation2 + $0xb0] sm:$0xff] %vm2159_vm3, %v2149_v8  ;;  %v1875_v40 = vadd.f32 %v1874_v37, %v1762_v61 }
 0x320   : > { %v1764_v43 = vpop.f32.mrf.mxu1  ;;  %v1987_v7 = vpop.f32.mrf.mxu3 }
 0x321   : > { %v1988_v6 = vadd.f32 %v1987_v7, %v1875_v40  ;;  %v1765_v62 = vadd.f32 %v1764_v43, %v3802_v55 }
 0x323   : > { %v2101_v60 = vadd.f32 %v2100_v16, %v1988_v6  ;;  %v963_v6 = vld [vmem:[#allocation2 + $0xe8] sm:$0xff] }
 0x325   : > { %v2150_v27 = vadd.f32 %v2101_v60, %v957_v57 }
 0x326   : > { %v1877_v31 = vpop.f32.mrf.mxu2  ;;  %v2103_v32 = vpop.f32.mrf.mxu0 }
 0x327   : > { %2183 = vst.msk [vmem:[#allocation2 + $0xb8] sm:$0xff] %vm2159_vm3, %v2150_v27  ;;  %v1878_v49 = vadd.f32 %v1877_v31, %v1765_v62 }
 0x328   : > { %v1767_v44 = vpop.f32.mrf.mxu1  ;;  %v1990_v28 = vpop.f32.mrf.mxu3 }
 0x329   : > { %v1991_v58 = vadd.f32 %v1990_v28, %v1878_v49  ;;  %v1768_v14 = vadd.f32 %v1767_v44, %v3809_v41  ;;  %v964_v28 = vld [vmem:[#allocation2 + $0xf0] sm:$0xff] }
 0x32b   : > { %v2104_v29 = vadd.f32 %v2103_v32, %v1991_v58 }
 0x32d   : > { %v2151_v3 = vadd.f32 %v2104_v29, %v958_v38 }
 0x32e   : > { %v1880_v1 = vpop.f32.mrf.mxu2  ;;  %v2106_v5 = vpop.f32.mrf.mxu0 }
 0x32f   : > { %2184 = vst.msk [vmem:[#allocation2 + $0xc0] sm:$0xff] %vm2159_vm3, %v2151_v3  ;;  %v1881_v59 = vadd.f32 %v1880_v1, %v1768_v14 }
 0x330   : > { %v1770_v55 = vpop.f32.mrf.mxu1  ;;  %v1993_v48 = vpop.f32.mrf.mxu3 }
 0x331   : > { %v1994_v17 = vadd.f32 %v1993_v48, %v1881_v59  ;;  %v1771_v51 = vadd.f32 %v1770_v55, %v3816_v15  ;;  %v965_v59 = vld [vmem:[#allocation2 + $0xf8] sm:$0xff] }
 0x333   : > { %v2107_v34 = vadd.f32 %v2106_v5, %v1994_v17 }
 0x335   : > { %v2152_v26 = vadd.f32 %v2107_v34, %v959_v21 }
 0x336   : > { %v1883_v20 = vpop.f32.mrf.mxu2  ;;  %v2109_v35 = vpop.f32.mrf.mxu0 }
 0x337   : > { %2185 = vst.msk [vmem:[#allocation2 + $0xc8] sm:$0xff] %vm2159_vm3, %v2152_v26  ;;  %v1884_v39 = vadd.f32 %v1883_v20, %v1771_v51 }
 0x338   : > { %v1773_v41 = vpop.f32.mrf.mxu1  ;;  %v1996_v13 = vpop.f32.mrf.mxu3 }
 0x339   : > { %v1997_v22 = vadd.f32 %v1996_v13, %v1884_v39  ;;  %v1774_v2 = vadd.f32 %v1773_v41, %v3823_v19 }
 0x33b   : > { %v2110_v10 = vadd.f32 %v2109_v35, %v1997_v22 }
 0x33d   : > { %v2153_v18 = vadd.f32 %v2110_v10, %v960_v30 }
 0x33e   : > { %v1886_v0 = vpop.f32.mrf.mxu2  ;;  %v2112_v47 = vpop.f32.mrf.mxu0 }
 0x33f   : > { %2186 = vst.msk [vmem:[#allocation2 + $0xd0] sm:$0xff] %vm2159_vm3, %v2153_v18  ;;  %v1887_v25 = vadd.f32 %v1886_v0, %v1774_v2 }
 0x340   : > { %v1776_v15 = vpop.f32.mrf.mxu1  ;;  %v1999_v36 = vpop.f32.mrf.mxu3 }
 0x341   : > { %v2000_v4 = vadd.f32 %v1999_v36, %v1887_v25  ;;  %v1777_v33 = vadd.f32 %v1776_v15, %v3830_v42 }
 0x343   : > { %v2113_v53 = vadd.f32 %v2112_v47, %v2000_v4 }
 0x345   : > { %v2154_v9 = vadd.f32 %v2113_v53, %v961_v46 }
 0x346   : > { %v1889_v63 = vpop.f32.mrf.mxu2  ;;  %v2115_v45 = vpop.f32.mrf.mxu0 }
 0x347   : > { %2187 = vst.msk [vmem:[#allocation2 + $0xd8] sm:$0xff] %vm2159_vm3, %v2154_v9  ;;  %v1890_v24 = vadd.f32 %v1889_v63, %v1777_v33 }
 0x348   : > { %v1779_v19 = vpop.f32.mrf.mxu1  ;;  %v2002_v56 = vpop.f32.mrf.mxu3 }
 0x349   : > { %v2003_v12 = vadd.f32 %v2002_v56, %v1890_v24  ;;  %v1780_v61 = vadd.f32 %v1779_v19, %v3837_v50 }
 0x34b   : > { %v2116_v54 = vadd.f32 %v2115_v45, %v2003_v12 }
 0x34d   : > { %v2155_v8 = vadd.f32 %v2116_v54, %v962_v11 }
 0x34e   : > { %v1892_v37 = vpop.f32.mrf.mxu2  ;;  %v2118_v16 = vpop.f32.mrf.mxu0 }
 0x34f   : > { %2188 = vst.msk [vmem:[#allocation2 + $0xe0] sm:$0xff] %vm2159_vm3, %v2155_v8  ;;  %v1893_v40 = vadd.f32 %v1892_v37, %v1780_v61 }
 0x350   : > { %v1782_v42 = vpop.f32.mrf.mxu1  ;;  %v2005_v43 = vpop.f32.mrf.mxu3 }
 0x351   : > { %v2006_v7 = vadd.f32 %v2005_v43, %v1893_v40  ;;  %v1783_v60 = vadd.f32 %v1782_v42, %v3844_v23 }
 0x353   : > { %v2119_v57 = vadd.f32 %v2118_v16, %v2006_v7 }
 0x355   : > { %v2156_v62 = vadd.f32 %v2119_v57, %v963_v6 }
 0x356   : > { %v1895_v27 = vpop.f32.mrf.mxu2  ;;  %v2121_v31 = vpop.f32.mrf.mxu0 }
 0x357   : > { %2189 = vst.msk [vmem:[#allocation2 + $0xe8] sm:$0xff] %vm2159_vm3, %v2156_v62  ;;  %v1896_v32 = vadd.f32 %v1895_v27, %v1783_v60 }
 0x358   : > { %v2008_v50 = vpop.f32.mrf.mxu3  ;;  %v1785_v44 = vpop.f32.mrf.mxu1 }
 0x359   : > { %v2009_v49 = vadd.f32 %v2008_v50, %v1896_v32  ;;  %v1786_v38 = vadd.f32 %v1785_v44, %v3851_v52 }
 0x35b   : > { %v2122_v58 = vadd.f32 %v2121_v31, %v2009_v49 }
 0x35d   : > { %v2157_v29 = vadd.f32 %v2122_v58, %v964_v28 }
 0x35e   : > { %v1898_v14 = vpop.f32.mrf.mxu2  ;;  %v2124_v23 = vpop.f32.mrf.mxu0 }
 0x35f   : > { %2190 = vst.msk [vmem:[#allocation2 + $0xf0] sm:$0xff] %vm2159_vm3, %v2157_v29  ;;  %v1899_v3 = vadd.f32 %v1898_v14, %v1786_v38 }
 0x360   : > { %v2011_v1 = vpop.f32.mrf.mxu3 }
 0x361   : > { %v2012_v5 = vadd.f32 %v2011_v1, %v1899_v3 }
 0x363   : > { %v2125_v55 = vadd.f32 %v2124_v23, %v2012_v5  ;;  %2195 = sbr.rel (%p2510_p13) target bundleno = 912 (0x390), region = 82 }
 0x365   : > { %v2158_v48 = vadd.f32 %v2125_v55, %v965_v59 }
 0x367   : > { %2191 = vst.msk [vmem:[#allocation2 + $0xf8] sm:$0xff] %vm2159_vm3, %v2158_v48 }
 0x368   : > { %v2196_v17 = vld [vmem:[#allocation2] sm:$0xff]  ;;  %v2197_v34 = vld [vmem:[#allocation2 + $0x8] sm:$0xff]  ;;  %v2198_v20 = vld [vmem:[#allocation2 + $0x10] sm:$0xff] }
 0x369   : > { %v3987_v52 = vld [vmem:[%s4145_s2] ss:$0 sm:$0xff]  ;;  %v2199_v35 = vld [vmem:[#allocation2 + $0x18] sm:$0xff]  ;;  %v2201_v30 = vld [vmem:[#allocation2 + $0x28] sm:$0xff] }
 0x36a   : > { %v3992_v21 = vld [vmem:[%s4146_s3] ss:$0 sm:$0xff]  ;;  %v2232_v51 = vmul.f32 %v3987_v52, %v2196_v17  ;;  %v2233_v26 = vmul.f32 %v3987_v52, %v2197_v34  ;;  %v2234_v41 = vmul.f32 %v3987_v52, %v2198_v20  ;;  %v2235_v13 = vmul.f32 %v3987_v52, %v2199_v35  ;;  %v2202_v10 = vld [vmem:[#allocation2 + $0x30] sm:$0xff]  ;;  %v2203_v2 = vld [vmem:[#allocation2 + $0x38] sm:$0xff] }
 0x36b   : > { %v2200_v39 = vld [vmem:[#allocation2 + $0x20] sm:$0xff]  ;;  %v2237_v47 = vmul.f32 %v3987_v52, %v2201_v30  ;;  %v2238_v25 = vmul.f32 %v3987_v52, %v2202_v10  ;;  %v2239_v46 = vmul.f32 %v3987_v52, %v2203_v2  ;;  %v2205_v33 = vld [vmem:[#allocation2 + $0x48] sm:$0xff]  ;;  %v2206_v19 = vld [vmem:[#allocation2 + $0x50] sm:$0xff] }
 0x36c   : > { %v2236_v22 = vmul.f32 %v3987_v52, %v2200_v39  ;;  %v2268_v18 = vadd.f32 %v3992_v21, %v2232_v51  ;;  %v2269_v0 = vadd.f32 %v3992_v21, %v2233_v26  ;;  %v2270_v15 = vadd.f32 %v3992_v21, %v2234_v41  ;;  %v2204_v53 = vld [vmem:[#allocation2 + $0x40] sm:$0xff]  ;;  %v2207_v56 = vld [vmem:[#allocation2 + $0x58] sm:$0xff]  ;;  %v2209_v8 = vld [vmem:[#allocation2 + $0x68] sm:$0xff] }
 0x36d   : > { %v2271_v36 = vadd.f32 %v3992_v21, %v2235_v13  ;;  %v2273_v45 = vadd.f32 %v3992_v21, %v2237_v47  ;;  %v2274_v24 = vadd.f32 %v3992_v21, %v2238_v25  ;;  %v2208_v12 = vld [vmem:[#allocation2 + $0x60] sm:$0xff]  ;;  %v2275_v61 = vadd.f32 %v3992_v21, %v2239_v46  ;;  %v2210_v37 = vld [vmem:[#allocation2 + $0x70] sm:$0xff]  ;;  %v2211_v7 = vld [vmem:[#allocation2 + $0x78] sm:$0xff] }
 0x36e   : > { %v2272_v4 = vadd.f32 %v3992_v21, %v2236_v22  ;;  %v2300_v9 = vmax.f32 %v2268_v18, 0.0  ;;  %v2301_v63 = vmax.f32 %v2269_v0, 0.0  ;;  %v2302_v11 = vmax.f32 %v2270_v15, 0.0  ;;  %v2212_v38 = vld [vmem:[#allocation2 + $0x80] sm:$0xff]  ;;  %v2213_v29 = vld [vmem:[#allocation2 + $0x88] sm:$0xff]  ;;  %v2214_v1 = vld [vmem:[#allocation2 + $0x90] sm:$0xff] }
 0x36f   : > { %v2303_v54 = vmax.f32 %v2271_v36, 0.0  ;;  %v2305_v40 = vmax.f32 %v2273_v45, 0.0  ;;  %v2240_v42 = vmul.f32 %v3987_v52, %v2204_v53  ;;  %v2241_v43 = vmul.f32 %v3987_v52, %v2205_v33  ;;  %v2215_v23 = vld [vmem:[#allocation2 + $0x98] sm:$0xff]  ;;  %v2216_v55 = vld [vmem:[#allocation2 + $0xa0] sm:$0xff]  ;;  %v2217_v26 = vld [vmem:[#allocation2 + $0xa8] sm:$0xff] }
 0x370   : > { %2332 = vst.msk [vmem:[%s2922_s6] sm:$0xff] %vm2159_vm3, %v2300_v9  ;;  %v2304_v16 = vmax.f32 %v2272_v4, 0.0  ;;  %v2306_v6 = vmax.f32 %v2274_v24, 0.0  ;;  %v2242_v57 = vmul.f32 %v3987_v52, %v2206_v19  ;;  %v2243_v60 = vmul.f32 %v3987_v52, %v2207_v56  ;;  %v2218_v13 = vld [vmem:[#allocation2 + $0xb0] sm:$0xff]  ;;  %v2219_v2 = vld [vmem:[#allocation2 + $0xb8] sm:$0xff]  ;;  %v2220_v25 = vld [vmem:[#allocation2 + $0xc0] sm:$0xff] }
 0x371   : > { %2333 = vst.msk [vmem:[%s2922_s6 + $0x8] sm:$0xff] %vm2159_vm3, %v2301_v63  ;;  %v2244_v62 = vmul.f32 %v3987_v52, %v2208_v12  ;;  %v2276_v27 = vadd.f32 %v3992_v21, %v2240_v42  ;;  %v2277_v31 = vadd.f32 %v3992_v21, %v2241_v43  ;;  %v2245_v32 = vmul.f32 %v3987_v52, %v2209_v8  ;;  %v2221_v46 = vld [vmem:[#allocation2 + $0xc8] sm:$0xff]  ;;  %v2222_v63 = vld [vmem:[#allocation2 + $0xd0] sm:$0xff]  ;;  %v2223_v56 = vld [vmem:[#allocation2 + $0xd8] sm:$0xff] }
 0x372   : > { %2334 = vst.msk [vmem:[%s2922_s6 + $0x10] sm:$0xff] %vm2159_vm3, %v2302_v11  ;;  %v2246_v50 = vmul.f32 %v3987_v52, %v2210_v37  ;;  %v2307_v49 = vmax.f32 %v2275_v61, 0.0  ;;  %v2278_v44 = vadd.f32 %v3992_v21, %v2242_v57  ;;  %v2279_v28 = vadd.f32 %v3992_v21, %v2243_v60  ;;  %v2224_v61 = vld [vmem:[#allocation2 + $0xe0] sm:$0xff] }
 0x373   : > { %2335 = vst.msk [vmem:[%s2922_s6 + $0x18] sm:$0xff] %vm2159_vm3, %v2303_v54  ;;  %v2247_v58 = vmul.f32 %v3987_v52, %v2211_v7  ;;  %v2308_v14 = vmax.f32 %v2276_v27, 0.0  ;;  %v2280_v3 = vadd.f32 %v3992_v21, %v2244_v62  ;;  %v2309_v5 = vmax.f32 %v2277_v31, 0.0  ;;  %v2227_v27 = vld [vmem:[#allocation2 + $0xf8] sm:$0xff] }
 0x374   : > { %2336 = vst.msk [vmem:[%s2922_s6 + $0x20] sm:$0xff] %vm2159_vm3, %v2304_v16  ;;  %v2281_v59 = vadd.f32 %v3992_v21, %v2245_v32  ;;  %v2310_v48 = vmax.f32 %v2278_v44, 0.0  ;;  %v2282_v17 = vadd.f32 %v3992_v21, %v2246_v50  ;;  %v2248_v34 = vmul.f32 %v3987_v52, %v2212_v38 }
 0x375   : > { %2337 = vst.msk [vmem:[%s2922_s6 + $0x28] sm:$0xff] %vm2159_vm3, %v2305_v40  ;;  %v2249_v51 = vmul.f32 %v3987_v52, %v2213_v29  ;;  %v2311_v20 = vmax.f32 %v2279_v28, 0.0  ;;  %v2283_v35 = vadd.f32 %v3992_v21, %v2247_v58  ;;  %v2250_v39 = vmul.f32 %v3987_v52, %v2214_v1  ;;  %v2225_v40 = vld [vmem:[#allocation2 + $0xe8] sm:$0xff] }
 0x376   : > { %2338 = vst.msk [vmem:[%s2922_s6 + $0x30] sm:$0xff] %vm2159_vm3, %v2306_v6  ;;  %v2251_v41 = vmul.f32 %v3987_v52, %v2215_v23  ;;  %v2312_v22 = vmax.f32 %v2280_v3, 0.0  ;;  %v2284_v30 = vadd.f32 %v3992_v21, %v2248_v34  ;;  %v2252_v10 = vmul.f32 %v3987_v52, %v2216_v55  ;;  %v2226_v6 = vld [vmem:[#allocation2 + $0xf0] sm:$0xff] }
 0x377   : > { %2339 = vst.msk [vmem:[%s2922_s6 + $0x38] sm:$0xff] %vm2159_vm3, %v2307_v49  ;;  %v2313_v18 = vmax.f32 %v2281_v59, 0.0  ;;  %v2285_v0 = vadd.f32 %v3992_v21, %v2249_v51  ;;  %v2253_v47 = vmul.f32 %v3987_v52, %v2217_v26  ;;  %v2314_v15 = vmax.f32 %v2282_v17, 0.0 }
 0x378   : > { %2340 = vst.msk [vmem:[%s2922_s6 + $0x40] sm:$0xff] %vm2159_vm3, %v2308_v14  ;;  %v2286_v36 = vadd.f32 %v3992_v21, %v2250_v39  ;;  %v2254_v4 = vmul.f32 %v3987_v52, %v2218_v13  ;;  %v2315_v53 = vmax.f32 %v2283_v35, 0.0  ;;  %v2287_v33 = vadd.f32 %v3992_v21, %v2251_v41 }
 0x379   : > { %2341 = vst.msk [vmem:[%s2922_s6 + $0x48] sm:$0xff] %vm2159_vm3, %v2309_v5  ;;  %v2255_v9 = vmul.f32 %v3987_v52, %v2219_v2  ;;  %v2316_v45 = vmax.f32 %v2284_v30, 0.0  ;;  %v2288_v24 = vadd.f32 %v3992_v21, %v2252_v10  ;;  %v2256_v19 = vmul.f32 %v3987_v52, %v2220_v25 }
 0x37a   : > { %2342 = vst.msk [vmem:[%s2922_s6 + $0x50] sm:$0xff] %vm2159_vm3, %v2310_v48  ;;  %v2317_v12 = vmax.f32 %v2285_v0, 0.0  ;;  %v2289_v11 = vadd.f32 %v3992_v21, %v2253_v47  ;;  %v2257_v54 = vmul.f32 %v3987_v52, %v2221_v46  ;;  %v2318_v8 = vmax.f32 %v2286_v36, 0.0 }
 0x37b   : > { %2343 = vst.msk [vmem:[%s2922_s6 + $0x58] sm:$0xff] %vm2159_vm3, %v2311_v20  ;;  %v2290_v37 = vadd.f32 %v3992_v21, %v2254_v4  ;;  %v2258_v16 = vmul.f32 %v3987_v52, %v2222_v63  ;;  %v2319_v42 = vmax.f32 %v2287_v33, 0.0  ;;  %v2291_v43 = vadd.f32 %v3992_v21, %v2255_v9 }
 0x37c   : > { %2344 = vst.msk [vmem:[%s2922_s6 + $0x60] sm:$0xff] %vm2159_vm3, %v2312_v22  ;;  %v2259_v7 = vmul.f32 %v3987_v52, %v2223_v56  ;;  %v2320_v57 = vmax.f32 %v2288_v24, 0.0  ;;  %v2292_v60 = vadd.f32 %v3992_v21, %v2256_v19  ;;  %v2260_v62 = vmul.f32 %v3987_v52, %v2224_v61 }
 0x37d   : > { %2345 = vst.msk [vmem:[%s2922_s6 + $0x68] sm:$0xff] %vm2159_vm3, %v2313_v18  ;;  %v2321_v31 = vmax.f32 %v2289_v11, 0.0  ;;  %v2293_v32 = vadd.f32 %v3992_v21, %v2257_v54  ;;  %v2261_v50 = vmul.f32 %v3987_v52, %v2225_v40  ;;  %v2322_v49 = vmax.f32 %v2290_v37, 0.0 }
 0x37e   : > { %2346 = vst.msk [vmem:[%s2922_s6 + $0x70] sm:$0xff] %vm2159_vm3, %v2314_v15  ;;  %v2294_v44 = vadd.f32 %v3992_v21, %v2258_v16  ;;  %v2262_v28 = vmul.f32 %v3987_v52, %v2226_v6  ;;  %v2323_v58 = vmax.f32 %v2291_v43, 0.0  ;;  %v2295_v38 = vadd.f32 %v3992_v21, %v2259_v7 }
 0x37f   : > { %2347 = vst.msk [vmem:[%s2922_s6 + $0x78] sm:$0xff] %vm2159_vm3, %v2315_v53  ;;  %v2263_v29 = vmul.f32 %v3987_v52, %v2227_v27  ;;  %v2324_v14 = vmax.f32 %v2292_v60, 0.0  ;;  %v2296_v3 = vadd.f32 %v3992_v21, %v2260_v62  ;;  %v2325_v1 = vmax.f32 %v2293_v32, 0.0 }
 0x380   : > { %2348 = vst.msk [vmem:[%s2922_s6 + $0x80] sm:$0xff] %vm2159_vm3, %v2316_v45  ;;  %v2297_v23 = vadd.f32 %v3992_v21, %v2261_v50  ;;  %v2326_v5 = vmax.f32 %v2294_v44, 0.0  ;;  %v2298_v52 = vadd.f32 %v3992_v21, %v2262_v28  ;;  %v2327_v59 = vmax.f32 %v2295_v38, 0.0 }
 0x381   : > { %2349 = vst.msk [vmem:[%s2922_s6 + $0x88] sm:$0xff] %vm2159_vm3, %v2317_v12  ;;  %v2299_v55 = vadd.f32 %v3992_v21, %v2263_v29  ;;  %v2328_v48 = vmax.f32 %v2296_v3, 0.0 }
 0x382   : > { %2350 = vst.msk [vmem:[%s2922_s6 + $0x90] sm:$0xff] %vm2159_vm3, %v2318_v8  ;;  %v2329_v17 = vmax.f32 %v2297_v23, 0.0  ;;  %v2330_v34 = vmax.f32 %v2298_v52, 0.0 }
 0x383   : > { %2351 = vst.msk [vmem:[%s2922_s6 + $0x98] sm:$0xff] %vm2159_vm3, %v2319_v42  ;;  %v2331_v51 = vmax.f32 %v2299_v55, 0.0 }
 0x384   : > { %2352 = vst.msk [vmem:[%s2922_s6 + $0xa0] sm:$0xff] %vm2159_vm3, %v2320_v57 }
 0x385   : > { %2353 = vst.msk [vmem:[%s2922_s6 + $0xa8] sm:$0xff] %vm2159_vm3, %v2321_v31 }
 0x386   : > { %2354 = vst.msk [vmem:[%s2922_s6 + $0xb0] sm:$0xff] %vm2159_vm3, %v2322_v49 }
 0x387   : > { %2355 = vst.msk [vmem:[%s2922_s6 + $0xb8] sm:$0xff] %vm2159_vm3, %v2323_v58 }
 0x388   : > { %2356 = vst.msk [vmem:[%s2922_s6 + $0xc0] sm:$0xff] %vm2159_vm3, %v2324_v14 }
 0x389   : > { %2357 = vst.msk [vmem:[%s2922_s6 + $0xc8] sm:$0xff] %vm2159_vm3, %v2325_v1 }
 0x38a   : > { %2358 = vst.msk [vmem:[%s2922_s6 + $0xd0] sm:$0xff] %vm2159_vm3, %v2326_v5 }
 0x38b   : > { %2359 = vst.msk [vmem:[%s2922_s6 + $0xd8] sm:$0xff] %vm2159_vm3, %v2327_v59 }
 0x38c   : > { %2360 = vst.msk [vmem:[%s2922_s6 + $0xe0] sm:$0xff] %vm2159_vm3, %v2328_v48 }
 0x38d   : > { %2361 = vst.msk [vmem:[%s2922_s6 + $0xe8] sm:$0xff] %vm2159_vm3, %v2329_v17 }
 0x38e   : > { %2362 = vst.msk [vmem:[%s2922_s6 + $0xf0] sm:$0xff] %vm2159_vm3, %v2330_v34 }
 0x38f   : > { %2363 = vst.msk [vmem:[%s2922_s6 + $0xf8] sm:$0xff] %vm2159_vm3, %v2331_v51 }
 0x390 PF: > { %s14_s21 = sadd.s32 1, %s2707_s21   ;;  %s4292_s15 = smov %s2687_s16 }
 0x391   : > { %p11_p0 = scmp.ge.s32.totalorder %s14_s21, 6   ;;  %s4293_s16 = smov %s2786_s28 }
 0x392   : > { %s4294_s17 = smov %s2699_s19  ;;  %s4295_s18 = smov %s2703_s20 }
 0x393   : > { %s4296_s19 = smov %s4299_s22  ;;  %s4297_s20 = smov %s4303_s23 }
 0x394   :  { %13 = sbr.rel (!%p11_p0) target bundleno = 4 (0x4), region = 126 }

</bundles_post_ra>
